<compile_context>
chip_gen: v5e
topology: v5e:2x2
jax: 0.10.0
libtpu: 0.0.40
codegen_flags: <defaults>
</compile_context>

<pallas_src>
import functools
import math

import jax
import jax.numpy as jnp
from jax import lax
from jax.experimental import pallas as pl
from jax.experimental.pallas import tpu as pltpu  # noqa: F401  (kept for TPU-specific tuning hooks)

# ---------------- small synthetic config ----------------
B = 2
SEQ_LEN = 16
PRED_LEN = 8
ENC_IN = 4                                   # M (number of variates)
D_MODEL = 32
PATCH_LEN = 4
STRIDE = 4
PATCH_NUM = (SEQ_LEN - PATCH_LEN) // STRIDE + 1   # N = 4
D_STATE = 8
D_CONV = 4
EXPAND = 1
D_INNER = EXPAND * D_MODEL
DT_RANK = math.ceil(D_MODEL / 16)
D_FF = 64
E_LAYERS = 1
HEAD_NF = D_MODEL * PATCH_NUM


# ---------------- in-kernel math helpers (operate on values, not refs) ----------------
def _layer_norm(x, g, b, eps=1e-5):
    mu = jnp.mean(x, axis=-1, keepdims=True)
    xc = x - mu
    var = jnp.mean(xc * xc, axis=-1, keepdims=True)
    return xc * lax.rsqrt(var + eps) * g + b


def _softplus(x):
    # F.softplus with threshold=20 (as used by Mamba for dt).
    sp = jnp.log(1.0 + jnp.exp(jnp.minimum(x, 20.0)))
    return jnp.where(x > 20.0, x, sp)


def _silu(x):
    return x * jax.nn.sigmoid(x)


# ---------------- kernel 1: RevIN + patch embedding ----------------
def _embed_kernel(x_ref, w_ref, b_ref, pos_ref, tok_ref, mu_ref, sd_ref, *,
                  n_patch, patch_len, stride):
    x = x_ref[...].astype(jnp.float32)                     # (R, L)
    mu = jnp.mean(x, axis=1, keepdims=True)                # (R, 1)
    xc = x - mu
    var = jnp.mean(xc * xc, axis=1, keepdims=True)         # unbiased=False
    sd = jnp.sqrt(var + 1e-5)
    xn = xc / sd
    # patches stacked time-major: row t*R + r
    pats = [xn[:, t * stride: t * stride + patch_len] for t in range(n_patch)]
    p = jnp.concatenate(pats, axis=0)                      # (N*R, patch_len)
    tok = jnp.dot(p, w_ref[...], preferred_element_type=jnp.float32)
    tok_ref[...] = (tok + b_ref[...] + pos_ref[...]).astype(tok_ref.dtype)
    mu_ref[...] = mu
    sd_ref[...] = sd


def revin_patch_embed(x_cl, w, b, pos_rep):
    R, L = x_cl.shape
    NR, Dm = pos_rep.shape
    flops = 2 * NR * PATCH_LEN * Dm + 8 * R * L
    bytes_acc = 4 * (R * L + PATCH_LEN * Dm + Dm + 2 * NR * Dm + 2 * R)
    return pl.pallas_call(
        functools.partial(_embed_kernel, n_patch=PATCH_NUM,
                          patch_len=PATCH_LEN, stride=STRIDE),
        out_shape=(
            jax.ShapeDtypeStruct((NR, Dm), jnp.float32),
            jax.ShapeDtypeStruct((R, 1), jnp.float32),
            jax.ShapeDtypeStruct((R, 1), jnp.float32),
        ),
        cost_estimate=pl.CostEstimate(flops=flops, transcendentals=R,
                                      bytes_accessed=bytes_acc),
    )(x_cl, w, b, pos_rep)


# ---------------- kernel 2: fused bidirectional-Mamba encoder layer ----------------
def _mamba_core(xin, z, conv_w, conv_b, proj_w, dt_b, a_t, d_vec,
                n_time, rows, reverse):
    """Single-direction Mamba inner block on VMEM values.

    xin, z : (n_time*rows, d_inner) in ORIGINAL time-major order (row = t*rows + r).
    The backward direction is handled by iterating time in reverse order (no flips).
    """
    d_inner = xin.shape[1]
    d_state = a_t.shape[0]
    k_conv = conv_w.shape[0]

    order = list(range(n_time))
    if reverse:
        order = order[::-1]
    u = [xin[t * rows:(t + 1) * rows, :] for t in order]      # processing order
    zg = [z[t * rows:(t + 1) * rows, :] for t in order]

    # causal depthwise conv + SiLU (list-index shifts == shifted adds, no rolls)
    xc = []
    for t in range(n_time):
        acc = conv_b
        for k in range(k_conv):
            src = t - (k_conv - 1) + k
            if src >= 0:
                acc = acc + u[src] * conv_w[k:k + 1, :]
        xc.append(_silu(acc))
    xc_all = jnp.concatenate(xc, axis=0)                      # (NT*R, Din)

    # fused x_proj with dt_proj folded in:  columns = [dt | B | C]
    proj = jnp.dot(xc_all, proj_w, preferred_element_type=jnp.float32)
    dt = _softplus(proj[:, :d_inner] + dt_b)                  # (NT*R, Din)
    b_all = proj[:, d_inner:d_inner + d_state]                # (NT*R, Ds)
    c_all = proj[:, d_inner + d_state:d_inner + 2 * d_state]  # (NT*R, Ds)

    # selective scan, vectorized over the state dimension
    h = jnp.zeros((rows, d_state, d_inner), jnp.float32)
    ys = []
    for t in range(n_time):
        sl = slice(t * rows, (t + 1) * rows)
        dt_t = dt[sl, :]                                      # (R, Din)
        u_t = xc[t]                                           # (R, Din)
        b_t = b_all[sl, :]                                    # (R, Ds)
        c_t = c_all[sl, :]                                    # (R, Ds)
        da = jnp.exp(dt_t[:, None, :] * a_t[None, :, :])      # (R, Ds, Din)
        dbu = (dt_t * u_t)[:, None, :] * b_t[:, :, None]      # (R, Ds, Din)
        h = h * da + dbu
        y_t = jnp.sum(h * c_t[:, :, None], axis=1) + d_vec * u_t
        ys.append(y_t * _silu(zg[t]))                         # SiLU(z) gate
    if reverse:
        ys = ys[::-1]                                         # back to original order
    return jnp.concatenate(ys, axis=0)                        # (NT*R, Din)


def _encoder_layer_kernel(x_ref, in_w_ref,
                          cw_f_ref, cb_f_ref, pw_f_ref, dtb_f_ref, at_f_ref, d_f_ref,
                          cw_b_ref, cb_b_ref, pw_b_ref, dtb_b_ref, at_b_ref, d_b_ref,
                          out_w_ref, g1_ref, b1_ref, w1_ref, fb1_ref, w2_ref, fb2_ref,
                          g2_ref, b2_ref, o_ref, *, n_time, rows):
    x = x_ref[...].astype(jnp.float32)                        # (NT*R, Dm)
    d_inner = d_f_ref.shape[1]

    # forward + backward in_proj fused into one lane-dense (Dm, 4*Din) matmul
    xz = jnp.dot(x, in_w_ref[...], preferred_element_type=jnp.float32)

    y_f = _mamba_core(xz[:, 0 * d_inner:1 * d_inner], xz[:, 1 * d_inner:2 * d_inner],
                      cw_f_ref[...], cb_f_ref[...], pw_f_ref[...], dtb_f_ref[...],
                      at_f_ref[...], d_f_ref[...], n_time, rows, reverse=False)
    y_b = _mamba_core(xz[:, 2 * d_inner:3 * d_inner], xz[:, 3 * d_inner:4 * d_inner],
                      cw_b_ref[...], cb_b_ref[...], pw_b_ref[...], dtb_b_ref[...],
                      at_b_ref[...], d_b_ref[...], n_time, rows, reverse=True)

    # out_proj of both directions fused into one K = 2*Din matmul
    new_x = jnp.dot(jnp.concatenate([y_f, y_b], axis=1), out_w_ref[...],
                    preferred_element_type=jnp.float32)

    x1 = x + new_x                                            # residual (residual == 1)
    x2 = _layer_norm(x1, g1_ref[...], b1_ref[...])            # norm1
    hdn = jnp.dot(x2, w1_ref[...], preferred_element_type=jnp.float32) + fb1_ref[...]
    hdn = jax.nn.gelu(hdn, approximate=True)  # TODO(synk): torch default GELU is exact (erf)
    hdn = jnp.dot(hdn, w2_ref[...], preferred_element_type=jnp.float32) + fb2_ref[...]
    o_ref[...] = _layer_norm(x2 + hdn, g2_ref[...], b2_ref[...]).astype(o_ref.dtype)


def encoder_layer(x_tok, lp, n_time, rows):
    NR, Dm = x_tok.shape
    d_inner = lp["f"]["D"].shape[1]
    d_state = lp["f"]["A_T"].shape[0]
    flops = (2 * NR * Dm * 4 * d_inner
             + 2 * (2 * NR * D_CONV * d_inner)
             + 2 * (2 * NR * d_inner * (d_inner + 2 * d_state))
             + 2 * (8 * NR * d_state * d_inner)
             + 2 * NR * 2 * d_inner * Dm
             + 2 * (2 * NR * Dm * D_FF)
             + 20 * NR * Dm)
    trans = 2 * NR * d_state * d_inner + 6 * NR * d_inner + NR * D_FF
    bytes_acc = 4 * (2 * NR * Dm + Dm * 4 * d_inner + 2 * d_inner * Dm
                     + 2 * (D_CONV * d_inner + d_inner * (d_inner + 2 * d_state)
                            + d_state * d_inner + 3 * d_inner)
                     + 2 * Dm * D_FF + D_FF + 5 * Dm)
    return pl.pallas_call(
        functools.partial(_encoder_layer_kernel, n_time=n_time, rows=rows),
        out_shape=jax.ShapeDtypeStruct((NR, Dm), jnp.float32),
        cost_estimate=pl.CostEstimate(flops=flops, transcendentals=trans,
                                      bytes_accessed=bytes_acc),
    )(x_tok, lp["in_w"],
      lp["f"]["conv_w"], lp["f"]["conv_b"], lp["f"]["proj_w"], lp["f"]["dt_b"],
      lp["f"]["A_T"], lp["f"]["D"],
      lp["b"]["conv_w"], lp["b"]["conv_b"], lp["b"]["proj_w"], lp["b"]["dt_b"],
      lp["b"]["A_T"], lp["b"]["D"],
      lp["out_w"], lp["norm1_g"], lp["norm1_b"], lp["ff1_w"], lp["ff1_b"],
      lp["ff2_w"], lp["ff2_b"], lp["norm2_g"], lp["norm2_b"])


# ---------------- kernel 3: final norm + Flatten_Head + RevIN de-norm ----------------
def _head_kernel(x_ref, g_ref, b_ref, hw_ref, hb_ref, mu_ref, sd_ref, o_ref, *,
                 n_time):
    x = x_ref[...].astype(jnp.float32)                        # (NT*R, Dm)
    rows = mu_ref.shape[0]
    xn = _layer_norm(x, g_ref[...], b_ref[...])               # encoder's final LayerNorm
    # Flatten_Head: (B*M, N, D) -> (B*M, N*D), N-major / D-minor (nn.Flatten(start_dim=-2))
    z = jnp.concatenate([xn[t * rows:(t + 1) * rows, :] for t in range(n_time)],
                        axis=1)                               # (R, N*Dm) = (R, 128)
    y = jnp.dot(z, hw_ref[...], preferred_element_type=jnp.float32) + hb_ref[...]
    # RevIN de-normalization fused into the head
    o_ref[...] = (y * sd_ref[...] + mu_ref[...]).astype(o_ref.dtype)


def head_denorm(x_tok, g, b, hw, hb, mu, sd, n_time):
    NR, Dm = x_tok.shape
    R = mu.shape[0]
    pred = hw.shape[1]
    flops = 2 * R * (n_time * Dm) * pred + 12 * NR * Dm
    bytes_acc = 4 * (NR * Dm + 2 * Dm + n_time * Dm * pred + pred + 2 * R + R * pred)
    return pl.pallas_call(
        functools.partial(_head_kernel, n_time=n_time),
        out_shape=jax.ShapeDtypeStruct((R, pred), jnp.float32),
        cost_estimate=pl.CostEstimate(flops=flops, transcendentals=0,
                                      bytes_accessed=bytes_acc),
    )(x_tok, g, b, hw, hb, mu, sd)


# ---------------- parameter packing (fuse weights, fold dt_proj into x_proj) ----------------
def _pack_mamba(p):
    a_mat = -jnp.exp(p["A_log"])                               # (Din, Ds)
    w_dt = p["x_proj_w"][:, :DT_RANK] @ p["dt_proj_w"]         # fold dt_proj into x_proj
    proj_w = jnp.concatenate([w_dt, p["x_proj_w"][:, DT_RANK:]], axis=1)
    return {
        "conv_w": p["conv_w"],                                 # (K, Din)
        "conv_b": p["conv_b"].reshape(1, -1),
        "proj_w": proj_w,                                      # (Din, Din + 2*Ds)
        "dt_b": p["dt_proj_b"].reshape(1, -1),
        "A_T": a_mat.T,                                        # (Ds, Din)
        "D": p["D"].reshape(1, -1),
    }


def _pack_layer(lp):
    pf, pb = lp["mamba_f"], lp["mamba_b"]
    return {
        "in_w": jnp.concatenate([pf["in_proj_w"], pb["in_proj_w"]], axis=1),    # (Dm, 4*Din)=(32,128)
        "out_w": jnp.concatenate([pf["out_proj_w"], pb["out_proj_w"]], axis=0), # (2*Din, Dm)
        "f": _pack_mamba(pf),
        "b": _pack_mamba(pb),
        "norm1_g": lp["norm1_g"].reshape(1, -1),
        "norm1_b": lp["norm1_b"].reshape(1, -1),
        "norm2_g": lp["norm2_g"].reshape(1, -1),
        "norm2_b": lp["norm2_b"].reshape(1, -1),
        "ff1_w": lp["ff1_w"], "ff1_b": lp["ff1_b"],
        "ff2_w": lp["ff2_w"], "ff2_b": lp["ff2_b"],
    }


# ---------------- model forward ----------------
def model_forward(params, x_enc, x_mark_enc=None, x_dec=None, x_mark_dec=None):
    Bb, L, M = x_enc.shape
    R = Bb * M
    # RevIN + patch embedding (x_mark_* unused since embed_type != 2)
    x_cl = jnp.transpose(x_enc, (0, 2, 1)).reshape(R, L)          # (B*M, L)
    pos_rep = jnp.repeat(params["patch"]["pos"], R, axis=0)       # row t*R+r -> pos[t]
    tok, mu, sd = revin_patch_embed(x_cl, params["patch"]["w"],
                                    params["patch"]["b"], pos_rep)
    # encoder: one fused Pallas call per layer (ch_ind=True path)
    for lp in params["layers"]:
        tok = encoder_layer(tok, _pack_layer(lp), PATCH_NUM, R)
    # final norm + Flatten_Head + RevIN de-norm fused
    dec = head_denorm(tok, params["enc_norm_g"].reshape(1, -1),
                      params["enc_norm_b"].reshape(1, -1),
                      params["head"]["head_w"], params["head"]["head_b"],
                      mu, sd, PATCH_NUM)                          # (B*M, pred_len)
    dec_out = jnp.transpose(dec.reshape(Bb, M, PRED_LEN), (0, 2, 1))[:, :, :M]
    return dec_out, None


# ---------------- deterministic parameter init ----------------
def init_params(key):
    keys = iter(jax.random.split(key, 64))

    def nrm(shape, scale=0.1):
        return scale * jax.random.normal(next(keys), shape, jnp.float32)

    def mamba_params():
        return {
            "in_proj_w": nrm((D_MODEL, 2 * D_INNER)),
            "conv_w": nrm((D_CONV, D_INNER)),
            "conv_b": nrm((D_INNER,)),
            "x_proj_w": nrm((D_INNER, DT_RANK + 2 * D_STATE)),
            "dt_proj_w": nrm((DT_RANK, D_INNER)),
            "dt_proj_b": nrm((D_INNER,)),
            "A_log": jnp.log(jnp.broadcast_to(
                jnp.arange(1, D_STATE + 1, dtype=jnp.float32), (D_INNER, D_STATE))),
            "D": jnp.ones((D_INNER,), jnp.float32),
            "out_proj_w": nrm((D_INNER, D_MODEL)),
        }

    layers = []
    for _ in range(E_LAYERS):
        layers.append({
            "mamba_f": mamba_params(),
            "mamba_b": mamba_params(),
            "norm1_g": jnp.ones((D_MODEL,), jnp.float32),
            "norm1_b": jnp.zeros((D_MODEL,), jnp.float32),
            "norm2_g": jnp.ones((D_MODEL,), jnp.float32),
            "norm2_b": jnp.zeros((D_MODEL,), jnp.float32),
            "ff1_w": nrm((D_MODEL, D_FF)), "ff1_b": jnp.zeros((1, D_FF), jnp.float32),
            "ff2_w": nrm((D_FF, D_MODEL)), "ff2_b": jnp.zeros((1, D_MODEL), jnp.float32),
        })

    return {
        "patch": {
            "w": nrm((PATCH_LEN, D_MODEL)),
            "b": jnp.zeros((1, D_MODEL), jnp.float32),
            "pos": nrm((PATCH_NUM, D_MODEL)),
        },
        "layers": layers,
        "enc_norm_g": jnp.ones((D_MODEL,), jnp.float32),
        "enc_norm_b": jnp.zeros((D_MODEL,), jnp.float32),
        "head": {
            "head_w": nrm((HEAD_NF, PRED_LEN)),
            "head_b": jnp.zeros((1, PRED_LEN), jnp.float32),
        },
    }


if __name__ == "__main__":
    key = jax.random.PRNGKey(0)
    pk, xk, mk = jax.random.split(key, 3)
    params = init_params(pk)

    x_enc = jax.random.normal(xk, (B, SEQ_LEN, ENC_IN), jnp.float32)
    x_mark_enc = jax.random.normal(mk, (B, SEQ_LEN, 4), jnp.float32)   # unused (embed_type != 2)
    x_dec = jnp.zeros((B, PRED_LEN, ENC_IN), jnp.float32)              # unused by forward
    x_mark_dec = jnp.zeros((B, PRED_LEN, 4), jnp.float32)              # unused by forward

    fwd = jax.jit(model_forward)
    out, _ = fwd(params, x_enc, x_mark_enc, x_dec, x_mark_dec)
    out = jax.block_until_ready(out)
    assert out.shape == (B, PRED_LEN, ENC_IN), out.shape
    assert bool(jnp.all(jnp.isfinite(out)))
    print("KERNEL_OK")
</pallas_src>

<mosaic_0001>
module attributes {stable_mosaic.version = 11 : i64} {
  func.func @_embed_kernel(%arg0: memref<8x16xf32, #tpu.memory_space<vmem>>, %arg1: memref<4x32xf32, #tpu.memory_space<vmem>>, %arg2: memref<1x32xf32, #tpu.memory_space<vmem>>, %arg3: memref<32x32xf32, #tpu.memory_space<vmem>>, %arg4: memref<32x32xf32, #tpu.memory_space<vmem>>, %arg5: memref<8x1xf32, #tpu.memory_space<vmem>>, %arg6: memref<8x1xf32, #tpu.memory_space<vmem>>) attributes {dimension_semantics = [], scalar_prefetch = 0 : i64, scratch_operands = 0 : i64, tpu.core_type = #tpu.core_type<tc>} {
    %c0 = arith.constant 0 : index
    %c0_0 = arith.constant 0 : index
    %0 = vector.load %arg0[%c0, %c0_0] : memref<8x16xf32, #tpu.memory_space<vmem>>, vector<8x16xf32>
    %cst = arith.constant dense<0.000000e+00> : vector<8xf32>
    %1 = vector.multi_reduction <add>, %0, %cst [1] : vector<8x16xf32> to vector<8xf32>
    %2 = vector.shape_cast %1 : vector<8xf32> to vector<8x1xf32>
    %cst_1 = arith.constant 1.600000e+01 : f32
    %3 = vector.broadcast %cst_1 : f32 to vector<8x1xf32>
    %4 = arith.divf %2, %3 : vector<8x1xf32>
    %5 = vector.broadcast %4 : vector<8x1xf32> to vector<8x16xf32>
    %6 = arith.subf %0, %5 : vector<8x16xf32>
    %7 = arith.mulf %6, %6 : vector<8x16xf32>
    %cst_2 = arith.constant dense<0.000000e+00> : vector<8xf32>
    %8 = vector.multi_reduction <add>, %7, %cst_2 [1] : vector<8x16xf32> to vector<8xf32>
    %9 = vector.shape_cast %8 : vector<8xf32> to vector<8x1xf32>
    %cst_3 = arith.constant 1.600000e+01 : f32
    %10 = vector.broadcast %cst_3 : f32 to vector<8x1xf32>
    %11 = arith.divf %9, %10 : vector<8x1xf32>
    %cst_4 = arith.constant 9.99999974E-6 : f32
    %12 = vector.broadcast %cst_4 : f32 to vector<8x1xf32>
    %13 = arith.addf %11, %12 : vector<8x1xf32>
    %14 = math.sqrt %13 : vector<8x1xf32>
    %15 = vector.broadcast %14 : vector<8x1xf32> to vector<8x16xf32>
    %16 = arith.divf %6, %15 : vector<8x16xf32>
    %17 = vector.extract_strided_slice %16 {offsets = [0, 0], sizes = [8, 4], strides = [1, 1]} : vector<8x16xf32> to vector<8x4xf32>
    %18 = vector.extract_strided_slice %16 {offsets = [0, 4], sizes = [8, 4], strides = [1, 1]} : vector<8x16xf32> to vector<8x4xf32>
    %19 = vector.extract_strided_slice %16 {offsets = [0, 8], sizes = [8, 4], strides = [1, 1]} : vector<8x16xf32> to vector<8x4xf32>
    %20 = vector.extract_strided_slice %16 {offsets = [0, 12], sizes = [8, 4], strides = [1, 1]} : vector<8x16xf32> to vector<8x4xf32>
    %21 = tpu.concatenate %17, %18, %19, %20 in 0 : vector<8x4xf32>, vector<8x4xf32>, vector<8x4xf32>, vector<8x4xf32> -> vector<32x4xf32>
    %c0_5 = arith.constant 0 : index
    %c0_6 = arith.constant 0 : index
    %22 = vector.load %arg1[%c0_5, %c0_6] : memref<4x32xf32, #tpu.memory_space<vmem>>, vector<4x32xf32>
    %cst_7 = arith.constant dense<0.000000e+00> : vector<32x32xf32>
    %23 = tpu.matmul %21, %22, %cst_7 {dimension_numbers = #tpu.dot_dimension_numbers<[1], [0], [0], [1], [0, 0, 1, 1], [], []>} : vector<32x4xf32>, vector<4x32xf32>, vector<32x32xf32> -> vector<32x32xf32>
    %c0_8 = arith.constant 0 : index
    %c0_9 = arith.constant 0 : index
    %24 = vector.load %arg2[%c0_8, %c0_9] : memref<1x32xf32, #tpu.memory_space<vmem>>, vector<1x32xf32>
    %25 = vector.broadcast %24 : vector<1x32xf32> to vector<32x32xf32>
    %26 = arith.addf %23, %25 : vector<32x32xf32>
    %c0_10 = arith.constant 0 : index
    %c0_11 = arith.constant 0 : index
    %27 = vector.load %arg3[%c0_10, %c0_11] : memref<32x32xf32, #tpu.memory_space<vmem>>, vector<32x32xf32>
    %28 = arith.addf %26, %27 : vector<32x32xf32>
    %c0_12 = arith.constant 0 : index
    %c0_13 = arith.constant 0 : index
    %29 = vector.load %arg4[%c0_12, %c0_13] : memref<32x32xf32, #tpu.memory_space<vmem>>, vector<32x32xf32>
    tpu.vector_store %arg4[%c0_12, %c0_13], %28 {strides = array<i32>} : memref<32x32xf32, #tpu.memory_space<vmem>>, vector<32x32xf32>,
    %c0_14 = arith.constant 0 : index
    %c0_15 = arith.constant 0 : index
    %30 = vector.load %arg5[%c0_14, %c0_15] : memref<8x1xf32, #tpu.memory_space<vmem>>, vector<8x1xf32>
    tpu.vector_store %arg5[%c0_14, %c0_15], %4 {strides = array<i32>} : memref<8x1xf32, #tpu.memory_space<vmem>>, vector<8x1xf32>,
    %c0_16 = arith.constant 0 : index
    %c0_17 = arith.constant 0 : index
    %31 = vector.load %arg6[%c0_16, %c0_17] : memref<8x1xf32, #tpu.memory_space<vmem>>, vector<8x1xf32>
    tpu.vector_store %arg6[%c0_16, %c0_17], %14 {strides = array<i32>} : memref<8x1xf32, #tpu.memory_space<vmem>>, vector<8x1xf32>,
    return
  }
}

module attributes {stable_mosaic.version = 11 : i64} {
  func.func @_head_kernel(%arg0: memref<32x32xf32, #tpu.memory_space<vmem>>, %arg1: memref<1x32xf32, #tpu.memory_space<vmem>>, %arg2: memref<1x32xf32, #tpu.memory_space<vmem>>, %arg3: memref<128x8xf32, #tpu.memory_space<vmem>>, %arg4: memref<1x8xf32, #tpu.memory_space<vmem>>, %arg5: memref<8x1xf32, #tpu.memory_space<vmem>>, %arg6: memref<8x1xf32, #tpu.memory_space<vmem>>, %arg7: memref<8x8xf32, #tpu.memory_space<vmem>>) attributes {dimension_semantics = [], scalar_prefetch = 0 : i64, scratch_operands = 0 : i64, tpu.core_type = #tpu.core_type<tc>} {
    %c0 = arith.constant 0 : index
    %c0_0 = arith.constant 0 : index
    %0 = vector.load %arg0[%c0, %c0_0] : memref<32x32xf32, #tpu.memory_space<vmem>>, vector<32x32xf32>
    %c0_1 = arith.constant 0 : index
    %c0_2 = arith.constant 0 : index
    %1 = vector.load %arg1[%c0_1, %c0_2] : memref<1x32xf32, #tpu.memory_space<vmem>>, vector<1x32xf32>
    %c0_3 = arith.constant 0 : index
    %c0_4 = arith.constant 0 : index
    %2 = vector.load %arg2[%c0_3, %c0_4] : memref<1x32xf32, #tpu.memory_space<vmem>>, vector<1x32xf32>
    %cst = arith.constant dense<0.000000e+00> : vector<32xf32>
    %3 = vector.multi_reduction <add>, %0, %cst [1] : vector<32x32xf32> to vector<32xf32>
    %4 = vector.shape_cast %3 : vector<32xf32> to vector<32x1xf32>
    %cst_5 = arith.constant 3.200000e+01 : f32
    %5 = vector.broadcast %cst_5 : f32 to vector<32x1xf32>
    %6 = arith.divf %4, %5 : vector<32x1xf32>
    %7 = vector.broadcast %6 : vector<32x1xf32> to vector<32x32xf32>
    %8 = arith.subf %0, %7 : vector<32x32xf32>
    %9 = arith.mulf %8, %8 : vector<32x32xf32>
    %cst_6 = arith.constant dense<0.000000e+00> : vector<32xf32>
    %10 = vector.multi_reduction <add>, %9, %cst_6 [1] : vector<32x32xf32> to vector<32xf32>
    %11 = vector.shape_cast %10 : vector<32xf32> to vector<32x1xf32>
    %cst_7 = arith.constant 3.200000e+01 : f32
    %12 = vector.broadcast %cst_7 : f32 to vector<32x1xf32>
    %13 = arith.divf %11, %12 : vector<32x1xf32>
    %cst_8 = arith.constant 9.99999974E-6 : f32
    %14 = vector.broadcast %cst_8 : f32 to vector<32x1xf32>
    %15 = arith.addf %13, %14 : vector<32x1xf32>
    %16 = math.rsqrt %15 : vector<32x1xf32>
    %17 = vector.broadcast %16 : vector<32x1xf32> to vector<32x32xf32>
    %18 = arith.mulf %8, %17 : vector<32x32xf32>
    %19 = vector.broadcast %1 : vector<1x32xf32> to vector<32x32xf32>
    %20 = arith.mulf %18, %19 : vector<32x32xf32>
    %21 = vector.broadcast %2 : vector<1x32xf32> to vector<32x32xf32>
    %22 = arith.addf %20, %21 : vector<32x32xf32>
    %23 = vector.extract_strided_slice %22 {offsets = [0, 0], sizes = [8, 32], strides = [1, 1]} : vector<32x32xf32> to vector<8x32xf32>
    %24 = vector.extract_strided_slice %22 {offsets = [8, 0], sizes = [8, 32], strides = [1, 1]} : vector<32x32xf32> to vector<8x32xf32>
    %25 = vector.extract_strided_slice %22 {offsets = [16, 0], sizes = [8, 32], strides = [1, 1]} : vector<32x32xf32> to vector<8x32xf32>
    %26 = vector.extract_strided_slice %22 {offsets = [24, 0], sizes = [8, 32], strides = [1, 1]} : vector<32x32xf32> to vector<8x32xf32>
    %27 = tpu.concatenate %23, %24, %25, %26 in 1 : vector<8x32xf32>, vector<8x32xf32>, vector<8x32xf32>, vector<8x32xf32> -> vector<8x128xf32>
    %c0_9 = arith.constant 0 : index
    %c0_10 = arith.constant 0 : index
    %28 = vector.load %arg3[%c0_9, %c0_10] : memref<128x8xf32, #tpu.memory_space<vmem>>, vector<128x8xf32>
    %cst_11 = arith.constant dense<0.000000e+00> : vector<8x8xf32>
    %29 = tpu.matmul %27, %28, %cst_11 {dimension_numbers = #tpu.dot_dimension_numbers<[1], [0], [0], [1], [0, 0, 1, 1], [], []>} : vector<8x128xf32>, vector<128x8xf32>, vector<8x8xf32> -> vector<8x8xf32>
    %c0_12 = arith.constant 0 : index
    %c0_13 = arith.constant 0 : index
    %30 = vector.load %arg4[%c0_12, %c0_13] : memref<1x8xf32, #tpu.memory_space<vmem>>, vector<1x8xf32>
    %31 = vector.broadcast %30 : vector<1x8xf32> to vector<8x8xf32>
    %32 = arith.addf %29, %31 : vector<8x8xf32>
    %c0_14 = arith.constant 0 : index
    %c0_15 = arith.constant 0 : index
    %33 = vector.load %arg6[%c0_14, %c0_15] : memref<8x1xf32, #tpu.memory_space<vmem>>, vector<8x1xf32>
    %34 = vector.broadcast %33 : vector<8x1xf32> to vector<8x8xf32>
    %35 = arith.mulf %32, %34 : vector<8x8xf32>
    %c0_16 = arith.constant 0 : index
    %c0_17 = arith.constant 0 : index
    %36 = vector.load %arg5[%c0_16, %c0_17] : memref<8x1xf32, #tpu.memory_space<vmem>>, vector<8x1xf32>
    %37 = vector.broadcast %36 : vector<8x1xf32> to vector<8x8xf32>
    %38 = arith.addf %35, %37 : vector<8x8xf32>
    %c0_18 = arith.constant 0 : index
    %c0_19 = arith.constant 0 : index
    %39 = vector.load %arg7[%c0_18, %c0_19] : memref<8x8xf32, #tpu.memory_space<vmem>>, vector<8x8xf32>
    tpu.vector_store %arg7[%c0_18, %c0_19], %38 {strides = array<i32>} : memref<8x8xf32, #tpu.memory_space<vmem>>, vector<8x8xf32>,
    return
  }
}

module attributes {stable_mosaic.version = 11 : i64} {
  func.func @_encoder_layer_kernel(%arg0: memref<32x32xf32, #tpu.memory_space<vmem>>, %arg1: memref<32x128xf32, #tpu.memory_space<vmem>>, %arg2: memref<4x32xf32, #tpu.memory_space<vmem>>, %arg3: memref<1x32xf32, #tpu.memory_space<vmem>>, %arg4: memref<32x48xf32, #tpu.memory_space<vmem>>, %arg5: memref<1x32xf32, #tpu.memory_space<vmem>>, %arg6: memref<8x32xf32, #tpu.memory_space<vmem>>, %arg7: memref<1x32xf32, #tpu.memory_space<vmem>>, %arg8: memref<4x32xf32, #tpu.memory_space<vmem>>, %arg9: memref<1x32xf32, #tpu.memory_space<vmem>>, %arg10: memref<32x48xf32, #tpu.memory_space<vmem>>, %arg11: memref<1x32xf32, #tpu.memory_space<vmem>>, %arg12: memref<8x32xf32, #tpu.memory_space<vmem>>, %arg13: memref<1x32xf32, #tpu.memory_space<vmem>>, %arg14: memref<64x32xf32, #tpu.memory_space<vmem>>, %arg15: memref<1x32xf32, #tpu.memory_space<vmem>>, %arg16: memref<1x32xf32, #tpu.memory_space<vmem>>, %arg17: memref<32x64xf32, #tpu.memory_space<vmem>>, %arg18: memref<1x64xf32, #tpu.memory_space<vmem>>, %arg19: memref<64x32xf32, #tpu.memory_space<vmem>>, %arg20: memref<1x32xf32, #tpu.memory_space<vmem>>, %arg21: memref<1x32xf32, #tpu.memory_space<vmem>>, %arg22: memref<1x32xf32, #tpu.memory_space<vmem>>, %arg23: memref<32x32xf32, #tpu.memory_space<vmem>>) attributes {dimension_semantics = [], scalar_prefetch = 0 : i64, scratch_operands = 0 : i64, tpu.core_type = #tpu.core_type<tc>} {
    %c0 = arith.constant 0 : index
    %c0_0 = arith.constant 0 : index
    %0 = vector.load %arg0[%c0, %c0_0] : memref<32x32xf32, #tpu.memory_space<vmem>>, vector<32x32xf32>
    %c0_1 = arith.constant 0 : index
    %c0_2 = arith.constant 0 : index
    %1 = vector.load %arg1[%c0_1, %c0_2] : memref<32x128xf32, #tpu.memory_space<vmem>>, vector<32x128xf32>
    %cst = arith.constant dense<0.000000e+00> : vector<32x128xf32>
    %2 = tpu.matmul %0, %1, %cst {dimension_numbers = #tpu.dot_dimension_numbers<[1], [0], [0], [1], [0, 0, 1, 1], [], []>} : vector<32x32xf32>, vector<32x128xf32>, vector<32x128xf32> -> vector<32x128xf32>
    %3 = vector.extract_strided_slice %2 {offsets = [0, 0], sizes = [32, 32], strides = [1, 1]} : vector<32x128xf32> to vector<32x32xf32>
    %4 = vector.extract_strided_slice %2 {offsets = [0, 32], sizes = [32, 32], strides = [1, 1]} : vector<32x128xf32> to vector<32x32xf32>
    %c0_3 = arith.constant 0 : index
    %c0_4 = arith.constant 0 : index
    %5 = vector.load %arg2[%c0_3, %c0_4] : memref<4x32xf32, #tpu.memory_space<vmem>>, vector<4x32xf32>
    %c0_5 = arith.constant 0 : index
    %c0_6 = arith.constant 0 : index
    %6 = vector.load %arg3[%c0_5, %c0_6] : memref<1x32xf32, #tpu.memory_space<vmem>>, vector<1x32xf32>
    %c0_7 = arith.constant 0 : index
    %c0_8 = arith.constant 0 : index
    %7 = vector.load %arg4[%c0_7, %c0_8] : memref<32x48xf32, #tpu.memory_space<vmem>>, vector<32x48xf32>
    %c0_9 = arith.constant 0 : index
    %c0_10 = arith.constant 0 : index
    %8 = vector.load %arg5[%c0_9, %c0_10] : memref<1x32xf32, #tpu.memory_space<vmem>>, vector<1x32xf32>
    %c0_11 = arith.constant 0 : index
    %c0_12 = arith.constant 0 : index
    %9 = vector.load %arg6[%c0_11, %c0_12] : memref<8x32xf32, #tpu.memory_space<vmem>>, vector<8x32xf32>
    %c0_13 = arith.constant 0 : index
    %c0_14 = arith.constant 0 : index
    %10 = vector.load %arg7[%c0_13, %c0_14] : memref<1x32xf32, #tpu.memory_space<vmem>>, vector<1x32xf32>
    %11 = vector.extract_strided_slice %3 {offsets = [0, 0], sizes = [8, 32], strides = [1, 1]} : vector<32x32xf32> to vector<8x32xf32>
    %12 = vector.extract_strided_slice %3 {offsets = [8, 0], sizes = [8, 32], strides = [1, 1]} : vector<32x32xf32> to vector<8x32xf32>
    %13 = vector.extract_strided_slice %3 {offsets = [16, 0], sizes = [8, 32], strides = [1, 1]} : vector<32x32xf32> to vector<8x32xf32>
    %14 = vector.extract_strided_slice %3 {offsets = [24, 0], sizes = [8, 32], strides = [1, 1]} : vector<32x32xf32> to vector<8x32xf32>
    %15 = vector.extract_strided_slice %4 {offsets = [0, 0], sizes = [8, 32], strides = [1, 1]} : vector<32x32xf32> to vector<8x32xf32>
    %16 = vector.extract_strided_slice %4 {offsets = [8, 0], sizes = [8, 32], strides = [1, 1]} : vector<32x32xf32> to vector<8x32xf32>
    %17 = vector.extract_strided_slice %4 {offsets = [16, 0], sizes = [8, 32], strides = [1, 1]} : vector<32x32xf32> to vector<8x32xf32>
    %18 = vector.extract_strided_slice %4 {offsets = [24, 0], sizes = [8, 32], strides = [1, 1]} : vector<32x32xf32> to vector<8x32xf32>
    %19 = vector.extract_strided_slice %5 {offsets = [3, 0], sizes = [1, 32], strides = [1, 1]} : vector<4x32xf32> to vector<1x32xf32>
    %20 = vector.broadcast %19 : vector<1x32xf32> to vector<8x32xf32>
    %21 = arith.mulf %11, %20 : vector<8x32xf32>
    %22 = vector.broadcast %6 : vector<1x32xf32> to vector<8x32xf32>
    %23 = arith.addf %22, %21 : vector<8x32xf32>
    %24 = arith.negf %23 : vector<8x32xf32>
    %25 = math.exp %24 : vector<8x32xf32>
    %cst_15 = arith.constant 1.000000e+00 : f32
    %26 = vector.broadcast %cst_15 : f32 to vector<8x32xf32>
    %27 = arith.addf %26, %25 : vector<8x32xf32>
    %28 = arith.divf %26, %27 : vector<8x32xf32>
    %29 = arith.mulf %23, %28 : vector<8x32xf32>
    %30 = vector.extract_strided_slice %5 {offsets = [2, 0], sizes = [1, 32], strides = [1, 1]} : vector<4x32xf32> to vector<1x32xf32>
    %31 = vector.broadcast %30 : vector<1x32xf32> to vector<8x32xf32>
    %32 = arith.mulf %11, %31 : vector<8x32xf32>
    %33 = vector.broadcast %6 : vector<1x32xf32> to vector<8x32xf32>
    %34 = arith.addf %33, %32 : vector<8x32xf32>
    %35 = vector.extract_strided_slice %5 {offsets = [3, 0], sizes = [1, 32], strides = [1, 1]} : vector<4x32xf32> to vector<1x32xf32>
    %36 = vector.broadcast %35 : vector<1x32xf32> to vector<8x32xf32>
    %37 = arith.mulf %12, %36 : vector<8x32xf32>
    %38 = arith.addf %34, %37 : vector<8x32xf32>
    %39 = arith.negf %38 : vector<8x32xf32>
    %40 = math.exp %39 : vector<8x32xf32>
    %cst_16 = arith.constant 1.000000e+00 : f32
    %41 = vector.broadcast %cst_16 : f32 to vector<8x32xf32>
    %42 = arith.addf %41, %40 : vector<8x32xf32>
    %43 = arith.divf %41, %42 : vector<8x32xf32>
    %44 = arith.mulf %38, %43 : vector<8x32xf32>
    %45 = vector.extract_strided_slice %5 {offsets = [1, 0], sizes = [1, 32], strides = [1, 1]} : vector<4x32xf32> to vector<1x32xf32>
    %46 = vector.broadcast %45 : vector<1x32xf32> to vector<8x32xf32>
    %47 = arith.mulf %11, %46 : vector<8x32xf32>
    %48 = vector.broadcast %6 : vector<1x32xf32> to vector<8x32xf32>
    %49 = arith.addf %48, %47 : vector<8x32xf32>
    %50 = vector.extract_strided_slice %5 {offsets = [2, 0], sizes = [1, 32], strides = [1, 1]} : vector<4x32xf32> to vector<1x32xf32>
    %51 = vector.broadcast %50 : vector<1x32xf32> to vector<8x32xf32>
    %52 = arith.mulf %12, %51 : vector<8x32xf32>
    %53 = arith.addf %49, %52 : vector<8x32xf32>
    %54 = vector.extract_strided_slice %5 {offsets = [3, 0], sizes = [1, 32], strides = [1, 1]} : vector<4x32xf32> to vector<1x32xf32>
    %55 = vector.broadcast %54 : vector<1x32xf32> to vector<8x32xf32>
    %56 = arith.mulf %13, %55 : vector<8x32xf32>
    %57 = arith.addf %53, %56 : vector<8x32xf32>
    %58 = arith.negf %57 : vector<8x32xf32>
    %59 = math.exp %58 : vector<8x32xf32>
    %cst_17 = arith.constant 1.000000e+00 : f32
    %60 = vector.broadcast %cst_17 : f32 to vector<8x32xf32>
    %61 = arith.addf %60, %59 : vector<8x32xf32>
    %62 = arith.divf %60, %61 : vector<8x32xf32>
    %63 = arith.mulf %57, %62 : vector<8x32xf32>
    %64 = vector.extract_strided_slice %5 {offsets = [0, 0], sizes = [1, 32], strides = [1, 1]} : vector<4x32xf32> to vector<1x32xf32>
    %65 = vector.broadcast %64 : vector<1x32xf32> to vector<8x32xf32>
    %66 = arith.mulf %11, %65 : vector<8x32xf32>
    %67 = vector.broadcast %6 : vector<1x32xf32> to vector<8x32xf32>
    %68 = arith.addf %67, %66 : vector<8x32xf32>
    %69 = vector.extract_strided_slice %5 {offsets = [1, 0], sizes = [1, 32], strides = [1, 1]} : vector<4x32xf32> to vector<1x32xf32>
    %70 = vector.broadcast %69 : vector<1x32xf32> to vector<8x32xf32>
    %71 = arith.mulf %12, %70 : vector<8x32xf32>
    %72 = arith.addf %68, %71 : vector<8x32xf32>
    %73 = vector.extract_strided_slice %5 {offsets = [2, 0], sizes = [1, 32], strides = [1, 1]} : vector<4x32xf32> to vector<1x32xf32>
    %74 = vector.broadcast %73 : vector<1x32xf32> to vector<8x32xf32>
    %75 = arith.mulf %13, %74 : vector<8x32xf32>
    %76 = arith.addf %72, %75 : vector<8x32xf32>
    %77 = vector.extract_strided_slice %5 {offsets = [3, 0], sizes = [1, 32], strides = [1, 1]} : vector<4x32xf32> to vector<1x32xf32>
    %78 = vector.broadcast %77 : vector<1x32xf32> to vector<8x32xf32>
    %79 = arith.mulf %14, %78 : vector<8x32xf32>
    %80 = arith.addf %76, %79 : vector<8x32xf32>
    %81 = arith.negf %80 : vector<8x32xf32>
    %82 = math.exp %81 : vector<8x32xf32>
    %cst_18 = arith.constant 1.000000e+00 : f32
    %83 = vector.broadcast %cst_18 : f32 to vector<8x32xf32>
    %84 = arith.addf %83, %82 : vector<8x32xf32>
    %85 = arith.divf %83, %84 : vector<8x32xf32>
    %86 = arith.mulf %80, %85 : vector<8x32xf32>
    %87 = tpu.concatenate %29, %44, %63, %86 in 0 : vector<8x32xf32>, vector<8x32xf32>, vector<8x32xf32>, vector<8x32xf32> -> vector<32x32xf32>
    %cst_19 = arith.constant dense<0.000000e+00> : vector<32x48xf32>
    %88 = tpu.matmul %87, %7, %cst_19 {dimension_numbers = #tpu.dot_dimension_numbers<[1], [0], [0], [1], [0, 0, 1, 1], [], []>} : vector<32x32xf32>, vector<32x48xf32>, vector<32x48xf32> -> vector<32x48xf32>
    %89 = vector.extract_strided_slice %88 {offsets = [0, 0], sizes = [32, 32], strides = [1, 1]} : vector<32x48xf32> to vector<32x32xf32>
    %90 = vector.broadcast %8 : vector<1x32xf32> to vector<32x32xf32>
    %91 = arith.addf %89, %90 : vector<32x32xf32>
    %cst_20 = arith.constant 2.000000e+01 : f32
    %92 = vector.broadcast %cst_20 : f32 to vector<32x32xf32>
    %93 = arith.minimumf %91, %92 : vector<32x32xf32>
    %94 = math.exp %93 : vector<32x32xf32>
    %cst_21 = arith.constant 1.000000e+00 : f32
    %95 = vector.broadcast %cst_21 : f32 to vector<32x32xf32>
    %96 = arith.addf %95, %94 : vector<32x32xf32>
    %97 = math.log %96 : vector<32x32xf32>
    %cst_22 = arith.constant 2.000000e+01 : f32
    %98 = vector.broadcast %cst_22 : f32 to vector<32x32xf32>
    %99 = arith.cmpf ogt, %91, %98 : vector<32x32xf32>
    %100 = arith.select %99, %91, %97 : vector<32x32xi1>, vector<32x32xf32>
    %101 = vector.extract_strided_slice %88 {offsets = [0, 32], sizes = [32, 8], strides = [1, 1]} : vector<32x48xf32> to vector<32x8xf32>
    %102 = vector.extract_strided_slice %88 {offsets = [0, 40], sizes = [32, 8], strides = [1, 1]} : vector<32x48xf32> to vector<32x8xf32>
    %cst_23 = arith.constant 0.000000e+00 : f32
    %103 = vector.broadcast %cst_23 : f32 to vector<8x8x32xf32>
    %104 = vector.extract_strided_slice %100 {offsets = [0, 0], sizes = [8, 32], strides = [1, 1]} : vector<32x32xf32> to vector<8x32xf32>
    %105 = vector.extract_strided_slice %101 {offsets = [0, 0], sizes = [8, 8], strides = [1, 1]} : vector<32x8xf32> to vector<8x8xf32>
    %106 = vector.extract_strided_slice %102 {offsets = [0, 0], sizes = [8, 8], strides = [1, 1]} : vector<32x8xf32> to vector<8x8xf32>
    %107 = vector.shape_cast %104 : vector<8x32xf32> to vector<8x1x32xf32>
    %108 = vector.shape_cast %9 : vector<8x32xf32> to vector<1x8x32xf32>
    %109 = vector.broadcast %107 : vector<8x1x32xf32> to vector<8x8x32xf32>
    %110 = vector.broadcast %108 : vector<1x8x32xf32> to vector<8x8x32xf32>
    %111 = arith.mulf %109, %110 : vector<8x8x32xf32>
    %112 = math.exp %111 : vector<8x8x32xf32>
    %113 = arith.mulf %104, %29 : vector<8x32xf32>
    %114 = vector.shape_cast %113 : vector<8x32xf32> to vector<8x1x32xf32>
    %115 = vector.shape_cast %105 : vector<8x8xf32> to vector<8x8x1xf32>
    %116 = vector.broadcast %114 : vector<8x1x32xf32> to vector<8x8x32xf32>
    %117 = vector.broadcast %115 : vector<8x8x1xf32> to vector<8x8x32xf32>
    %118 = arith.mulf %116, %117 : vector<8x8x32xf32>
    %119 = arith.mulf %103, %112 : vector<8x8x32xf32>
    %120 = arith.addf %119, %118 : vector<8x8x32xf32>
    %121 = vector.shape_cast %106 : vector<8x8xf32> to vector<8x8x1xf32>
    %122 = vector.broadcast %121 : vector<8x8x1xf32> to vector<8x8x32xf32>
    %123 = arith.mulf %120, %122 : vector<8x8x32xf32>
    %cst_24 = arith.constant dense<0.000000e+00> : vector<8x32xf32>
    %124 = vector.multi_reduction <add>, %123, %cst_24 [1] : vector<8x8x32xf32> to vector<8x32xf32>
    %125 = vector.broadcast %10 : vector<1x32xf32> to vector<8x32xf32>
    %126 = arith.mulf %125, %29 : vector<8x32xf32>
    %127 = arith.addf %124, %126 : vector<8x32xf32>
    %128 = arith.negf %15 : vector<8x32xf32>
    %129 = math.exp %128 : vector<8x32xf32>
    %cst_25 = arith.constant 1.000000e+00 : f32
    %130 = vector.broadcast %cst_25 : f32 to vector<8x32xf32>
    %131 = arith.addf %130, %129 : vector<8x32xf32>
    %132 = arith.divf %130, %131 : vector<8x32xf32>
    %133 = arith.mulf %15, %132 : vector<8x32xf32>
    %134 = arith.mulf %127, %133 : vector<8x32xf32>
    %135 = vector.extract_strided_slice %100 {offsets = [8, 0], sizes = [8, 32], strides = [1, 1]} : vector<32x32xf32> to vector<8x32xf32>
    %136 = vector.extract_strided_slice %101 {offsets = [8, 0], sizes = [8, 8], strides = [1, 1]} : vector<32x8xf32> to vector<8x8xf32>
    %137 = vector.extract_strided_slice %102 {offsets = [8, 0], sizes = [8, 8], strides = [1, 1]} : vector<32x8xf32> to vector<8x8xf32>
    %138 = vector.shape_cast %135 : vector<8x32xf32> to vector<8x1x32xf32>
    %139 = vector.shape_cast %9 : vector<8x32xf32> to vector<1x8x32xf32>
    %140 = vector.broadcast %138 : vector<8x1x32xf32> to vector<8x8x32xf32>
    %141 = vector.broadcast %139 : vector<1x8x32xf32> to vector<8x8x32xf32>
    %142 = arith.mulf %140, %141 : vector<8x8x32xf32>
    %143 = math.exp %142 : vector<8x8x32xf32>
    %144 = arith.mulf %135, %44 : vector<8x32xf32>
    %145 = vector.shape_cast %144 : vector<8x32xf32> to vector<8x1x32xf32>
    %146 = vector.shape_cast %136 : vector<8x8xf32> to vector<8x8x1xf32>
    %147 = vector.broadcast %145 : vector<8x1x32xf32> to vector<8x8x32xf32>
    %148 = vector.broadcast %146 : vector<8x8x1xf32> to vector<8x8x32xf32>
    %149 = arith.mulf %147, %148 : vector<8x8x32xf32>
    %150 = arith.mulf %120, %143 : vector<8x8x32xf32>
    %151 = arith.addf %150, %149 : vector<8x8x32xf32>
    %152 = vector.shape_cast %137 : vector<8x8xf32> to vector<8x8x1xf32>
    %153 = vector.broadcast %152 : vector<8x8x1xf32> to vector<8x8x32xf32>
    %154 = arith.mulf %151, %153 : vector<8x8x32xf32>
    %cst_26 = arith.constant dense<0.000000e+00> : vector<8x32xf32>
    %155 = vector.multi_reduction <add>, %154, %cst_26 [1] : vector<8x8x32xf32> to vector<8x32xf32>
    %156 = vector.broadcast %10 : vector<1x32xf32> to vector<8x32xf32>
    %157 = arith.mulf %156, %44 : vector<8x32xf32>
    %158 = arith.addf %155, %157 : vector<8x32xf32>
    %159 = arith.negf %16 : vector<8x32xf32>
    %160 = math.exp %159 : vector<8x32xf32>
    %cst_27 = arith.constant 1.000000e+00 : f32
    %161 = vector.broadcast %cst_27 : f32 to vector<8x32xf32>
    %162 = arith.addf %161, %160 : vector<8x32xf32>
    %163 = arith.divf %161, %162 : vector<8x32xf32>
    %164 = arith.mulf %16, %163 : vector<8x32xf32>
    %165 = arith.mulf %158, %164 : vector<8x32xf32>
    %166 = vector.extract_strided_slice %100 {offsets = [16, 0], sizes = [8, 32], strides = [1, 1]} : vector<32x32xf32> to vector<8x32xf32>
    %167 = vector.extract_strided_slice %101 {offsets = [16, 0], sizes = [8, 8], strides = [1, 1]} : vector<32x8xf32> to vector<8x8xf32>
    %168 = vector.extract_strided_slice %102 {offsets = [16, 0], sizes = [8, 8], strides = [1, 1]} : vector<32x8xf32> to vector<8x8xf32>
    %169 = vector.shape_cast %166 : vector<8x32xf32> to vector<8x1x32xf32>
    %170 = vector.shape_cast %9 : vector<8x32xf32> to vector<1x8x32xf32>
    %171 = vector.broadcast %169 : vector<8x1x32xf32> to vector<8x8x32xf32>
    %172 = vector.broadcast %170 : vector<1x8x32xf32> to vector<8x8x32xf32>
    %173 = arith.mulf %171, %172 : vector<8x8x32xf32>
    %174 = math.exp %173 : vector<8x8x32xf32>
    %175 = arith.mulf %166, %63 : vector<8x32xf32>
    %176 = vector.shape_cast %175 : vector<8x32xf32> to vector<8x1x32xf32>
    %177 = vector.shape_cast %167 : vector<8x8xf32> to vector<8x8x1xf32>
    %178 = vector.broadcast %176 : vector<8x1x32xf32> to vector<8x8x32xf32>
    %179 = vector.broadcast %177 : vector<8x8x1xf32> to vector<8x8x32xf32>
    %180 = arith.mulf %178, %179 : vector<8x8x32xf32>
    %181 = arith.mulf %151, %174 : vector<8x8x32xf32>
    %182 = arith.addf %181, %180 : vector<8x8x32xf32>
    %183 = vector.shape_cast %168 : vector<8x8xf32> to vector<8x8x1xf32>
    %184 = vector.broadcast %183 : vector<8x8x1xf32> to vector<8x8x32xf32>
    %185 = arith.mulf %182, %184 : vector<8x8x32xf32>
    %cst_28 = arith.constant dense<0.000000e+00> : vector<8x32xf32>
    %186 = vector.multi_reduction <add>, %185, %cst_28 [1] : vector<8x8x32xf32> to vector<8x32xf32>
    %187 = vector.broadcast %10 : vector<1x32xf32> to vector<8x32xf32>
    %188 = arith.mulf %187, %63 : vector<8x32xf32>
    %189 = arith.addf %186, %188 : vector<8x32xf32>
    %190 = arith.negf %17 : vector<8x32xf32>
    %191 = math.exp %190 : vector<8x32xf32>
    %cst_29 = arith.constant 1.000000e+00 : f32
    %192 = vector.broadcast %cst_29 : f32 to vector<8x32xf32>
    %193 = arith.addf %192, %191 : vector<8x32xf32>
    %194 = arith.divf %192, %193 : vector<8x32xf32>
    %195 = arith.mulf %17, %194 : vector<8x32xf32>
    %196 = arith.mulf %189, %195 : vector<8x32xf32>
    %197 = vector.extract_strided_slice %100 {offsets = [24, 0], sizes = [8, 32], strides = [1, 1]} : vector<32x32xf32> to vector<8x32xf32>
    %198 = vector.extract_strided_slice %101 {offsets = [24, 0], sizes = [8, 8], strides = [1, 1]} : vector<32x8xf32> to vector<8x8xf32>
    %199 = vector.extract_strided_slice %102 {offsets = [24, 0], sizes = [8, 8], strides = [1, 1]} : vector<32x8xf32> to vector<8x8xf32>
    %200 = vector.shape_cast %197 : vector<8x32xf32> to vector<8x1x32xf32>
    %201 = vector.shape_cast %9 : vector<8x32xf32> to vector<1x8x32xf32>
    %202 = vector.broadcast %200 : vector<8x1x32xf32> to vector<8x8x32xf32>
    %203 = vector.broadcast %201 : vector<1x8x32xf32> to vector<8x8x32xf32>
    %204 = arith.mulf %202, %203 : vector<8x8x32xf32>
    %205 = math.exp %204 : vector<8x8x32xf32>
    %206 = arith.mulf %197, %86 : vector<8x32xf32>
    %207 = vector.shape_cast %206 : vector<8x32xf32> to vector<8x1x32xf32>
    %208 = vector.shape_cast %198 : vector<8x8xf32> to vector<8x8x1xf32>
    %209 = vector.broadcast %207 : vector<8x1x32xf32> to vector<8x8x32xf32>
    %210 = vector.broadcast %208 : vector<8x8x1xf32> to vector<8x8x32xf32>
    %211 = arith.mulf %209, %210 : vector<8x8x32xf32>
    %212 = arith.mulf %182, %205 : vector<8x8x32xf32>
    %213 = arith.addf %212, %211 : vector<8x8x32xf32>
    %214 = vector.shape_cast %199 : vector<8x8xf32> to vector<8x8x1xf32>
    %215 = vector.broadcast %214 : vector<8x8x1xf32> to vector<8x8x32xf32>
    %216 = arith.mulf %213, %215 : vector<8x8x32xf32>
    %cst_30 = arith.constant dense<0.000000e+00> : vector<8x32xf32>
    %217 = vector.multi_reduction <add>, %216, %cst_30 [1] : vector<8x8x32xf32> to vector<8x32xf32>
    %218 = vector.broadcast %10 : vector<1x32xf32> to vector<8x32xf32>
    %219 = arith.mulf %218, %86 : vector<8x32xf32>
    %220 = arith.addf %217, %219 : vector<8x32xf32>
    %221 = arith.negf %18 : vector<8x32xf32>
    %222 = math.exp %221 : vector<8x32xf32>
    %cst_31 = arith.constant 1.000000e+00 : f32
    %223 = vector.broadcast %cst_31 : f32 to vector<8x32xf32>
    %224 = arith.addf %223, %222 : vector<8x32xf32>
    %225 = arith.divf %223, %224 : vector<8x32xf32>
    %226 = arith.mulf %18, %225 : vector<8x32xf32>
    %227 = arith.mulf %220, %226 : vector<8x32xf32>
    %228 = tpu.concatenate %134, %165, %196, %227 in 0 : vector<8x32xf32>, vector<8x32xf32>, vector<8x32xf32>, vector<8x32xf32> -> vector<32x32xf32>
    %229 = vector.extract_strided_slice %2 {offsets = [0, 64], sizes = [32, 32], strides = [1, 1]} : vector<32x128xf32> to vector<32x32xf32>
    %230 = vector.extract_strided_slice %2 {offsets = [0, 96], sizes = [32, 32], strides = [1, 1]} : vector<32x128xf32> to vector<32x32xf32>
    %c0_32 = arith.constant 0 : index
    %c0_33 = arith.constant 0 : index
    %231 = vector.load %arg8[%c0_32, %c0_33] : memref<4x32xf32, #tpu.memory_space<vmem>>, vector<4x32xf32>
    %c0_34 = arith.constant 0 : index
    %c0_35 = arith.constant 0 : index
    %232 = vector.load %arg9[%c0_34, %c0_35] : memref<1x32xf32, #tpu.memory_space<vmem>>, vector<1x32xf32>
    %c0_36 = arith.constant 0 : index
    %c0_37 = arith.constant 0 : index
    %233 = vector.load %arg10[%c0_36, %c0_37] : memref<32x48xf32, #tpu.memory_space<vmem>>, vector<32x48xf32>
    %c0_38 = arith.constant 0 : index
    %c0_39 = arith.constant 0 : index
    %234 = vector.load %arg11[%c0_38, %c0_39] : memref<1x32xf32, #tpu.memory_space<vmem>>, vector<1x32xf32>
    %c0_40 = arith.constant 0 : index
    %c0_41 = arith.constant 0 : index
    %235 = vector.load %arg12[%c0_40, %c0_41] : memref<8x32xf32, #tpu.memory_space<vmem>>, vector<8x32xf32>
    %c0_42 = arith.constant 0 : index
    %c0_43 = arith.constant 0 : index
    %236 = vector.load %arg13[%c0_42, %c0_43] : memref<1x32xf32, #tpu.memory_space<vmem>>, vector<1x32xf32>
    %237 = vector.extract_strided_slice %229 {offsets = [24, 0], sizes = [8, 32], strides = [1, 1]} : vector<32x32xf32> to vector<8x32xf32>
    %238 = vector.extract_strided_slice %229 {offsets = [16, 0], sizes = [8, 32], strides = [1, 1]} : vector<32x32xf32> to vector<8x32xf32>
    %239 = vector.extract_strided_slice %229 {offsets = [8, 0], sizes = [8, 32], strides = [1, 1]} : vector<32x32xf32> to vector<8x32xf32>
    %240 = vector.extract_strided_slice %229 {offsets = [0, 0], sizes = [8, 32], strides = [1, 1]} : vector<32x32xf32> to vector<8x32xf32>
    %241 = vector.extract_strided_slice %230 {offsets = [24, 0], sizes = [8, 32], strides = [1, 1]} : vector<32x32xf32> to vector<8x32xf32>
    %242 = vector.extract_strided_slice %230 {offsets = [16, 0], sizes = [8, 32], strides = [1, 1]} : vector<32x32xf32> to vector<8x32xf32>
    %243 = vector.extract_strided_slice %230 {offsets = [8, 0], sizes = [8, 32], strides = [1, 1]} : vector<32x32xf32> to vector<8x32xf32>
    %244 = vector.extract_strided_slice %230 {offsets = [0, 0], sizes = [8, 32], strides = [1, 1]} : vector<32x32xf32> to vector<8x32xf32>
    %245 = vector.extract_strided_slice %231 {offsets = [3, 0], sizes = [1, 32], strides = [1, 1]} : vector<4x32xf32> to vector<1x32xf32>
    %246 = vector.broadcast %245 : vector<1x32xf32> to vector<8x32xf32>
    %247 = arith.mulf %237, %246 : vector<8x32xf32>
    %248 = vector.broadcast %232 : vector<1x32xf32> to vector<8x32xf32>
    %249 = arith.addf %248, %247 : vector<8x32xf32>
    %250 = arith.negf %249 : vector<8x32xf32>
    %251 = math.exp %250 : vector<8x32xf32>
    %cst_44 = arith.constant 1.000000e+00 : f32
    %252 = vector.broadcast %cst_44 : f32 to vector<8x32xf32>
    %253 = arith.addf %252, %251 : vector<8x32xf32>
    %254 = arith.divf %252, %253 : vector<8x32xf32>
    %255 = arith.mulf %249, %254 : vector<8x32xf32>
    %256 = vector.extract_strided_slice %231 {offsets = [2, 0], sizes = [1, 32], strides = [1, 1]} : vector<4x32xf32> to vector<1x32xf32>
    %257 = vector.broadcast %256 : vector<1x32xf32> to vector<8x32xf32>
    %258 = arith.mulf %237, %257 : vector<8x32xf32>
    %259 = vector.broadcast %232 : vector<1x32xf32> to vector<8x32xf32>
    %260 = arith.addf %259, %258 : vector<8x32xf32>
    %261 = vector.extract_strided_slice %231 {offsets = [3, 0], sizes = [1, 32], strides = [1, 1]} : vector<4x32xf32> to vector<1x32xf32>
    %262 = vector.broadcast %261 : vector<1x32xf32> to vector<8x32xf32>
    %263 = arith.mulf %238, %262 : vector<8x32xf32>
    %264 = arith.addf %260, %263 : vector<8x32xf32>
    %265 = arith.negf %264 : vector<8x32xf32>
    %266 = math.exp %265 : vector<8x32xf32>
    %cst_45 = arith.constant 1.000000e+00 : f32
    %267 = vector.broadcast %cst_45 : f32 to vector<8x32xf32>
    %268 = arith.addf %267, %266 : vector<8x32xf32>
    %269 = arith.divf %267, %268 : vector<8x32xf32>
    %270 = arith.mulf %264, %269 : vector<8x32xf32>
    %271 = vector.extract_strided_slice %231 {offsets = [1, 0], sizes = [1, 32], strides = [1, 1]} : vector<4x32xf32> to vector<1x32xf32>
    %272 = vector.broadcast %271 : vector<1x32xf32> to vector<8x32xf32>
    %273 = arith.mulf %237, %272 : vector<8x32xf32>
    %274 = vector.broadcast %232 : vector<1x32xf32> to vector<8x32xf32>
    %275 = arith.addf %274, %273 : vector<8x32xf32>
    %276 = vector.extract_strided_slice %231 {offsets = [2, 0], sizes = [1, 32], strides = [1, 1]} : vector<4x32xf32> to vector<1x32xf32>
    %277 = vector.broadcast %276 : vector<1x32xf32> to vector<8x32xf32>
    %278 = arith.mulf %238, %277 : vector<8x32xf32>
    %279 = arith.addf %275, %278 : vector<8x32xf32>
    %280 = vector.extract_strided_slice %231 {offsets = [3, 0], sizes = [1, 32], strides = [1, 1]} : vector<4x32xf32> to vector<1x32xf32>
    %281 = vector.broadcast %280 : vector<1x32xf32> to vector<8x32xf32>
    %282 = arith.mulf %239, %281 : vector<8x32xf32>
    %283 = arith.addf %279, %282 : vector<8x32xf32>
    %284 = arith.negf %283 : vector<8x32xf32>
    %285 = math.exp %284 : vector<8x32xf32>
    %cst_46 = arith.constant 1.000000e+00 : f32
    %286 = vector.broadcast %cst_46 : f32 to vector<8x32xf32>
    %287 = arith.addf %286, %285 : vector<8x32xf32>
    %288 = arith.divf %286, %287 : vector<8x32xf32>
    %289 = arith.mulf %283, %288 : vector<8x32xf32>
    %290 = vector.extract_strided_slice %231 {offsets = [0, 0], sizes = [1, 32], strides = [1, 1]} : vector<4x32xf32> to vector<1x32xf32>
    %291 = vector.broadcast %290 : vector<1x32xf32> to vector<8x32xf32>
    %292 = arith.mulf %237, %291 : vector<8x32xf32>
    %293 = vector.broadcast %232 : vector<1x32xf32> to vector<8x32xf32>
    %294 = arith.addf %293, %292 : vector<8x32xf32>
    %295 = vector.extract_strided_slice %231 {offsets = [1, 0], sizes = [1, 32], strides = [1, 1]} : vector<4x32xf32> to vector<1x32xf32>
    %296 = vector.broadcast %295 : vector<1x32xf32> to vector<8x32xf32>
    %297 = arith.mulf %238, %296 : vector<8x32xf32>
    %298 = arith.addf %294, %297 : vector<8x32xf32>
    %299 = vector.extract_strided_slice %231 {offsets = [2, 0], sizes = [1, 32], strides = [1, 1]} : vector<4x32xf32> to vector<1x32xf32>
    %300 = vector.broadcast %299 : vector<1x32xf32> to vector<8x32xf32>
    %301 = arith.mulf %239, %300 : vector<8x32xf32>
    %302 = arith.addf %298, %301 : vector<8x32xf32>
    %303 = vector.extract_strided_slice %231 {offsets = [3, 0], sizes = [1, 32], strides = [1, 1]} : vector<4x32xf32> to vector<1x32xf32>
    %304 = vector.broadcast %303 : vector<1x32xf32> to vector<8x32xf32>
    %305 = arith.mulf %240, %304 : vector<8x32xf32>
    %306 = arith.addf %302, %305 : vector<8x32xf32>
    %307 = arith.negf %306 : vector<8x32xf32>
    %308 = math.exp %307 : vector<8x32xf32>
    %cst_47 = arith.constant 1.000000e+00 : f32
    %309 = vector.broadcast %cst_47 : f32 to vector<8x32xf32>
    %310 = arith.addf %309, %308 : vector<8x32xf32>
    %311 = arith.divf %309, %310 : vector<8x32xf32>
    %312 = arith.mulf %306, %311 : vector<8x32xf32>
    %313 = tpu.concatenate %255, %270, %289, %312 in 0 : vector<8x32xf32>, vector<8x32xf32>, vector<8x32xf32>, vector<8x32xf32> -> vector<32x32xf32>
    %cst_48 = arith.constant dense<0.000000e+00> : vector<32x48xf32>
    %314 = tpu.matmul %313, %233, %cst_48 {dimension_numbers = #tpu.dot_dimension_numbers<[1], [0], [0], [1], [0, 0, 1, 1], [], []>} : vector<32x32xf32>, vector<32x48xf32>, vector<32x48xf32> -> vector<32x48xf32>
    %315 = vector.extract_strided_slice %314 {offsets = [0, 0], sizes = [32, 32], strides = [1, 1]} : vector<32x48xf32> to vector<32x32xf32>
    %316 = vector.broadcast %234 : vector<1x32xf32> to vector<32x32xf32>
    %317 = arith.addf %315, %316 : vector<32x32xf32>
    %cst_49 = arith.constant 2.000000e+01 : f32
    %318 = vector.broadcast %cst_49 : f32 to vector<32x32xf32>
    %319 = arith.minimumf %317, %318 : vector<32x32xf32>
    %320 = math.exp %319 : vector<32x32xf32>
    %cst_50 = arith.constant 1.000000e+00 : f32
    %321 = vector.broadcast %cst_50 : f32 to vector<32x32xf32>
    %322 = arith.addf %321, %320 : vector<32x32xf32>
    %323 = math.log %322 : vector<32x32xf32>
    %cst_51 = arith.constant 2.000000e+01 : f32
    %324 = vector.broadcast %cst_51 : f32 to vector<32x32xf32>
    %325 = arith.cmpf ogt, %317, %324 : vector<32x32xf32>
    %326 = arith.select %325, %317, %323 : vector<32x32xi1>, vector<32x32xf32>
    %327 = vector.extract_strided_slice %314 {offsets = [0, 32], sizes = [32, 8], strides = [1, 1]} : vector<32x48xf32> to vector<32x8xf32>
    %328 = vector.extract_strided_slice %314 {offsets = [0, 40], sizes = [32, 8], strides = [1, 1]} : vector<32x48xf32> to vector<32x8xf32>
    %cst_52 = arith.constant 0.000000e+00 : f32
    %329 = vector.broadcast %cst_52 : f32 to vector<8x8x32xf32>
    %330 = vector.extract_strided_slice %326 {offsets = [0, 0], sizes = [8, 32], strides = [1, 1]} : vector<32x32xf32> to vector<8x32xf32>
    %331 = vector.extract_strided_slice %327 {offsets = [0, 0], sizes = [8, 8], strides = [1, 1]} : vector<32x8xf32> to vector<8x8xf32>
    %332 = vector.extract_strided_slice %328 {offsets = [0, 0], sizes = [8, 8], strides = [1, 1]} : vector<32x8xf32> to vector<8x8xf32>
    %333 = vector.shape_cast %330 : vector<8x32xf32> to vector<8x1x32xf32>
    %334 = vector.shape_cast %235 : vector<8x32xf32> to vector<1x8x32xf32>
    %335 = vector.broadcast %333 : vector<8x1x32xf32> to vector<8x8x32xf32>
    %336 = vector.broadcast %334 : vector<1x8x32xf32> to vector<8x8x32xf32>
    %337 = arith.mulf %335, %336 : vector<8x8x32xf32>
    %338 = math.exp %337 : vector<8x8x32xf32>
    %339 = arith.mulf %330, %255 : vector<8x32xf32>
    %340 = vector.shape_cast %339 : vector<8x32xf32> to vector<8x1x32xf32>
    %341 = vector.shape_cast %331 : vector<8x8xf32> to vector<8x8x1xf32>
    %342 = vector.broadcast %340 : vector<8x1x32xf32> to vector<8x8x32xf32>
    %343 = vector.broadcast %341 : vector<8x8x1xf32> to vector<8x8x32xf32>
    %344 = arith.mulf %342, %343 : vector<8x8x32xf32>
    %345 = arith.mulf %329, %338 : vector<8x8x32xf32>
    %346 = arith.addf %345, %344 : vector<8x8x32xf32>
    %347 = vector.shape_cast %332 : vector<8x8xf32> to vector<8x8x1xf32>
    %348 = vector.broadcast %347 : vector<8x8x1xf32> to vector<8x8x32xf32>
    %349 = arith.mulf %346, %348 : vector<8x8x32xf32>
    %cst_53 = arith.constant dense<0.000000e+00> : vector<8x32xf32>
    %350 = vector.multi_reduction <add>, %349, %cst_53 [1] : vector<8x8x32xf32> to vector<8x32xf32>
    %351 = vector.broadcast %236 : vector<1x32xf32> to vector<8x32xf32>
    %352 = arith.mulf %351, %255 : vector<8x32xf32>
    %353 = arith.addf %350, %352 : vector<8x32xf32>
    %354 = arith.negf %241 : vector<8x32xf32>
    %355 = math.exp %354 : vector<8x32xf32>
    %cst_54 = arith.constant 1.000000e+00 : f32
    %356 = vector.broadcast %cst_54 : f32 to vector<8x32xf32>
    %357 = arith.addf %356, %355 : vector<8x32xf32>
    %358 = arith.divf %356, %357 : vector<8x32xf32>
    %359 = arith.mulf %241, %358 : vector<8x32xf32>
    %360 = arith.mulf %353, %359 : vector<8x32xf32>
    %361 = vector.extract_strided_slice %326 {offsets = [8, 0], sizes = [8, 32], strides = [1, 1]} : vector<32x32xf32> to vector<8x32xf32>
    %362 = vector.extract_strided_slice %327 {offsets = [8, 0], sizes = [8, 8], strides = [1, 1]} : vector<32x8xf32> to vector<8x8xf32>
    %363 = vector.extract_strided_slice %328 {offsets = [8, 0], sizes = [8, 8], strides = [1, 1]} : vector<32x8xf32> to vector<8x8xf32>
    %364 = vector.shape_cast %361 : vector<8x32xf32> to vector<8x1x32xf32>
    %365 = vector.shape_cast %235 : vector<8x32xf32> to vector<1x8x32xf32>
    %366 = vector.broadcast %364 : vector<8x1x32xf32> to vector<8x8x32xf32>
    %367 = vector.broadcast %365 : vector<1x8x32xf32> to vector<8x8x32xf32>
    %368 = arith.mulf %366, %367 : vector<8x8x32xf32>
    %369 = math.exp %368 : vector<8x8x32xf32>
    %370 = arith.mulf %361, %270 : vector<8x32xf32>
    %371 = vector.shape_cast %370 : vector<8x32xf32> to vector<8x1x32xf32>
    %372 = vector.shape_cast %362 : vector<8x8xf32> to vector<8x8x1xf32>
    %373 = vector.broadcast %371 : vector<8x1x32xf32> to vector<8x8x32xf32>
    %374 = vector.broadcast %372 : vector<8x8x1xf32> to vector<8x8x32xf32>
    %375 = arith.mulf %373, %374 : vector<8x8x32xf32>
    %376 = arith.mulf %346, %369 : vector<8x8x32xf32>
    %377 = arith.addf %376, %375 : vector<8x8x32xf32>
    %378 = vector.shape_cast %363 : vector<8x8xf32> to vector<8x8x1xf32>
    %379 = vector.broadcast %378 : vector<8x8x1xf32> to vector<8x8x32xf32>
    %380 = arith.mulf %377, %379 : vector<8x8x32xf32>
    %cst_55 = arith.constant dense<0.000000e+00> : vector<8x32xf32>
    %381 = vector.multi_reduction <add>, %380, %cst_55 [1] : vector<8x8x32xf32> to vector<8x32xf32>
    %382 = vector.broadcast %236 : vector<1x32xf32> to vector<8x32xf32>
    %383 = arith.mulf %382, %270 : vector<8x32xf32>
    %384 = arith.addf %381, %383 : vector<8x32xf32>
    %385 = arith.negf %242 : vector<8x32xf32>
    %386 = math.exp %385 : vector<8x32xf32>
    %cst_56 = arith.constant 1.000000e+00 : f32
    %387 = vector.broadcast %cst_56 : f32 to vector<8x32xf32>
    %388 = arith.addf %387, %386 : vector<8x32xf32>
    %389 = arith.divf %387, %388 : vector<8x32xf32>
    %390 = arith.mulf %242, %389 : vector<8x32xf32>
    %391 = arith.mulf %384, %390 : vector<8x32xf32>
    %392 = vector.extract_strided_slice %326 {offsets = [16, 0], sizes = [8, 32], strides = [1, 1]} : vector<32x32xf32> to vector<8x32xf32>
    %393 = vector.extract_strided_slice %327 {offsets = [16, 0], sizes = [8, 8], strides = [1, 1]} : vector<32x8xf32> to vector<8x8xf32>
    %394 = vector.extract_strided_slice %328 {offsets = [16, 0], sizes = [8, 8], strides = [1, 1]} : vector<32x8xf32> to vector<8x8xf32>
    %395 = vector.shape_cast %392 : vector<8x32xf32> to vector<8x1x32xf32>
    %396 = vector.shape_cast %235 : vector<8x32xf32> to vector<1x8x32xf32>
    %397 = vector.broadcast %395 : vector<8x1x32xf32> to vector<8x8x32xf32>
    %398 = vector.broadcast %396 : vector<1x8x32xf32> to vector<8x8x32xf32>
    %399 = arith.mulf %397, %398 : vector<8x8x32xf32>
    %400 = math.exp %399 : vector<8x8x32xf32>
    %401 = arith.mulf %392, %289 : vector<8x32xf32>
    %402 = vector.shape_cast %401 : vector<8x32xf32> to vector<8x1x32xf32>
    %403 = vector.shape_cast %393 : vector<8x8xf32> to vector<8x8x1xf32>
    %404 = vector.broadcast %402 : vector<8x1x32xf32> to vector<8x8x32xf32>
    %405 = vector.broadcast %403 : vector<8x8x1xf32> to vector<8x8x32xf32>
    %406 = arith.mulf %404, %405 : vector<8x8x32xf32>
    %407 = arith.mulf %377, %400 : vector<8x8x32xf32>
    %408 = arith.addf %407, %406 : vector<8x8x32xf32>
    %409 = vector.shape_cast %394 : vector<8x8xf32> to vector<8x8x1xf32>
    %410 = vector.broadcast %409 : vector<8x8x1xf32> to vector<8x8x32xf32>
    %411 = arith.mulf %408, %410 : vector<8x8x32xf32>
    %cst_57 = arith.constant dense<0.000000e+00> : vector<8x32xf32>
    %412 = vector.multi_reduction <add>, %411, %cst_57 [1] : vector<8x8x32xf32> to vector<8x32xf32>
    %413 = vector.broadcast %236 : vector<1x32xf32> to vector<8x32xf32>
    %414 = arith.mulf %413, %289 : vector<8x32xf32>
    %415 = arith.addf %412, %414 : vector<8x32xf32>
    %416 = arith.negf %243 : vector<8x32xf32>
    %417 = math.exp %416 : vector<8x32xf32>
    %cst_58 = arith.constant 1.000000e+00 : f32
    %418 = vector.broadcast %cst_58 : f32 to vector<8x32xf32>
    %419 = arith.addf %418, %417 : vector<8x32xf32>
    %420 = arith.divf %418, %419 : vector<8x32xf32>
    %421 = arith.mulf %243, %420 : vector<8x32xf32>
    %422 = arith.mulf %415, %421 : vector<8x32xf32>
    %423 = vector.extract_strided_slice %326 {offsets = [24, 0], sizes = [8, 32], strides = [1, 1]} : vector<32x32xf32> to vector<8x32xf32>
    %424 = vector.extract_strided_slice %327 {offsets = [24, 0], sizes = [8, 8], strides = [1, 1]} : vector<32x8xf32> to vector<8x8xf32>
    %425 = vector.extract_strided_slice %328 {offsets = [24, 0], sizes = [8, 8], strides = [1, 1]} : vector<32x8xf32> to vector<8x8xf32>
    %426 = vector.shape_cast %423 : vector<8x32xf32> to vector<8x1x32xf32>
    %427 = vector.shape_cast %235 : vector<8x32xf32> to vector<1x8x32xf32>
    %428 = vector.broadcast %426 : vector<8x1x32xf32> to vector<8x8x32xf32>
    %429 = vector.broadcast %427 : vector<1x8x32xf32> to vector<8x8x32xf32>
    %430 = arith.mulf %428, %429 : vector<8x8x32xf32>
    %431 = math.exp %430 : vector<8x8x32xf32>
    %432 = arith.mulf %423, %312 : vector<8x32xf32>
    %433 = vector.shape_cast %432 : vector<8x32xf32> to vector<8x1x32xf32>
    %434 = vector.shape_cast %424 : vector<8x8xf32> to vector<8x8x1xf32>
    %435 = vector.broadcast %433 : vector<8x1x32xf32> to vector<8x8x32xf32>
    %436 = vector.broadcast %434 : vector<8x8x1xf32> to vector<8x8x32xf32>
    %437 = arith.mulf %435, %436 : vector<8x8x32xf32>
    %438 = arith.mulf %408, %431 : vector<8x8x32xf32>
    %439 = arith.addf %438, %437 : vector<8x8x32xf32>
    %440 = vector.shape_cast %425 : vector<8x8xf32> to vector<8x8x1xf32>
    %441 = vector.broadcast %440 : vector<8x8x1xf32> to vector<8x8x32xf32>
    %442 = arith.mulf %439, %441 : vector<8x8x32xf32>
    %cst_59 = arith.constant dense<0.000000e+00> : vector<8x32xf32>
    %443 = vector.multi_reduction <add>, %442, %cst_59 [1] : vector<8x8x32xf32> to vector<8x32xf32>
    %444 = vector.broadcast %236 : vector<1x32xf32> to vector<8x32xf32>
    %445 = arith.mulf %444, %312 : vector<8x32xf32>
    %446 = arith.addf %443, %445 : vector<8x32xf32>
    %447 = arith.negf %244 : vector<8x32xf32>
    %448 = math.exp %447 : vector<8x32xf32>
    %cst_60 = arith.constant 1.000000e+00 : f32
    %449 = vector.broadcast %cst_60 : f32 to vector<8x32xf32>
    %450 = arith.addf %449, %448 : vector<8x32xf32>
    %451 = arith.divf %449, %450 : vector<8x32xf32>
    %452 = arith.mulf %244, %451 : vector<8x32xf32>
    %453 = arith.mulf %446, %452 : vector<8x32xf32>
    %454 = tpu.concatenate %453, %422, %391, %360 in 0 : vector<8x32xf32>, vector<8x32xf32>, vector<8x32xf32>, vector<8x32xf32> -> vector<32x32xf32>
    %455 = tpu.concatenate %228, %454 in 1 : vector<32x32xf32>, vector<32x32xf32> -> vector<32x64xf32>
    %c0_61 = arith.constant 0 : index
    %c0_62 = arith.constant 0 : index
    %456 = vector.load %arg14[%c0_61, %c0_62] : memref<64x32xf32, #tpu.memory_space<vmem>>, vector<64x32xf32>
    %cst_63 = arith.constant dense<0.000000e+00> : vector<32x32xf32>
    %457 = tpu.matmul %455, %456, %cst_63 {dimension_numbers = #tpu.dot_dimension_numbers<[1], [0], [0], [1], [0, 0, 1, 1], [], []>} : vector<32x64xf32>, vector<64x32xf32>, vector<32x32xf32> -> vector<32x32xf32>
    %458 = arith.addf %0, %457 : vector<32x32xf32>
    %c0_64 = arith.constant 0 : index
    %c0_65 = arith.constant 0 : index
    %459 = vector.load %arg15[%c0_64, %c0_65] : memref<1x32xf32, #tpu.memory_space<vmem>>, vector<1x32xf32>
    %c0_66 = arith.constant 0 : index
    %c0_67 = arith.constant 0 : index
    %460 = vector.load %arg16[%c0_66, %c0_67] : memref<1x32xf32, #tpu.memory_space<vmem>>, vector<1x32xf32>
    %cst_68 = arith.constant dense<0.000000e+00> : vector<32xf32>
    %461 = vector.multi_reduction <add>, %458, %cst_68 [1] : vector<32x32xf32> to vector<32xf32>
    %462 = vector.shape_cast %461 : vector<32xf32> to vector<32x1xf32>
    %cst_69 = arith.constant 3.200000e+01 : f32
    %463 = vector.broadcast %cst_69 : f32 to vector<32x1xf32>
    %464 = arith.divf %462, %463 : vector<32x1xf32>
    %465 = vector.broadcast %464 : vector<32x1xf32> to vector<32x32xf32>
    %466 = arith.subf %458, %465 : vector<32x32xf32>
    %467 = arith.mulf %466, %466 : vector<32x32xf32>
    %cst_70 = arith.constant dense<0.000000e+00> : vector<32xf32>
    %468 = vector.multi_reduction <add>, %467, %cst_70 [1] : vector<32x32xf32> to vector<32xf32>
    %469 = vector.shape_cast %468 : vector<32xf32> to vector<32x1xf32>
    %cst_71 = arith.constant 3.200000e+01 : f32
    %470 = vector.broadcast %cst_71 : f32 to vector<32x1xf32>
    %471 = arith.divf %469, %470 : vector<32x1xf32>
    %cst_72 = arith.constant 9.99999974E-6 : f32
    %472 = vector.broadcast %cst_72 : f32 to vector<32x1xf32>
    %473 = arith.addf %471, %472 : vector<32x1xf32>
    %474 = math.rsqrt %473 : vector<32x1xf32>
    %475 = vector.broadcast %474 : vector<32x1xf32> to vector<32x32xf32>
    %476 = arith.mulf %466, %475 : vector<32x32xf32>
    %477 = vector.broadcast %459 : vector<1x32xf32> to vector<32x32xf32>
    %478 = arith.mulf %476, %477 : vector<32x32xf32>
    %479 = vector.broadcast %460 : vector<1x32xf32> to vector<32x32xf32>
    %480 = arith.addf %478, %479 : vector<32x32xf32>
    %c0_73 = arith.constant 0 : index
    %c0_74 = arith.constant 0 : index
    %481 = vector.load %arg17[%c0_73, %c0_74] : memref<32x64xf32, #tpu.memory_space<vmem>>, vector<32x64xf32>
    %cst_75 = arith.constant dense<0.000000e+00> : vector<32x64xf32>
    %482 = tpu.matmul %480, %481, %cst_75 {dimension_numbers = #tpu.dot_dimension_numbers<[1], [0], [0], [1], [0, 0, 1, 1], [], []>} : vector<32x32xf32>, vector<32x64xf32>, vector<32x64xf32> -> vector<32x64xf32>
    %c0_76 = arith.constant 0 : index
    %c0_77 = arith.constant 0 : index
    %483 = vector.load %arg18[%c0_76, %c0_77] : memref<1x64xf32, #tpu.memory_space<vmem>>, vector<1x64xf32>
    %484 = vector.broadcast %483 : vector<1x64xf32> to vector<32x64xf32>
    %485 = arith.addf %482, %484 : vector<32x64xf32>
    %486 = arith.mulf %485, %485 : vector<32x64xf32>
    %487 = arith.mulf %485, %486 : vector<32x64xf32>
    %cst_78 = arith.constant 4.471500e-02 : f32
    %488 = vector.broadcast %cst_78 : f32 to vector<32x64xf32>
    %489 = arith.mulf %488, %487 : vector<32x64xf32>
    %490 = arith.addf %485, %489 : vector<32x64xf32>
    %cst_79 = arith.constant 0.797884583 : f32
    %491 = vector.broadcast %cst_79 : f32 to vector<32x64xf32>
    %492 = arith.mulf %491, %490 : vector<32x64xf32>
    %493 = math.tanh %492 : vector<32x64xf32>
    %cst_80 = arith.constant 1.000000e+00 : f32
    %494 = vector.broadcast %cst_80 : f32 to vector<32x64xf32>
    %495 = arith.addf %494, %493 : vector<32x64xf32>
    %cst_81 = arith.constant 5.000000e-01 : f32
    %496 = vector.broadcast %cst_81 : f32 to vector<32x64xf32>
    %497 = arith.mulf %496, %495 : vector<32x64xf32>
    %498 = arith.mulf %485, %497 : vector<32x64xf32>
    %c0_82 = arith.constant 0 : index
    %c0_83 = arith.constant 0 : index
    %499 = vector.load %arg19[%c0_82, %c0_83] : memref<64x32xf32, #tpu.memory_space<vmem>>, vector<64x32xf32>
    %cst_84 = arith.constant dense<0.000000e+00> : vector<32x32xf32>
    %500 = tpu.matmul %498, %499, %cst_84 {dimension_numbers = #tpu.dot_dimension_numbers<[1], [0], [0], [1], [0, 0, 1, 1], [], []>} : vector<32x64xf32>, vector<64x32xf32>, vector<32x32xf32> -> vector<32x32xf32>
    %c0_85 = arith.constant 0 : index
    %c0_86 = arith.constant 0 : index
    %501 = vector.load %arg20[%c0_85, %c0_86] : memref<1x32xf32, #tpu.memory_space<vmem>>, vector<1x32xf32>
    %502 = vector.broadcast %501 : vector<1x32xf32> to vector<32x32xf32>
    %503 = arith.addf %500, %502 : vector<32x32xf32>
    %504 = arith.addf %480, %503 : vector<32x32xf32>
    %c0_87 = arith.constant 0 : index
    %c0_88 = arith.constant 0 : index
    %505 = vector.load %arg21[%c0_87, %c0_88] : memref<1x32xf32, #tpu.memory_space<vmem>>, vector<1x32xf32>
    %c0_89 = arith.constant 0 : index
    %c0_90 = arith.constant 0 : index
    %506 = vector.load %arg22[%c0_89, %c0_90] : memref<1x32xf32, #tpu.memory_space<vmem>>, vector<1x32xf32>
    %cst_91 = arith.constant dense<0.000000e+00> : vector<32xf32>
    %507 = vector.multi_reduction <add>, %504, %cst_91 [1] : vector<32x32xf32> to vector<32xf32>
    %508 = vector.shape_cast %507 : vector<32xf32> to vector<32x1xf32>
    %cst_92 = arith.constant 3.200000e+01 : f32
    %509 = vector.broadcast %cst_92 : f32 to vector<32x1xf32>
    %510 = arith.divf %508, %509 : vector<32x1xf32>
    %511 = vector.broadcast %510 : vector<32x1xf32> to vector<32x32xf32>
    %512 = arith.subf %504, %511 : vector<32x32xf32>
    %513 = arith.mulf %512, %512 : vector<32x32xf32>
    %cst_93 = arith.constant dense<0.000000e+00> : vector<32xf32>
    %514 = vector.multi_reduction <add>, %513, %cst_93 [1] : vector<32x32xf32> to vector<32xf32>
    %515 = vector.shape_cast %514 : vector<32xf32> to vector<32x1xf32>
    %cst_94 = arith.constant 3.200000e+01 : f32
    %516 = vector.broadcast %cst_94 : f32 to vector<32x1xf32>
    %517 = arith.divf %515, %516 : vector<32x1xf32>
    %cst_95 = arith.constant 9.99999974E-6 : f32
    %518 = vector.broadcast %cst_95 : f32 to vector<32x1xf32>
    %519 = arith.addf %517, %518 : vector<32x1xf32>
    %520 = math.rsqrt %519 : vector<32x1xf32>
    %521 = vector.broadcast %520 : vector<32x1xf32> to vector<32x32xf32>
    %522 = arith.mulf %512, %521 : vector<32x32xf32>
    %523 = vector.broadcast %505 : vector<1x32xf32> to vector<32x32xf32>
    %524 = arith.mulf %522, %523 : vector<32x32xf32>
    %525 = vector.broadcast %506 : vector<1x32xf32> to vector<32x32xf32>
    %526 = arith.addf %524, %525 : vector<32x32xf32>
    %c0_96 = arith.constant 0 : index
    %c0_97 = arith.constant 0 : index
    %527 = vector.load %arg23[%c0_96, %c0_97] : memref<32x32xf32, #tpu.memory_space<vmem>>, vector<32x32xf32>
    tpu.vector_store %arg23[%c0_96, %c0_97], %526 {strides = array<i32>} : memref<32x32xf32, #tpu.memory_space<vmem>>, vector<32x32xf32>,
    return
  }
}

</mosaic_0001>

<bundles_post_ra>
// kernel: model_forward.3
= control target key start
LH: loop header
LB: loop body
LE: loop exit
PB: predicated region body
PF: predicated region fallthrough
CT: control target
= control target key end

     0   :  { %vm21_vm0 = vcmask 130048   ;;  %v168_v2 = vmov 16.0   ;;  %vm134_vm2 = vcmask 7168   ;;  %vm88_vm3 = vcmask 1043456   ;;  %s169_s26 = smov 124   ;;  %s170_s27 = smov 120   ;;  %s254_s0 = inlined_call_operand.vmem [shape: f32[8,16], index: 0, kind: input, shape index: {}]   ;;  %s255_s5 = inlined_call_operand.vmem [shape: f32[8,1], index: 5, kind: output, shape index: {1}]   ;;  %s256_s1 = inlined_call_operand.vmem [shape: f32[4,32], index: 1, kind: input, shape index: {}]   ;;  %s257_s6 = inlined_call_operand.vmem [shape: f32[8,1], index: 6, kind: output, shape index: {2}]   ;;  %s258_s2 = inlined_call_operand.vmem [shape: f32[1,32], index: 2, kind: input, shape index: {}]   ;;  %s259_s3 = inlined_call_operand.vmem [shape: f32[32,32], index: 3, kind: input, shape index: {}]   ;;  %s260_s4 = inlined_call_operand.vmem [shape: f32[32,32], index: 4, kind: output, shape index: {0}]  }
   0x1   :  { %v20_v0 = vld [vmem:[%s254_s0] sm:$0xff]  ;;  %162 = vrcp.f32 %v168_v2  ;;  %vm79_vm10 = vcmask 31744   ;;  %vm129_vm11 = vcmask 261120   ;;  %v122_v48 = vld [vmem:[%s259_s3 + $0x8] sm:$0xff]  ;;  %v123_v52 = vld [vmem:[%s259_s3 + $0x10] sm:$0xff] }
   0x2   :  { %v22_v1 = vsel %vm21_vm0, %v20_v0, 0.0  ;;  %v74_v14 = vld [vmem:[%s256_s1] sm:$0xf]  ;;  %v124_v56 = vld [vmem:[%s259_s3 + $0x18] sm:$0xff] }
   0x3   :  { %23 = vadd.xlane.f32.xlu0 %v22_v1  ;;  %149 = vmatpush.msk.msra.mxu0 %vm88_vm3, %v74_v14  ;;  %v161_v42 = vld [vmem:[%s258_s2] ss:$0 sm:$0xff] }
   0x4   :  { %154 = vmatpush.msk.msra.mxu1 %vm88_vm3, %v74_v14  ;;  %155 = vmatpush.msk.msra.mxu2 %vm88_vm3, %v74_v14  ;;  %v121_v44 = vld [vmem:[%s259_s3] sm:$0xff] }
   0x5   :  { %156 = vmatpush.msk.msra.mxu3 %vm88_vm3, %v74_v14 }
   0x7   :  { %v163_v3 = vpop.eup %162 }
   0x8   :  { %v26_v4 = vmul.f32 16.0, %v163_v3  ;;  %vm30_vm1 = vweird.f32 %v163_v3 }
   0xa   :  { %v27_v5 = vsub.f32 1.0, %v26_v4 }
   0xc   :  { %v28_v6 = vmul.f32 %v163_v3, %v27_v5 }
   0xe   :  { %v29_v7 = vadd.f32 %v163_v3, %v28_v6 }
  0x10   :  { %v31_v8 = vsel %vm30_vm1, %v163_v3, %v29_v7 }
  0x76   :  { %v24_v9 = vpop.xlane.xlu0 %23 }
  0x77   :  { %v32_v10 = vmul.f32 %v31_v8, %v24_v9 }
  0x79   :  { %v33_v11 = vsub.f32 %v20_v0, %v32_v10  ;;  %135 = vst.msk [vmem:[%s255_s5] sm:$0xff] %vm134_vm2, %v32_v10 }
  0x7b   :  { %v34_v12 = vmul.f32 %v33_v11, %v33_v11 }
  0x7d   :  { %v35_v13 = vsel %vm21_vm0, %v34_v12, 0.0 }
  0x7e   :  { %36 = vadd.xlane.f32.xlu0 %v35_v13 }
  0xf1   :  { %v37_v15 = vpop.xlane.xlu0 %36 }
  0xf2   :  { %v38_v16 = vmul.f32 %v37_v15, %v31_v8 }
  0xf4   :  { %v39_v17 = vadd.f32 1e-05, %v38_v16 }
  0xf6   :  { %164 = vrsqrt.f32 %v39_v17  ;;  %vm47_vm4 = vcmp.eq.f32.partialorder %v39_v17, inf  ;;  %v50_v25 = vand.u32 2147483648, %v39_v17  ;;  %vm49_vm5 = vcmp.eq.f32.partialorder %v39_v17, 0.0 }
  0xfc   :  { %v165_v18 = vpop.eup %164 }
  0xfd   :  { %v41_v19 = vmul.f32 %v165_v18, %v39_v17 }
  0xff   :  { %v42_v20 = vmul.f32 %v165_v18, %v41_v19 }
 0x101   :  { %v43_v21 = vmul.f32 0.5, %v42_v20 }
 0x103   :  { %v44_v22 = vsub.f32 1.5, %v43_v21 }
 0x105   :  { %v45_v23 = vmul.f32 %v165_v18, %v44_v22 }
 0x107   :  { %v46_v24 = vmul.f32 %v45_v23, %v39_v17 }
 0x109   :  { %v48_v26 = vsel %vm47_vm4, %v39_v17, %v46_v24 }
 0x10a   :  { %v51_v27 = vsel %vm49_vm5, %v50_v25, %v48_v26 }
 0x10b   :  { %166 = vrcp.f32 %v51_v27  ;;  %136 = vst.msk [vmem:[%s257_s6] sm:$0xff] %vm134_vm2, %v51_v27  ;;  %v63_v31 = vand.u32 2147483648, %v51_v27  ;;  %v61_v33 = vand.u32 2147483647, %v51_v27  ;;  %vm57_vm7 = vweird.f32 %v51_v27  ;;  %s171_s6 = smov 116  }
 0x10d   :  { %v64_v35 = vor.u32 1.1754944e-38, %v63_v31  ;;  %vm62_vm9 = vcmp.eq.f32.partialorder %v61_v33, 8.507059e+37 }
 0x111   :  { %v167_v28 = vpop.eup %166 }
 0x112   :  { %v53_v29 = vmul.f32 %v167_v28, %v51_v27  ;;  %vm58_vm6 = vweird.f32 %v167_v28 }
 0x113   :  { %vm59_vm8 = vmor %vm57_vm7, %vm58_vm6 }
 0x114   :  { %v54_v30 = vsub.f32 1.0, %v53_v29 }
 0x116   :  { %v55_v32 = vmul.f32 %v167_v28, %v54_v30 }
 0x118   :  { %v56_v34 = vadd.f32 %v167_v28, %v55_v32 }
 0x11a   :  { %v60_v36 = vsel %vm59_vm8, %v167_v28, %v56_v34 }
 0x11b   :  { %v65_v37 = vsel %vm62_vm9, %v64_v35, %v60_v36 }
 0x11c   :  { %v66_v38 = vmul.f32 %v65_v37, %v33_v11 }
 0x11e   :  { %68 = vrot.lane.b32.xlu2 %v66_v38, %s169_s26  ;;  %70 = vrot.lane.b32.xlu1 %v66_v38, %s170_s27 }
 0x11f   :  { %150 = vmatmul.msk.f32.vlgmr.msra.gmra.mxu0 %vm79_vm10, %v66_v38 }
 0x126   :  { %72 = vrot.lane.b32.xlu1 %v66_v38, %s171_s6 }
 0x178   :  { %v69_v39 = vpop.permute.xlu2 %68 }
 0x179   :  { %151 = vmatmul.msk.f32.vlgmr.msra.gmra.mxu1 %vm79_vm10, %v69_v39 }
 0x190   :  { %v71_v40 = vpop.permute.xlu1 %70 }
 0x191   :  { %152 = vmatmul.msk.f32.vlgmr.msra.gmra.mxu2 %vm79_vm10, %v71_v40 }
 0x198   :  { %v73_v41 = vpop.permute.xlu1 %72 }
 0x199   :  { %153 = vmatmul.msk.f32.vlgmr.msra.gmra.mxu3 %vm79_vm10, %v73_v41 }
 0x19c   :  { %v109_v43 = vpop.f32.mrf.mxu0 }
 0x19d   :  { %v110_v45 = vadd.f32 %v161_v42, %v109_v43 }
 0x19f   :  { %v125_v46 = vadd.f32 %v121_v44, %v110_v45 }
 0x1a1   :  { %130 = vst.msk [vmem:[%s260_s4] sm:$0xff] %vm129_vm11, %v125_v46 }
 0x1f6   :  { %v112_v47 = vpop.f32.mrf.mxu1 }
 0x1f7   :  { %v113_v49 = vadd.f32 %v161_v42, %v112_v47 }
 0x1f9   :  { %v126_v50 = vadd.f32 %v122_v48, %v113_v49 }
 0x1fb   :  { %131 = vst.msk [vmem:[%s260_s4 + $0x8] sm:$0xff] %vm129_vm11, %v126_v50 }
 0x214   :  { %v115_v51 = vpop.f32.mrf.mxu2 }
 0x215   :  { %v116_v53 = vadd.f32 %v161_v42, %v115_v51 }
 0x217   :  { %v127_v54 = vadd.f32 %v123_v52, %v116_v53 }
 0x219   :  { %132 = vst.msk [vmem:[%s260_s4 + $0x10] sm:$0xff] %vm129_vm11, %v127_v54 }
 0x21c   :  { %v118_v55 = vpop.f32.mrf.mxu3 }
 0x21d   :  { %v119_v57 = vadd.f32 %v161_v42, %v118_v55 }
 0x21f   :  { %v128_v58 = vadd.f32 %v124_v56, %v119_v57 }
 0x221   :  { %133 = vst.msk [vmem:[%s260_s4 + $0x18] sm:$0xff] %vm129_vm11, %v128_v58 }

// kernel: model_forward.5
= control target key start
LH: loop header
LB: loop body
LE: loop exit
PB: predicated region body
PF: predicated region fallthrough
CT: control target
= control target key end

     0   :  { %vm33_vm0 = vcmask 261120   ;;  %s427_s0 = inlined_call_operand.vmem [shape: f32[32,32], index: 0, kind: input, shape index: {}]   ;;  %s428_s1 = inlined_call_operand.vmem [shape: f32[1,32], index: 1, kind: input, shape index: {}]   ;;  %s429_s2 = inlined_call_operand.vmem [shape: f32[1,32], index: 2, kind: input, shape index: {}]   ;;  %s430_s3 = inlined_call_operand.vmem [shape: f32[128,8], index: 3, kind: input, shape index: {}]   ;;  %s431_s4 = inlined_call_operand.vmem [shape: f32[1,8], index: 4, kind: input, shape index: {}]   ;;  %s432_s5 = inlined_call_operand.vmem [shape: f32[8,1], index: 5, kind: input, shape index: {}]   ;;  %s433_s6 = inlined_call_operand.vmem [shape: f32[8,1], index: 6, kind: input, shape index: {}]   ;;  %s434_s7 = inlined_call_operand.hbm [shape: f32[8,8], index: 7, kind: output, shape index: {}]  }
   0x1   :  { %v30_v0 = vld [vmem:[%s427_s0 + $0x18] sm:$0xff]  ;;  %v28_v1 = vld [vmem:[%s427_s0 + $0x8] sm:$0xff] }
   0x2   :  { %v43_v2 = vsel %vm33_vm0, %v30_v0, 0.0  ;;  %v37_v3 = vsel %vm33_vm0, %v28_v1, 0.0 }
   0x3   :  { %44 = vadd.xlane.f32.xlu1 %v43_v2  ;;  %38 = vadd.xlane.f32.xlu0 %v37_v3 }
   0x4   :  { %12 = vsyncpa [#allocation3], 0  ;;  %v29_v4 = vld [vmem:[%s427_s0 + $0x10] sm:$0xff]  ;;  %v27_v5 = vld [vmem:[%s427_s0] sm:$0xff]  ;;  %v279_v8 = vmov 32.0   ;;  %s282_s12 = smov 64  }
   0x5   :  { %v40_v6 = vsel %vm33_vm0, %v29_v4, 0.0  ;;  %v34_v7 = vsel %vm33_vm0, %v27_v5, 0.0  ;;  %243 = vrcp.f32 %v279_v8  ;;  %v240_v63 = vld [vmem:[%s428_s1] ss:$0 sm:$0xff]  ;;  %s280_s1 = smov 32   ;;  %vm156_vm14 = vcmask 523264  }
   0x6   :  { %vm158_vm15 = vcmask 785408   ;;  %s223_s26 = sshll.u32 %s434_s7, 4  ;;  %s224_s26 = int_to_ptr.hbm [resolvable:$true] %s223_s26 }
   0xb   :  { %41 = vadd.xlane.f32.xlu0 %v40_v6  ;;  %35 = vadd.xlane.f32.xlu1 %v34_v7  ;;  %v244_v9 = vpop.eup %243 }
   0xc   :  { %v47_v10 = vmul.f32 32.0, %v244_v9  ;;  %vm51_vm1 = vweird.f32 %v244_v9 }
   0xe   :  { %v48_v11 = vsub.f32 1.0, %v47_v10 }
  0x10   :  { %v49_v12 = vmul.f32 %v244_v9, %v48_v11 }
  0x12   :  { %v50_v13 = vadd.f32 %v244_v9, %v49_v12 }
  0x14   :  { %v52_v14 = vsel %vm51_vm1, %v244_v9, %v50_v13 }
  0x76   :  { %v45_v15 = vpop.xlane.xlu1 %44  ;;  %v39_v16 = vpop.xlane.xlu0 %38 }
  0x77   :  { %v56_v17 = vmul.f32 %v52_v14, %v45_v15  ;;  %v54_v18 = vmul.f32 %v52_v14, %v39_v16 }
  0x79   :  { %v341_v19 = vsub.f32 %v30_v0, %v56_v17  ;;  %v58_v20 = vsub.f32 %v28_v1, %v54_v18 }
  0x7b   :  { %v64_v21 = vmul.f32 %v341_v19, %v341_v19  ;;  %v62_v22 = vmul.f32 %v58_v20, %v58_v20 }
  0x7d   :  { %v74_v23 = vsel %vm33_vm0, %v64_v21, 0.0  ;;  %v68_v24 = vsel %vm33_vm0, %v62_v22, 0.0 }
  0x7e   :  { %75 = vadd.xlane.f32.xlu0 %v74_v23  ;;  %69 = vadd.xlane.f32.xlu2 %v68_v24  ;;  %v42_v25 = vpop.xlane.xlu0 %41  ;;  %v36_v26 = vpop.xlane.xlu1 %35 }
  0x7f   :  { %v55_v27 = vmul.f32 %v52_v14, %v42_v25  ;;  %v53_v28 = vmul.f32 %v52_v14, %v36_v26  ;;  %v175_v25 = vld [vmem:[%s430_s3 + $0x78] sm:$0xff]  ;;  %v174_v26 = vld [vmem:[%s430_s3 + $0x70] sm:$0xff] }
  0x80   :  { %180 = vmatpush.msra.mxu0 %v175_v25 }
  0x81   :  { %v347_v29 = vsub.f32 %v29_v4, %v55_v27  ;;  %v349_v30 = vsub.f32 %v27_v5, %v53_v28  ;;  %v241_v5 = vld [vmem:[%s429_s2] ss:$0 sm:$0xff]  ;;  %s281_s2 = smov 96   ;;  %v173_v27 = vld [vmem:[%s430_s3 + $0x68] sm:$0xff] }
  0x82   :  { %181 = vmatpush.msra.mxu0 %v174_v26  ;;  %v172_v28 = vld [vmem:[%s430_s3 + $0x60] sm:$0xff] }
  0x83   :  { %v63_v31 = vmul.f32 %v347_v29, %v347_v29  ;;  %v61_v32 = vmul.f32 %v349_v30, %v349_v30 }
  0x84   :  { %182 = vmatpush.msra.mxu0 %v173_v27 }
  0x85   :  { %v71_v33 = vsel %vm33_vm0, %v63_v31, 0.0  ;;  %v65_v34 = vsel %vm33_vm0, %v61_v32, 0.0  ;;  %v169_v31 = vld [vmem:[%s430_s3 + $0x48] sm:$0xff]  ;;  %v168_v32 = vld [vmem:[%s430_s3 + $0x40] sm:$0xff] }
  0x86   :  { %72 = vadd.xlane.f32.xlu2 %v71_v33  ;;  %66 = vadd.xlane.f32.xlu1 %v65_v34  ;;  %v167_v33 = vld [vmem:[%s430_s3 + $0x38] sm:$0xff]  ;;  %v166_v34 = vld [vmem:[%s430_s3 + $0x30] sm:$0xff] }
  0x87   :  { %183 = vmatpush.msra.mxu0 %v172_v28 }
  0xf1   :  { %v70_v35 = vpop.xlane.xlu2 %69  ;;  %v76_v36 = vpop.xlane.xlu0 %75 }
  0xf2   :  { %v78_v37 = vmul.f32 %v70_v35, %v52_v14  ;;  %v80_v38 = vmul.f32 %v76_v36, %v52_v14  ;;  %v165_v35 = vld [vmem:[%s430_s3 + $0x28] sm:$0xff]  ;;  %v164_v36 = vld [vmem:[%s430_s3 + $0x20] sm:$0xff] }
  0xf4   :  { %v82_v39 = vadd.f32 1e-05, %v78_v37  ;;  %v84_v40 = vadd.f32 1e-05, %v80_v38  ;;  %v163_v37 = vld [vmem:[%s430_s3 + $0x18] sm:$0xff]  ;;  %v162_v38 = vld [vmem:[%s430_s3 + $0x10] sm:$0xff] }
  0xf6   :  { %245 = vrsqrt.f32 %v82_v39  ;;  %vm121_vm3 = vweird.f32 %v84_v40  ;;  %vm101_vm5 = vweird.f32 %v82_v39 }
  0xf7   :  { %247 = vrsqrt.f32 %v84_v40 }
  0xf9   :  { %v73_v41 = vpop.xlane.xlu2 %72  ;;  %v67_v42 = vpop.xlane.xlu1 %66 }
  0xfa   :  { %v79_v43 = vmul.f32 %v73_v41, %v52_v14  ;;  %v77_v44 = vmul.f32 %v67_v42, %v52_v14  ;;  %v207_v41 = vld [vmem:[%s432_s5] sm:$0xff] }
  0xfb   :  { %v200_v42 = vld [vmem:[%s433_s6] sm:$0xff]  ;;  %s284_s6 = smov [#allocation2]  }
  0xfc   :  { %v246_v45 = vpop.eup %245  ;;  %v83_v46 = vadd.f32 1e-05, %v79_v43  ;;  %v81_v47 = vadd.f32 1e-05, %v77_v44  ;;  %v283_v43 = vmov 0   ;;  %s221_s23 = sshll.u32 %s284_s6, 4  ;;  %s222_s23 = int_to_ptr.vmem [resolvable:$true] %s221_s23 }
  0xfd   :  { %v248_v48 = vpop.eup %247  ;;  %v96_v49 = vmul.f32 %v246_v45, %v82_v39  ;;  %vm102_vm2 = vweird.f32 %v246_v45  ;;  %v161_v39 = vld [vmem:[%s430_s3 + $0x8] sm:$0xff]  ;;  %239 = vset.pattern.permute.xlu0 %v283_v43  ;;  %238 = vset.pattern.permute.xlu2 %v283_v43 }
  0xfe   :  { %v116_v50 = vmul.f32 %v248_v48, %v84_v40  ;;  %249 = vrsqrt.f32 %v83_v46  ;;  %vm122_vm4 = vweird.f32 %v248_v48  ;;  %vm103_vm6 = vmor %vm101_vm5, %vm102_vm2  ;;  %vm91_vm8 = vweird.f32 %v81_v47  ;;  %v160_v40 = vld [vmem:[%s430_s3] sm:$0xff] }
  0xff   :  { %v97_v51 = vmul.f32 %v246_v45, %v96_v49  ;;  %251 = vrsqrt.f32 %v81_v47  ;;  %vm123_vm7 = vmor %vm121_vm3, %vm122_vm4  ;;  %vm111_vm11 = vweird.f32 %v83_v46 }
 0x100   :  { %v117_v52 = vmul.f32 %v248_v48, %v116_v50  ;;  %v242_v50 = vld [vmem:[%s431_s4] ss:$0 sm:$0xff] }
 0x101   :  { %v98_v53 = vmul.f32 0.5, %v97_v51 }
 0x102   :  { %v118_v54 = vmul.f32 0.5, %v117_v52 }
 0x103   :  { %v99_v55 = vsub.f32 1.5, %v98_v53 }
 0x104   :  { %v250_v56 = vpop.eup %249  ;;  %v119_v57 = vsub.f32 1.5, %v118_v54 }
 0x105   :  { %v252_v58 = vpop.eup %251  ;;  %v100_v59 = vmul.f32 %v246_v45, %v99_v55  ;;  %v106_v60 = vmul.f32 %v250_v56, %v83_v46  ;;  %vm112_vm10 = vweird.f32 %v250_v56 }
 0x106   :  { %v120_v61 = vmul.f32 %v248_v48, %v119_v57  ;;  %v86_v62 = vmul.f32 %v252_v58, %v81_v47  ;;  %vm92_vm9 = vweird.f32 %v252_v58  ;;  %vm113_vm13 = vmor %vm111_vm11, %vm112_vm10 }
 0x107   :  { %v104_v0 = vsel %vm103_vm6, %v246_v45, %v100_v59  ;;  %v107_v1 = vmul.f32 %v250_v56, %v106_v60  ;;  %vm93_vm12 = vmor %vm91_vm8, %vm92_vm9 }
 0x108   :  { %v124_v2 = vsel %vm123_vm7, %v248_v48, %v120_v61  ;;  %v87_v3 = vmul.f32 %v252_v58, %v86_v62  ;;  %v126_v4 = vmul.f32 %v104_v0, %v58_v20 }
 0x109   :  { %v108_v6 = vmul.f32 0.5, %v107_v1  ;;  %v128_v7 = vmul.f32 %v124_v2, %v341_v19 }
 0x10a   :  { %v88_v8 = vmul.f32 0.5, %v87_v3  ;;  %v133_v9 = vmul.f32 %v240_v63, %v126_v4 }
 0x10b   :  { %v109_v10 = vsub.f32 1.5, %v108_v6  ;;  %v135_v11 = vmul.f32 %v240_v63, %v128_v7 }
 0x10c   :  { %v89_v12 = vsub.f32 1.5, %v88_v8  ;;  %v140_v13 = vadd.f32 %v241_v5, %v133_v9 }
 0x10d   :  { %v110_v14 = vmul.f32 %v250_v56, %v109_v10  ;;  %v142_v15 = vadd.f32 %v241_v5, %v135_v11 }
 0x10e   :  { %v90_v16 = vmul.f32 %v252_v58, %v89_v12  ;;  %144 = vrot.lane.b32.xlu2 %v140_v13, %s280_s1 }
 0x10f   :  { %v114_v17 = vsel %vm113_vm13, %v250_v56, %v110_v14  ;;  %152 = vrot.lane.b32.xlu1 %v142_v15, %s281_s2 }
 0x110   :  { %v94_v18 = vsel %vm93_vm12, %v252_v58, %v90_v16  ;;  %v127_v19 = vmul.f32 %v114_v17, %v347_v29  ;;  %v171_v29 = vld [vmem:[%s430_s3 + $0x58] sm:$0xff] }
 0x111   :  { %v125_v20 = vmul.f32 %v94_v18, %v349_v30  ;;  %v170_v30 = vld [vmem:[%s430_s3 + $0x50] sm:$0xff]  ;;  %184 = vmatpush.msra.mxu0 %v171_v29 }
 0x112   :  { %v134_v21 = vmul.f32 %v240_v63, %v127_v19 }
 0x113   :  { %v132_v22 = vmul.f32 %v240_v63, %v125_v20  ;;  %185 = vmatpush.msra.mxu0 %v170_v30 }
 0x114   :  { %v141_v23 = vadd.f32 %v241_v5, %v134_v21 }
 0x115   :  { %v139_v24 = vadd.f32 %v241_v5, %v132_v22  ;;  %186 = vmatpush.msra.mxu0 %v169_v31 }
 0x116   :  { %148 = vrot.lane.b32.xlu0 %v141_v23, %s282_s12  ;;  %203 = vperm.xlu2 %238, %v200_v42  }
 0x117   :  { %187 = vmatpush.msra.mxu0 %v168_v32 }
 0x119   :  { %188 = vmatpush.msra.mxu0 %v167_v33 }
 0x11b   :  { %189 = vmatpush.msra.mxu0 %v166_v34 }
 0x11d   :  { %190 = vmatpush.msra.mxu0 %v165_v35 }
 0x11e   :  { %210 = vperm.xlu0 %239, %v207_v41  }
 0x11f   :  { %191 = vmatpush.msra.mxu0 %v164_v36 }
 0x121   :  { %192 = vmatpush.msra.mxu0 %v163_v37 }
 0x123   :  { %193 = vmatpush.msra.mxu0 %v162_v38 }
 0x125   :  { %194 = vmatpush.msra.mxu0 %v161_v39 }
 0x127   :  { %195 = vmatpush.msra.mxu0 %v160_v40 }
 0x168   :  { %v145_v44 = vpop.permute.xlu2 %144 }
 0x169   :  { %v155_v45 = vsel %vm33_vm0, %v139_v24, %v145_v44  ;;  %vm214_vm0 = vcmask 64512  }
 0x170   :  { %v204_v52 = vpop.permute.xlu2 %203 }
 0x181   :  { %v153_v47 = vpop.permute.xlu1 %152 }
 0x188   :  { %v149_v46 = vpop.permute.xlu0 %148 }
 0x189   :  { %v157_v48 = vsel %vm156_vm14, %v155_v45, %v149_v46 }
 0x18a   :  { %v159_v49 = vsel %vm158_vm15, %v157_v48, %v153_v47 }
 0x18b   :  { %196 = vmatmul.f32.vlgmr.msra.gmra.mxu0 %v159_v49 }
 0x190   :  { %v211_v54 = vpop.permute.xlu0 %210 }
 0x208   :  { %v197_v51 = vpop.f32.mrf.mxu0 }
 0x209   :  { %v198_v53 = vadd.f32 %v242_v50, %v197_v51 }
 0x20b   :  { %v206_v55 = vmul.f32 %v204_v52, %v198_v53 }
 0x20d   :  { %v213_v56 = vadd.f32 %v211_v54, %v206_v55 }
 0x20f   :  { %215 = vst.msk [vmem:[#allocation2] sm:$0xff] %vm214_vm0, %v213_v56 }
 0x210   :  { %226 = dma.vmem_to_hbm [thread:$0]  %s222_s23, 128, %s224_s26, [#allocation3]  }
 0x211   :  { %277 = dma.done.wait [#allocation3], 128  }
 0x212   :  { %278 = vsyncadd [#allocation3], 4294967168 }
 0x213   :  { %231 = vsyncpa [#allocation3], 1 }

// kernel: model_forward.4
= control target key start
LH: loop header
LB: loop body
LE: loop exit
PB: predicated region body
PF: predicated region fallthrough
CT: control target
= control target key end

     0   :  { %vm82_vm0 = vcmask 261120   ;;  %s4232_s25 = smov 64   ;;  %s6713_s1 = inlined_call_operand.vmem [shape: f32[32,128], index: 1, kind: input, shape index: {}]   ;;  %s6714_s8 = inlined_call_operand.vmem [shape: f32[4,32], index: 8, kind: input, shape index: {}]   ;;  %s6715_s0 = inlined_call_operand.vmem [shape: f32[32,32], index: 0, kind: input, shape index: {}]   ;;  %s6716_s3 = inlined_call_operand.vmem [shape: f32[1,32], index: 3, kind: input, shape index: {}]   ;;  %s6717_s7 = inlined_call_operand.vmem [shape: f32[1,32], index: 7, kind: input, shape index: {}]   ;;  %s6718_s9 = inlined_call_operand.vmem [shape: f32[1,32], index: 9, kind: input, shape index: {}]   ;;  %s6719_s13 = inlined_call_operand.vmem [shape: f32[1,32], index: 13, kind: input, shape index: {}]   ;;  %s6720_s2 = inlined_call_operand.vmem [shape: f32[4,32], index: 2, kind: input, shape index: {}]   ;;  %s6721_s4 = inlined_call_operand.vmem [shape: f32[32,48], index: 4, kind: input, shape index: {}]   ;;  %s6722_s5 = inlined_call_operand.vmem [shape: f32[1,32], index: 5, kind: input, shape index: {}]   ;;  %s6723_s10 = inlined_call_operand.vmem [shape: f32[32,48], index: 10, kind: input, shape index: {}]   ;;  %s6724_s11 = inlined_call_operand.vmem [shape: f32[1,32], index: 11, kind: input, shape index: {}]   ;;  %s6725_s6 = inlined_call_operand.vmem [shape: f32[8,32], index: 6, kind: input, shape index: {}]   ;;  %s6726_s12 = inlined_call_operand.vmem [shape: f32[8,32], index: 12, kind: input, shape index: {}]   ;;  %s6727_s14 = inlined_call_operand.vmem [shape: f32[64,32], index: 14, kind: input, shape index: {}]   ;;  %s6728_s15 = inlined_call_operand.vmem [shape: f32[1,32], index: 15, kind: input, shape index: {}]   ;;  %s6729_s16 = inlined_call_operand.vmem [shape: f32[1,32], index: 16, kind: input, shape index: {}]   ;;  %s6730_s18 = inlined_call_operand.vmem [shape: f32[1,64], index: 18, kind: input, shape index: {}]   ;;  %s6731_s17 = inlined_call_operand.vmem [shape: f32[32,64], index: 17, kind: input, shape index: {}]   ;;  %s6732_s20 = inlined_call_operand.vmem [shape: f32[1,32], index: 20, kind: input, shape index: {}]   ;;  %s6733_s19 = inlined_call_operand.vmem [shape: f32[64,32], index: 19, kind: input, shape index: {}]   ;;  %s6734_s21 = inlined_call_operand.vmem [shape: f32[1,32], index: 21, kind: input, shape index: {}]   ;;  %s6735_s22 = inlined_call_operand.vmem [shape: f32[1,32], index: 22, kind: input, shape index: {}]   ;;  %s6736_s23 = inlined_call_operand.vmem [shape: f32[32,32], index: 23, kind: output, shape index: {}]  }
   0x1   :  { %6845 = sst [smem:[#allocation100_spill]] %s6713_s1  ;;  %v129_v15 = vld [vmem:[%s6721_s4 + $0x18] sm:$0xff]  ;;  %v128_v17 = vld [vmem:[%s6721_s4 + $0x10] sm:$0xff]  ;;  %v127_v21 = vld [vmem:[%s6721_s4 + $0x8] sm:$0xff] }
   0x2   :  { %6846 = sst [smem:[#allocation101_spill]] %s6714_s8  ;;  %264 = vmatpush.msra.mxu0 %v129_v15  ;;  %3928 = vmatpush.msra.mxu1 %v129_v15  ;;  %v126_v28 = vld [vmem:[%s6721_s4] sm:$0xff]  ;;  %s4233_s4 = smov 96  }
   0x3   :  { %6847 = sst [smem:[#allocation102_spill]] %s6715_s0 }
   0x4   :  { %6848 = sst [smem:[#allocation103_spill]] %s6716_s3  ;;  %265 = vmatpush.msra.mxu0 %v128_v17  ;;  %3929 = vmatpush.msra.mxu1 %v128_v17 }
   0x5   :  { %6849 = sst [smem:[#allocation104_spill]] %s6717_s7 }
   0x6   :  { %6850 = sst [smem:[#allocation105_spill]] %s6718_s9  ;;  %266 = vmatpush.msra.mxu0 %v127_v21  ;;  %3930 = vmatpush.msra.mxu1 %v127_v21 }
   0x7   :  { %6851 = sst [smem:[#allocation106_spill]] %s6719_s13 }
   0x8   :  { %6852 = sst [smem:[#allocation107_spill]] %s6720_s2  ;;  %267 = vmatpush.msra.mxu0 %v126_v28  ;;  %3931 = vmatpush.msra.mxu1 %v126_v28 }
   0x9   :  { %s6853_s24 = sld [smem:[#allocation100_spill]] }
   0xa   :  { %s6854_s27 = sld [smem:[#allocation101_spill]] }
   0xb   :  { %s6855_s1 = sld [smem:[#allocation102_spill]] }
   0xc   :  { %s6857_s8 = sld [smem:[#allocation103_spill]] }
   0xd   :  { %s6864_s2 = sld [smem:[#allocation105_spill]] }
   0xe   :  { %s6973_s30 = sld [smem:[#allocation106_spill]] }
   0xf   :  { %v81_v0 = vld [vmem:[%s6853_s24 + $0x18] sm:$0xff]  ;;  %v80_v1 = vld [vmem:[%s6853_s24 + $0x10] sm:$0xff]  ;;  %v79_v2 = vld [vmem:[%s6853_s24 + $0x8] sm:$0xff] }
  0x10   :  { %107 = vmatpush.msra.mxu2 %v81_v0  ;;  %3924 = vmatpush.msra.mxu3 %v81_v0  ;;  %v1822_v3 = vld [vmem:[%s6854_s27] sm:$0xf]  ;;  %s6856_s27 = sld [smem:[#allocation107_spill]] }
  0x11   :  { %v1902_v4 = vperm.slane %v1822_v3, 1  ;;  %v1831_v5 = vperm.slane %v1822_v3, 3  ;;  %v78_v6 = vld [vmem:[%s6853_s24] sm:$0xff]  ;;  %v77_v8 = vld [vmem:[%s6855_s1 + $0x18] sm:$0xff]  ;;  %v1865_v9 = vperm.slane %v1822_v3, 2  ;;  %v75_v10 = vld [vmem:[%s6855_s1 + $0x8] sm:$0xff] }
  0x12   :  { %108 = vmatpush.msra.mxu2 %v80_v1  ;;  %3925 = vmatpush.msra.mxu3 %v80_v1  ;;  %v74_v7 = vld [vmem:[%s6855_s1] sm:$0xff]  ;;  %v1945_v11 = vperm.slane %v1822_v3, 0  ;;  %v76_v12 = vld [vmem:[%s6855_s1 + $0x10] sm:$0xff] }
  0x13   :  { %1904 = vrot.lane.b32.xlu1 %v1902_v4, %s4232_s25  ;;  %1833 = vrot.lane.b32.xlu2 %v1831_v5, %s4232_s25  ;;  %v4417_v22 = vld [vmem:[%s6857_s8] ss:$0 sm:$0xff]  ;;  %s6982_s8 = sld [smem:[#allocation104_spill]] }
  0x14   :  { %109 = vmatpush.msra.mxu2 %v79_v2  ;;  %3926 = vmatpush.msra.mxu3 %v79_v2 }
  0x16   :  { %110 = vmatpush.msra.mxu2 %v78_v6  ;;  %3927 = vmatpush.msra.mxu3 %v78_v6  ;;  %v4396_v14 = vld [vmem:[%s6856_s27] sm:$0xf] }
  0x17   :  { %3888 = vmatmul.msk.f32.vlgmr.msra.gmra.mxu2 %vm82_vm0, %v74_v7  ;;  %3891 = vmatmul.msk.f32.vlgmr.msra.gmra.mxu3 %vm82_vm0, %v77_v8  ;;  %v4405_v18 = vperm.slane %v4396_v14, 3  ;;  %v4420_v23 = vperm.slane %v4396_v14, 2  ;;  %v184_v52 = vperm.slane %v4396_v14, 1  ;;  %v211_v53 = vperm.slane %v4396_v14, 0 }
  0x1b   :  { %1867 = vrot.lane.b32.xlu2 %v1865_v9, %s4232_s25 }
  0x1f   :  { %3889 = vmatmul.msk.f32.gmra.mxu2 %vm82_vm0, %v75_v10 }
  0x23   :  { %1947 = vrot.lane.b32.xlu2 %v1945_v11, %s4232_s25 }
  0x27   :  { %3890 = vmatmul.msk.f32.gmra.mxu2 %vm82_vm0, %v76_v12 }
  0x6d   :  { %v4391_v13 = vpop.permute.xlu2 %1833 }
  0x75   :  { %v1868_v16 = vpop.permute.xlu2 %1867 }
  0x7d   :  { %v1948_v44 = vpop.permute.xlu2 %1947 }
  0x85   :  { %v1905_v30 = vpop.permute.xlu1 %1904 }
  0x9a   :  { %v4407_v19 = vpop.f32.mrf.mxu2  ;;  %v4409_v20 = vpop.f32.mrf.mxu3 }
  0x9b   :  { %v3900_v24 = vmul.f32 -1.442695, %v4407_v19  ;;  %v3903_v25 = vmul.f32 -1.442695, %v4409_v20  ;;  %v1870_v26 = vmul.f32 %v1868_v16, %v4409_v20  ;;  %v1836_v27 = vmul.f32 %v4391_v13, %v4409_v20 }
  0x9c   :  { %v134_v29 = vmul.f32 %v4405_v18, %v4407_v19  ;;  %v160_v32 = vmul.f32 %v4420_v23, %v4407_v19  ;;  %v1907_v34 = vmul.f32 %v1905_v30, %v4409_v20  ;;  %v1950_v47 = vmul.f32 %v1948_v44, %v4409_v20 }
  0x9d   :  { %3988 = vpow2.f32 %v3900_v24  ;;  %1872 = vrot.lane.b32.xlu2 %v1870_v26, %s4232_s25  ;;  %1841 = vrot.lane.b32.xlu1 %v1836_v27, %s4232_s25  ;;  %v1968_v58 = vmul.f32 %v4391_v13, %v4407_v19  ;;  %v185_v61 = vmul.f32 %v184_v52, %v4407_v19  ;;  %v212_v62 = vmul.f32 %v211_v53, %v4407_v19 }
  0x9e   :  { %3990 = vpow2.f32 %v3903_v25  ;;  %v4435_v31 = vadd.f32 %v4417_v22, %v134_v29  ;;  %v161_v38 = vadd.f32 %v4417_v22, %v160_v32 }
  0xa0   :  { %v3892_v33 = vmul.f32 -1.442695, %v4435_v31 }
  0xa2   :  { %v4441_v35 = vpop.f32.mrf.mxu2  ;;  %3992 = vpow2.f32 %v3892_v33 }
  0xa3   :  { %v3989_v36 = vpop.eup %3988  ;;  %v1919_v37 = vmul.f32 %v4391_v13, %v4441_v35  ;;  %v162_v39 = vmul.f32 %v4405_v18, %v4441_v35  ;;  %v1962_v48 = vmul.f32 %v1868_v16, %v4441_v35  ;;  %v187_v17 = vmul.f32 %v4420_v23, %v4441_v35 }
  0xa4   :  { %v3991_v40 = vpop.eup %3990  ;;  %v616_v41 = vadd.f32 1.0, %v3989_v36  ;;  %v214_v27 = vmul.f32 %v184_v52, %v4441_v35  ;;  %v218_v52 = vmul.f32 %v4405_v18, %v4409_v20 }
  0xa5   :  { %v4448_v42 = vadd.f32 1.0, %v3991_v40  ;;  %1909 = vrot.lane.b32.xlu2 %v1907_v34, %s4232_s25  ;;  %1921 = vrot.lane.b32.xlu1 %v1919_v37, %s4232_s25  ;;  %v4452_v43 = vadd.f32 %v162_v39, %v161_v38  ;;  %v213_v34 = vadd.f32 %v4417_v22, %v212_v62  ;;  %v3901_v39 = vmul.f32 -1.442695, %v4441_v35 }
  0xa6   :  { %3994 = vrcp.f32 %v616_v41  ;;  %v626_v60 = vand.u32 2147483647, %v616_v41  ;;  %v628_v0 = vand.u32 2147483648, %v616_v41  ;;  %vm622_vm4 = vweird.f32 %v616_v41 }
  0xa7   :  { %3996 = vrcp.f32 %v4448_v42  ;;  %v3893_v46 = vmul.f32 -1.442695, %v4452_v43  ;;  %vm1672_vm1 = vweird.f32 %v4448_v42  ;;  %v1678_v3 = vand.u32 2147483648, %v4448_v42 }
  0xa8   :  { %v3993_v45 = vpop.eup %3992  ;;  %v1676_v7 = vand.u32 2147483647, %v4448_v42  ;;  %v629_v14 = vor.u32 1.1754944e-38, %v628_v0  ;;  %vm627_vm7 = vcmp.eq.f32.partialorder %v626_v60, 8.507059e+37 }
  0xa9   :  { %v4458_v49 = vadd.f32 1.0, %v3993_v45  ;;  %3998 = vpow2.f32 %v3893_v46  ;;  %v1679_v24 = vor.u32 1.1754944e-38, %v1678_v3 }
  0xaa   :  { %v4460_v50 = vpop.f32.mrf.mxu2  ;;  %vm1677_vm8 = vcmp.eq.f32.partialorder %v1676_v7, 8.507059e+37 }
  0xab   :  { %v1913_v51 = vmul.f32 %v1868_v16, %v4460_v50  ;;  %4000 = vrcp.f32 %v4458_v49  ;;  %v1956_v8 = vmul.f32 %v1905_v30, %v4460_v50  ;;  %v1876_v11 = vmul.f32 %v4391_v13, %v4460_v50 }
  0xac   :  { %v3995_v54 = vpop.eup %3994  ;;  %v186_v16 = vadd.f32 %v4417_v22, %v185_v61  ;;  %v152_v29 = vand.u32 2147483647, %v4458_v49  ;;  %v154_v30 = vand.u32 2147483648, %v4458_v49  ;;  %v189_v32 = vmul.f32 %v4405_v18, %v4460_v50 }
  0xad   :  { %v3997_v55 = vpop.eup %3996  ;;  %v618_v56 = vmul.f32 %v3995_v54, %v616_v41  ;;  %1952 = vrot.lane.b32.xlu2 %v1950_v47, %s4232_s25  ;;  %1964 = vrot.lane.b32.xlu1 %v1962_v48, %s4232_s25  ;;  %vm623_vm3 = vweird.f32 %v3995_v54  ;;  %v216_v36 = vmul.f32 %v4420_v23, %v4460_v50  ;;  %vm148_vm10 = vweird.f32 %v4458_v49 }
  0xae   :  { %v1668_v57 = vmul.f32 %v3997_v55, %v4448_v42  ;;  %1915 = vrot.lane.b32.xlu0 %v1913_v51, %s4232_s25  ;;  %vm1673_vm2 = vweird.f32 %v3997_v55  ;;  %vm624_vm6 = vmor %vm622_vm4, %vm623_vm3  ;;  %v215_v42 = vadd.f32 %v214_v27, %v213_v34  ;;  %vm153_vm12 = vcmp.eq.f32.partialorder %v152_v29, 8.507059e+37 }
  0xaf   :  { %v619_v59 = vsub.f32 1.0, %v618_v56  ;;  %v3999_v63 = vpop.eup %3998  ;;  %vm4480_vm5 = vmor %vm1672_vm1, %vm1673_vm2  ;;  %v155_v45 = vor.u32 1.1754944e-38, %v154_v30 }
  0xb0   :  { %v1669_v1 = vsub.f32 1.0, %v1668_v57  ;;  %v4476_v4 = vadd.f32 1.0, %v3999_v63  ;;  %v217_v48 = vadd.f32 %v216_v36, %v215_v42 }
  0xb1   :  { %v620_v2 = vmul.f32 %v3995_v54, %v619_v59  ;;  %v4001_v5 = vpop.eup %4000 }
  0xb2   :  { %v1670_v6 = vmul.f32 %v3997_v55, %v1669_v1  ;;  %v144_v12 = vmul.f32 %v4001_v5, %v4458_v49  ;;  %4002 = vrcp.f32 %v4476_v4  ;;  %vm149_vm9 = vweird.f32 %v4001_v5 }
  0xb3   :  { %v621_v9 = vadd.f32 %v3995_v54, %v620_v2  ;;  %vm150_vm11 = vmor %vm148_vm10, %vm149_vm9  ;;  %v179_v51 = vand.u32 2147483648, %v4476_v4  ;;  %4004 = vpow2.f32 %v3901_v39  ;;  %vm173_vm14 = vweird.f32 %v4476_v4 }
  0xb4   :  { %v1671_v15 = vadd.f32 %v3997_v55, %v1670_v6  ;;  %v145_v13 = vsub.f32 1.0, %v144_v12  ;;  %v4534_v18 = vadd.f32 %v218_v52, %v217_v48 }
  0xb5   :  { %v625_v21 = vsel %vm624_vm6, %v3995_v54, %v621_v9  ;;  %1970 = vrot.lane.b32.xlu2 %v1968_v58, %s4232_s25  ;;  %1878 = vrot.lane.b32.xlu1 %v1876_v11, %s4232_s25 }
  0xb6   :  { %v630_v25 = vsel %vm627_vm7, %v629_v14, %v625_v21  ;;  %v1675_v26 = vsel %vm4480_vm5, %v3997_v55, %v1671_v15  ;;  %1958 = vrot.lane.b32.xlu0 %v1956_v8, %s4232_s25  ;;  %v146_v33 = vmul.f32 %v4001_v5, %v145_v13  ;;  %s4234_s25 = smov 32   ;;  %v177_v55 = vand.u32 2147483647, %v4476_v4 }
  0xb7   :  { %v4498_v28 = vmul.f32 %v630_v25, %v4407_v19  ;;  %v1680_v38 = vsel %vm1677_vm8, %v1679_v24, %v1675_v26  ;;  %v188_v19 = vadd.f32 %v187_v17, %v186_v16  ;;  %v3895_v58 = vmul.f32 -1.442695, %v4534_v18 }
  0xb8   :  { %v4003_v37 = vpop.eup %4002  ;;  %v147_v40 = vadd.f32 %v4001_v5, %v146_v33  ;;  %v4514_v23 = vmul.f32 %v1680_v38, %v4409_v20  ;;  %v180_v20 = vor.u32 1.1754944e-38, %v179_v51  ;;  %vm178_vm1 = vcmp.eq.f32.partialorder %v177_v55, 8.507059e+37 }
  0xb9   :  { %v169_v41 = vmul.f32 %v4003_v37, %v4476_v4  ;;  %v634_v44 = vrot.slane %v4498_v28, 1  ;;  %v4511_v22 = vadd.f32 %v189_v32, %v188_v19  ;;  %vm174_vm13 = vweird.f32 %v4003_v37  ;;  %v4005_v63 = vpop.eup %4004 }
  0xba   :  { %6860 = vst [vmem:[#allocation2_spill] sm:$0xff] %v4514_v23  ;;  %v151_v46 = vsel %vm150_vm11, %v4001_v5, %v147_v40  ;;  %vm175_vm15 = vmor %vm173_vm14, %vm174_vm13  ;;  %v637_v59 = vrot.slane %v4498_v28, 4  ;;  %v635_v62 = vrot.slane %v4498_v28, 2  ;;  %v4546_v1 = vadd.f32 1.0, %v4005_v63 }
  0xbb   :  { %v170_v47 = vsub.f32 1.0, %v169_v41  ;;  %v156_v49 = vsel %vm153_vm12, %v155_v45, %v151_v46  ;;  %v3894_v56 = vmul.f32 -1.442695, %v4511_v22  ;;  %v640_v3 = vrot.slane %v4498_v28, 7 }
  0xbc   :  { %v4525_v53 = vmul.f32 %v156_v49, %v4435_v31  ;;  %v636_v4 = vrot.slane %v4498_v28, 3  ;;  %v638_v6 = vrot.slane %v4498_v28, 5  ;;  %v639_v12 = vrot.slane %v4498_v28, 6 }
  0xbd   :  { %643 = vrot.lane.b32.xlu2 %v634_v44, %s4233_s4  ;;  %641 = vrot.lane.b32.xlu1 %v4498_v28, %s4233_s4  ;;  %v171_v54 = vmul.f32 %v4003_v37, %v170_v47  ;;  %4006 = vpow2.f32 %v3894_v56  ;;  %vm972_vm10 = vweird.f32 %v4546_v1  ;;  %v978_v19 = vand.u32 2147483648, %v4546_v1 }
  0xbe   :  { %2367 = vrot.lane.b32.xlu0 %v4514_v23, %s4234_s25  ;;  %3896 = vmatmul.msk.f32.vlgmr.msra.gmra.mxu0 %vm82_vm0, %v4525_v53  ;;  %4008 = vpow2.f32 %v3895_v58  ;;  %v976_v41 = vand.u32 2147483647, %v4546_v1  ;;  %v6746_v45 = vrot.slane %v4514_v23, 1  ;;  %v3902_v49 = vmul.f32 -1.442695, %v4460_v50 }
  0xbf   :  { %v172_v57 = vadd.f32 %v4003_v37, %v171_v54  ;;  %v6745_v51 = vrot.slane %v4514_v23, 3  ;;  %v6752_v52 = vrot.slane %v4514_v23, 2 }
  0xc0   :  { %vm977_vm13 = vcmp.eq.f32.partialorder %v976_v41, 8.507059e+37 }
  0xc1   :  { %v176_v31 = vsel %vm175_vm15, %v4003_v37, %v172_v57 }
  0xc2   :  { %v181_v60 = vsel %vm178_vm1, %v180_v20, %v176_v31 }
  0xc3   :  { %v4539_v61 = vmul.f32 %v181_v60, %v4452_v43  ;;  %v4007_v0 = vpop.eup %4006  ;;  %v6741_v60 = vrot.slane %v4514_v23, 7 }
  0xc4   :  { %v194_v2 = vadd.f32 1.0, %v4007_v0  ;;  %v4009_v43 = vpop.eup %4008 }
  0xc5   :  { %649 = vrot.lane.b32.xlu2 %v637_v59, %s4233_s4  ;;  %3333 = vrot.lane.b32.xlu1 %v4498_v28, %s4234_s25  ;;  %v223_v5 = vadd.f32 1.0, %v4009_v43 }
  0xc6   :  { %645 = vrot.lane.b32.xlu0 %v635_v62, %s4233_s4  ;;  %3897 = vmatmul.msk.f32.gmra.mxu0 %vm82_vm0, %v4539_v61  ;;  %4010 = vrcp.f32 %v194_v2  ;;  %v206_v14 = vand.u32 2147483648, %v194_v2  ;;  %v204_v17 = vand.u32 2147483647, %v194_v2  ;;  %vm200_vm3 = vweird.f32 %v194_v2 }
  0xc7   :  { %4012 = vrcp.f32 %v4546_v1  ;;  %v235_v28 = vand.u32 2147483648, %v223_v5  ;;  %vm229_vm7 = vweird.f32 %v223_v5  ;;  %v233_v34 = vand.u32 2147483647, %v223_v5 }
  0xc8   :  { %4014 = vrcp.f32 %v223_v5  ;;  %v207_v25 = vor.u32 1.1754944e-38, %v206_v14  ;;  %vm205_vm5 = vcmp.eq.f32.partialorder %v204_v17, 8.507059e+37 }
  0xc9   :  { %v236_v38 = vor.u32 1.1754944e-38, %v235_v28  ;;  %vm234_vm9 = vcmp.eq.f32.partialorder %v233_v34, 8.507059e+37  ;;  %4016 = vpow2.f32 %v3902_v49 }
  0xcc   :  { %v4011_v7 = vpop.eup %4010 }
  0xcd   :  { %655 = vrot.lane.b32.xlu2 %v640_v3, %s4233_s4  ;;  %647 = vrot.lane.b32.xlu1 %v636_v4, %s4233_s4  ;;  %v196_v8 = vmul.f32 %v4011_v7, %v194_v2  ;;  %v4013_v9 = vpop.eup %4012  ;;  %vm201_vm2 = vweird.f32 %v4011_v7 }
  0xce   :  { %651 = vrot.lane.b32.xlu0 %v638_v6, %s4233_s4  ;;  %v4015_v10 = vpop.eup %4014  ;;  %v968_v21 = vmul.f32 %v4013_v9, %v4546_v1  ;;  %vm202_vm4 = vmor %vm200_vm3, %vm201_vm2  ;;  %vm973_vm11 = vweird.f32 %v4013_v9 }
  0xcf   :  { %v197_v11 = vsub.f32 1.0, %v196_v8  ;;  %v225_v15 = vmul.f32 %v4015_v10, %v223_v5  ;;  %vm230_vm6 = vweird.f32 %v4015_v10  ;;  %vm974_vm12 = vmor %vm972_vm10, %vm973_vm11  ;;  %v4017_v55 = vpop.eup %4016 }
  0xd0   :  { %v969_v29 = vsub.f32 1.0, %v968_v21  ;;  %vm231_vm8 = vmor %vm229_vm7, %vm230_vm6  ;;  %v1316_v57 = vadd.f32 1.0, %v4017_v55 }
  0xd1   :  { %v198_v16 = vmul.f32 %v4011_v7, %v197_v11  ;;  %v226_v24 = vsub.f32 1.0, %v225_v15 }
  0xd2   :  { %v970_v37 = vmul.f32 %v4013_v9, %v969_v29  ;;  %4018 = vrcp.f32 %v1316_v57  ;;  %vm1322_vm14 = vweird.f32 %v1316_v57  ;;  %v1328_v8 = vand.u32 2147483648, %v1316_v57  ;;  %v1825_v29 = vld [vmem:[%s6723_s10 + $0x8] sm:$0xff] }
  0xd3   :  { %v199_v13 = vadd.f32 %v4011_v7, %v198_v16  ;;  %v227_v26 = vmul.f32 %v4015_v10, %v226_v24  ;;  %v1827_v24 = vld [vmem:[%s6723_s10 + $0x18] sm:$0xff] }
  0xd4   :  { %v971_v40 = vadd.f32 %v4013_v9, %v970_v37  ;;  %v1329_v14 = vor.u32 1.1754944e-38, %v1328_v8  ;;  %2018 = vmatpush.msrb.mxu2 %v1827_v24 }
  0xd5   :  { %3335 = vrot.lane.b32.xlu2 %v634_v44, %s4234_s25  ;;  %653 = vrot.lane.b32.xlu1 %v639_v12, %s4233_s4  ;;  %v203_v27 = vsel %vm202_vm4, %v4011_v7, %v199_v13  ;;  %v228_v32 = vadd.f32 %v4015_v10, %v227_v26  ;;  %v6744_v44 = vrot.slane %v4514_v23, 5  ;;  %v1826_v26 = vld [vmem:[%s6723_s10 + $0x10] sm:$0xff] }
  0xd6   :  { %3343 = vrot.lane.b32.xlu0 %v638_v6, %s4234_s25  ;;  %v208_v30 = vsel %vm205_vm5, %v207_v25, %v203_v27  ;;  %v975_v46 = vsel %vm974_vm12, %v4013_v9, %v971_v40  ;;  %2019 = vmatpush.msrb.mxu2 %v1826_v26 }
  0xd7   :  { %v4565_v33 = vmul.f32 %v208_v30, %v4511_v22  ;;  %v232_v36 = vsel %vm231_vm8, %v4015_v10, %v228_v32  ;;  %v979_v22 = vor.u32 1.1754944e-38, %v978_v19  ;;  %v1326_v10 = vand.u32 2147483647, %v1316_v57 }
  0xd8   :  { %v237_v39 = vsel %vm234_vm9, %v236_v38, %v232_v36  ;;  %2020 = vmatpush.msrb.mxu2 %v1825_v29  ;;  %v378_v36 = vlaneseq }
  0xd9   :  { %6861 = vst [vmem:[#allocation3_spill] sm:$0xff] %v4565_v33  ;;  %3898 = vmatmul.msk.f32.vlgmr.msra.gmra.mxu1 %vm82_vm0, %v4565_v33  ;;  %v4576_v42 = vmul.f32 %v237_v39, %v4534_v18  ;;  %v980_v47 = vsel %vm977_vm13, %v979_v22, %v975_v46  ;;  %v6751_v18 = vrot.slane %v4514_v23, 4  ;;  %vm1327_vm2 = vcmp.eq.f32.partialorder %v1326_v10, 8.507059e+37 }
  0xda   :  { %v4590_v48 = vmul.f32 %v980_v47, %v4441_v35  ;;  %v6750_v35 = vrot.slane %v4514_v23, 6  ;;  %v4678_v38 = vshrl.u32 %v378_v36, 7 }
  0xdb   :  { %6862 = vst [vmem:[#allocation4_spill] sm:$0xff] %v4576_v42 }
  0xdc   :  { %6863 = vst [vmem:[#allocation5_spill] sm:$0xff] %v4590_v48  ;;  %v986_v54 = vrot.slane %v4590_v48, 3  ;;  %v989_v20 = vrot.slane %v4590_v48, 6  ;;  %v984_v31 = vrot.slane %v4590_v48, 1  ;;  %v985_v2 = vrot.slane %v4590_v48, 2 }
  0xdd   :  { %3337 = vrot.lane.b32.xlu2 %v635_v62, %s4234_s25  ;;  %3341 = vrot.lane.b32.xlu1 %v637_v59, %s4234_s25  ;;  %v4019_v59 = vpop.eup %4018  ;;  %v987_v62 = vrot.slane %v4590_v48, 4  ;;  %v988_v43 = vrot.slane %v4590_v48, 5  ;;  %v4685_v46 = vadd.s32 32, %v4678_v38 }
  0xde   :  { %3347 = vrot.lane.b32.xlu0 %v640_v3, %s4234_s25  ;;  %v1318_v63 = vmul.f32 %v4019_v59, %v1316_v57  ;;  %vm1323_vm15 = vweird.f32 %v4019_v59 }
  0xdf   :  { %vm1324_vm1 = vmor %vm1322_vm14, %vm1323_vm15  ;;  %3937 = vset.pattern.permute.xlu1 %v4685_v46  ;;  %3936 = vset.pattern.permute.xlu0 %v4685_v46 }
  0xe0   :  { %v1319_v1 = vsub.f32 1.0, %v1318_v63  ;;  %3938 = vset.pattern.permute.xlu2 %v4685_v46 }
  0xe1   :  { %3899 = vmatmul.msk.f32.gmra.mxu1 %vm82_vm0, %v4576_v42 }
  0xe2   :  { %v1320_v3 = vmul.f32 %v4019_v59, %v1319_v1 }
  0xe4   :  { %v1321_v9 = vadd.f32 %v4019_v59, %v1320_v3 }
  0xe5   :  { %3339 = vrot.lane.b32.xlu2 %v636_v4, %s4234_s25  ;;  %2369 = vrot.lane.b32.xlu1 %v6746_v45, %s4234_s25  ;;  %v4638_v4 = vld [vmem:[%s6864_s2] ss:$0 sm:$0xff] }
  0xe6   :  { %2377 = vrot.lane.b32.xlu0 %v6744_v44, %s4234_s25  ;;  %v1325_v15 = vsel %vm1324_vm1, %v4019_v59, %v1321_v9 }
  0xe7   :  { %v1330_v21 = vsel %vm1327_vm2, %v1329_v14, %v1325_v15 }
  0xe8   :  { %v4663_v27 = vmul.f32 %v1330_v21, %v4460_v50  ;;  %v1824_v50 = vld [vmem:[%s6723_s10] sm:$0xff] }
  0xe9   :  { %2021 = vmatpush.msrb.mxu2 %v1824_v50 }
  0xea   :  { %6866 = vst [vmem:[#allocation7_spill] sm:$0xff] %v4663_v27  ;;  %v6747_v41 = vrot.slane %v4663_v27, 5  ;;  %v6755_v22 = vrot.slane %v4663_v27, 2  ;;  %v6749_v3 = vrot.slane %v4663_v27, 1 }
  0xed   :  { %3345 = vrot.lane.b32.xlu2 %v639_v12, %s4234_s25  ;;  %2373 = vrot.lane.b32.xlu1 %v6745_v51, %s4234_s25  ;;  %v6743_v12 = vrot.slane %v4590_v48, 7 }
  0xee   :  { %991 = vrot.lane.b32.xlu0 %v4590_v48, %s4233_s4 }
  0xf5   :  { %2371 = vrot.lane.b32.xlu2 %v6752_v52, %s4234_s25  ;;  %2379 = vrot.lane.b32.xlu1 %v6750_v35, %s4234_s25  ;;  %v3980_v35 = vld [vmem:[%s6722_s5] ss:$0 sm:$0xff] }
  0xf6   :  { %997 = vrot.lane.b32.xlu0 %v986_v54, %s4233_s4 }
  0xf7   :  { %v4610_v56 = vpop.permute.xlu2 %1872 }
  0xf8   :  { %v1875_v47 = vadd.f32 %v4638_v4, %v4610_v56 }
  0xfd   :  { %2375 = vrot.lane.b32.xlu2 %v6751_v18, %s4234_s25  ;;  %993 = vrot.lane.b32.xlu1 %v984_v31, %s4233_s4 }
  0xfe   :  { %1003 = vrot.lane.b32.xlu0 %v989_v20, %s4233_s4 }
  0xff   :  { %v1910_v58 = vpop.permute.xlu2 %1909 }
 0x100   :  { %v1912_v30 = vadd.f32 %v4638_v4, %v1910_v58 }
 0x105   :  { %2381 = vrot.lane.b32.xlu2 %v6741_v60, %s4234_s25  ;;  %999 = vrot.lane.b32.xlu1 %v987_v62, %s4233_s4 }
 0x106   :  { %3013 = vrot.lane.b32.xlu0 %v984_v31, %s4234_s25 }
 0x107   :  { %v4629_v0 = vpop.permute.xlu2 %1952 }
 0x108   :  { %v1955_v56 = vadd.f32 %v4638_v4, %v4629_v0 }
 0x10d   :  { %3011 = vrot.lane.b32.xlu2 %v4590_v48, %s4234_s25  ;;  %3021 = vrot.lane.b32.xlu1 %v988_v43, %s4234_s25 }
 0x10e   :  { %3015 = vrot.lane.b32.xlu0 %v985_v2, %s4234_s25 }
 0x10f   :  { %v1842_v5 = vpop.permute.xlu1 %1841  ;;  %v4642_v6 = vpop.permute.xlu2 %1970 }
 0x110   :  { %v4645_v7 = vadd.f32 %v4638_v4, %v1842_v5  ;;  %v6754_v5 = vrot.slane %v4663_v27, 4 }
 0x112   :  { %v3904_v11 = vmul.f32 -1.442695, %v4645_v7 }
 0x114   :  { %4020 = vpow2.f32 %v3904_v11 }
 0x115   :  { %995 = vrot.lane.b32.xlu2 %v985_v2, %s4233_s4  ;;  %3025 = vrot.lane.b32.xlu1 %v6743_v12, %s4234_s25 }
 0x116   :  { %3017 = vrot.lane.b32.xlu0 %v986_v54, %s4234_s25 }
 0x117   :  { %v4654_v16 = vpop.permute.xlu2 %643  ;;  %v1922_v17 = vpop.permute.xlu1 %1921 }
 0x118   :  { %6865 = vst [vmem:[#allocation6_spill] sm:$0xff] %v4654_v16 }
 0x11a   :  { %v4021_v13 = vpop.eup %4020 }
 0x11b   :  { %v1848_v25 = vadd.f32 1.0, %v4021_v13  ;;  %v6748_v13 = vrot.slane %v4663_v27, 3 }
 0x11d   :  { %4022 = vrcp.f32 %v1848_v25  ;;  %1001 = vrot.lane.b32.xlu2 %v988_v43, %s4233_s4  ;;  %2689 = vrot.lane.b32.xlu1 %v4663_v27, %s4234_s25  ;;  %v1860_v49 = vand.u32 2147483648, %v1848_v25  ;;  %vm1854_vm3 = vweird.f32 %v1848_v25  ;;  %v1858_v57 = vand.u32 2147483647, %v1848_v25 }
 0x11e   :  { %3023 = vrot.lane.b32.xlu0 %v989_v20, %s4234_s25 }
 0x11f   :  { %v4673_v32 = vpop.permute.xlu2 %649  ;;  %v1965_v28 = vpop.permute.xlu1 %1964  ;;  %v1861_v63 = vor.u32 1.1754944e-38, %v1860_v49  ;;  %vm1859_vm6 = vcmp.eq.f32.partialorder %v1858_v57, 8.507059e+37 }
 0x120   :  { %6867 = vst [vmem:[#allocation8_spill] sm:$0xff] %v4673_v32  ;;  %v1916_v34 = vpop.permute.xlu0 %1915 }
 0x121   :  { %v1918_v37 = vadd.f32 %v1916_v34, %v1912_v30 }
 0x123   :  { %v4023_v39 = vpop.eup %4022  ;;  %v4680_v19 = vadd.f32 %v1922_v17, %v1918_v37  ;;  %v6753_v37 = vrot.slane %v4663_v27, 6 }
 0x124   :  { %v1850_v40 = vmul.f32 %v4023_v39, %v1848_v25  ;;  %vm1855_vm4 = vweird.f32 %v4023_v39  ;;  %v6742_v25 = vrot.slane %v4663_v27, 7 }
 0x125   :  { %v3906_v54 = vmul.f32 -1.442695, %v4680_v19  ;;  %3019 = vrot.lane.b32.xlu2 %v987_v62, %s4234_s25  ;;  %2699 = vrot.lane.b32.xlu1 %v6747_v41, %s4234_s25  ;;  %vm1856_vm5 = vmor %vm1854_vm3, %vm1855_vm4 }
 0x126   :  { %v1851_v55 = vsub.f32 1.0, %v1850_v40  ;;  %2693 = vrot.lane.b32.xlu0 %v6755_v22, %s4234_s25 }
 0x127   :  { %4024 = vpow2.f32 %v3906_v54  ;;  %v4701_v20 = vpop.permute.xlu2 %655  ;;  %v1879_v31 = vpop.permute.xlu1 %1878 }
 0x128   :  { %6868 = vst [vmem:[#allocation9_spill] sm:$0xff] %v4701_v20  ;;  %v1852_v58 = vmul.f32 %v4023_v39, %v1851_v55  ;;  %v1959_v59 = vpop.permute.xlu0 %1958  ;;  %v4705_v62 = vadd.f32 %v1879_v31, %v1875_v47 }
 0x129   :  { %v1961_v1 = vadd.f32 %v1959_v59, %v1955_v56 }
 0x12a   :  { %v1853_v2 = vadd.f32 %v4023_v39, %v1852_v58  ;;  %v3905_v0 = vmul.f32 -1.442695, %v4705_v62 }
 0x12b   :  { %v1967_v43 = vadd.f32 %v1965_v28, %v1961_v1 }
 0x12c   :  { %v1857_v4 = vsel %vm1856_vm5, %v4023_v39, %v1853_v2  ;;  %4026 = vpow2.f32 %v3905_v0 }
 0x12d   :  { %v4025_v8 = vpop.eup %4024  ;;  %v1862_v9 = vsel %vm1859_vm6, %v1861_v63, %v1857_v4  ;;  %v4713_v10 = vadd.f32 %v4642_v6, %v1967_v43  ;;  %2691 = vrot.lane.b32.xlu2 %v6749_v3, %s4234_s25 }
 0x12e   :  { %v4719_v11 = vmul.f32 %v1862_v9, %v4645_v7  ;;  %v4721_v14 = vadd.f32 1.0, %v4025_v8  ;;  %2697 = vrot.lane.b32.xlu0 %v6754_v5, %s4234_s25 }
 0x12f   :  { %v3907_v15 = vmul.f32 -1.442695, %v4713_v10  ;;  %v4727_v17 = vpop.permute.xlu2 %3335  ;;  %v4734_v21 = vpop.permute.xlu1 %641 }
 0x130   :  { %6869 = vst [vmem:[#allocation10_spill] sm:$0xff] %v4727_v17  ;;  %4028 = vrcp.f32 %v4721_v14  ;;  %v4730_v6 = vpop.permute.xlu0 %2367  ;;  %3908 = vmatmul.msk.f32.vlgmr.msrb.gmra.mxu2 %vm82_vm0, %v4719_v11  ;;  %vm1934_vm12 = vweird.f32 %v4721_v14 }
 0x131   :  { %4030 = vpow2.f32 %v3907_v15  ;;  %6870 = vst [vmem:[#allocation11_spill] sm:$0xff] %v4734_v21 }
 0x132   :  { %v4027_v7 = vpop.eup %4026 }
 0x133   :  { %v1885_v24 = vadd.f32 1.0, %v4027_v7 }
 0x135   :  { %4032 = vrcp.f32 %v1885_v24  ;;  %2695 = vrot.lane.b32.xlu2 %v6748_v13, %s4234_s25  ;;  %v1897_v56 = vand.u32 2147483648, %v1885_v24  ;;  %v1895_v63 = vand.u32 2147483647, %v1885_v24  ;;  %vm1891_vm8 = vweird.f32 %v1885_v24 }
 0x136   :  { %v4029_v26 = vpop.eup %4028  ;;  %2703 = vrot.lane.b32.xlu0 %v6742_v25, %s4234_s25 }
 0x137   :  { %v4031_v29 = vpop.eup %4030  ;;  %v4744_v30 = vpop.permute.xlu2 %3337  ;;  %v1930_v34 = vmul.f32 %v4029_v26, %v4721_v14  ;;  %v1898_v4 = vor.u32 1.1754944e-38, %v1897_v56  ;;  %vm1896_vm10 = vcmp.eq.f32.partialorder %v1895_v63, 8.507059e+37  ;;  %vm1935_vm11 = vweird.f32 %v4029_v26 }
 0x138   :  { %6871 = vst [vmem:[#allocation12_spill] sm:$0xff] %v4744_v30  ;;  %v4746_v28 = vadd.f32 1.0, %v4031_v29  ;;  %v4748_v50 = vpop.permute.xlu0 %645  ;;  %v4753_v40 = vpop.permute.xlu1 %3333  ;;  %v1938_v56 = vand.u32 2147483647, %v4721_v14  ;;  %vm1936_vm13 = vmor %vm1934_vm12, %vm1935_vm11  ;;  %vm1732_vm11 = vcmask 1041409  }
 0x139   :  { %6872 = vst [vmem:[#allocation13_spill] sm:$0xff] %v4748_v50  ;;  %v1931_v49 = vsub.f32 1.0, %v1930_v34 }
 0x13a   :  { %4034 = vrcp.f32 %v4746_v28  ;;  %6873 = vst [vmem:[#allocation14_spill] sm:$0xff] %v4753_v40  ;;  %vm1939_vm14 = vcmp.eq.f32.partialorder %v1938_v56, 8.507059e+37  ;;  %vm1983_vm1 = vweird.f32 %v4746_v28 }
 0x13b   :  { %v4033_v36 = vpop.eup %4032  ;;  %v4755_v47 = vpop.f32.mrf.mxu0  ;;  %v1932_v2 = vmul.f32 %v4029_v26, %v1931_v49 }
 0x13c   :  { %v1887_v39 = vmul.f32 %v4033_v36, %v1885_v24  ;;  %v391_v55 = vperm.slane %v4755_v47, 2  ;;  %v6762_v57 = vperm.slane %v4755_v47, 0  ;;  %vm1892_vm7 = vweird.f32 %v4033_v36 }
 0x13d   :  { %2701 = vrot.lane.b32.xlu2 %v6753_v37, %s4234_s25  ;;  %vm1893_vm9 = vmor %vm1891_vm8, %vm1892_vm7  ;;  %v6759_v8 = vperm.slane %v4755_v47, 7  ;;  %v1933_v7 = vadd.f32 %v4029_v26, %v1932_v2  ;;  %v398_v24 = vperm.slane %v4755_v47, 3  ;;  %v6761_v49 = vperm.slane %v4755_v47, 1 }
 0x13e   :  { %v1888_v54 = vsub.f32 1.0, %v1887_v39  ;;  %396 = vperm.xlu1 %3937, %v391_v55   ;;  %382 = vperm.xlu0 %3936, %v6762_v57   ;;  %v284_v5 = vadd.f32 %v3980_v35, %v4755_v47 }
 0x13f   :  { %v4762_v31 = vpop.permute.xlu2 %3339  ;;  %v1937_v63 = vsel %vm1936_vm13, %v4029_v26, %v1933_v7  ;;  %v1987_v26 = vand.u32 2147483647, %v4746_v28  ;;  %vm1735_vm13 = vcmask 1042434  }
 0x140   :  { %6874 = vst [vmem:[#allocation15_spill] sm:$0xff] %v4762_v31  ;;  %v4035_v58 = vpop.eup %4034  ;;  %v1889_v59 = vmul.f32 %v4033_v36, %v1888_v54  ;;  %v4768_v1 = vpop.permute.xlu0 %651  ;;  %v1940_v54 = vand.u32 2147483648, %v4721_v14  ;;  %vm312_vm4 = vcmp.gt.f32.partialorder %v284_v5, 20.0 }
 0x141   :  { %6875 = vst [vmem:[#allocation16_spill] sm:$0xff] %v4768_v1  ;;  %v1979_v0 = vmul.f32 %v4035_v58, %v4746_v28  ;;  %v4777_v39 = vpop.permute.xlu1 %647  ;;  %vm1984_vm15 = vweird.f32 %v4035_v58  ;;  %vm1988_vm3 = vcmp.eq.f32.partialorder %v1987_v26, 8.507059e+37 }
 0x142   :  { %v1890_v43 = vadd.f32 %v4033_v36, %v1889_v59  ;;  %6877 = vst [vmem:[#allocation18_spill] sm:$0xff] %v4777_v39  ;;  %v4793_v59 = vadd.s32 40, %v4678_v38  ;;  %vm1985_vm2 = vmor %vm1983_vm1, %vm1984_vm15  ;;  %vm1741_vm15 = vcmask 1044484   ;;  %vm1744_vm1 = vcmask 1045509  }
 0x143   :  { %v1980_v29 = vsub.f32 1.0, %v1979_v0  ;;  %v1941_v0 = vor.u32 1.1754944e-38, %v1940_v54 }
 0x144   :  { %v1894_v9 = vsel %vm1893_vm9, %v4033_v36, %v1890_v43 }
 0x145   :  { %v1899_v15 = vsel %vm1896_vm10, %v1898_v4, %v1894_v9  ;;  %431 = vperm.xlu2 %3938, %v6759_v8   ;;  %v1981_v2 = vmul.f32 %v4035_v58, %v1980_v29  ;;  %v1942_v43 = vsel %vm1939_vm14, %v1941_v0, %v1937_v63  ;;  %v419_v4 = vperm.slane %v4755_v47, 6 }
 0x146   :  { %v4775_v34 = vmul.f32 %v1899_v15, %v4705_v62  ;;  %403 = vperm.xlu1 %3937, %v398_v24   ;;  %389 = vperm.xlu0 %3936, %v6761_v49   ;;  %v6760_v9 = vperm.slane %v4755_v47, 4  ;;  %v1989_v15 = vand.u32 2147483648, %v4746_v28  ;;  %v4802_v38 = vmul.f32 %v1942_v43, %v4680_v19  ;;  %v4827_v43 = vpop.f32.mrf.mxu0 }
 0x147   :  { %v4782_v36 = vpop.permute.xlu2 %3345  ;;  %v1982_v14 = vadd.f32 %v4035_v58, %v1981_v2  ;;  %v412_v63 = vperm.slane %v4755_v47, 5  ;;  %v6757_v26 = vperm.slane %v4827_v43, 5  ;;  %v758_v12 = vperm.slane %v4827_v43, 4 }
 0x148   :  { %6876 = vst [vmem:[#allocation17_spill] sm:$0xff] %v4775_v34  ;;  %v4788_v62 = vpop.permute.xlu0 %3343  ;;  %3909 = vmatmul.msk.f32.gmra.mxu2 %vm82_vm0, %v4775_v34  ;;  %v1990_v56 = vor.u32 1.1754944e-38, %v1989_v15  ;;  %v737_v51 = vperm.slane %v4827_v43, 1  ;;  %v779_v3 = vperm.slane %v4827_v43, 7  ;;  %v751_v18 = vperm.slane %v4827_v43, 3 }
 0x149   :  { %6878 = vst [vmem:[#allocation19_spill] sm:$0xff] %v4782_v36  ;;  %v4806_v7 = vpop.permute.xlu1 %653  ;;  %v1986_v54 = vsel %vm1985_vm2, %v4035_v58, %v1982_v14  ;;  %v4898_v31 = vadd.f32 %v3980_v35, %v4827_v43  ;;  %vm1738_vm14 = vcmask 1043459   ;;  %vm1747_vm2 = vcmask 1046534  }
 0x14a   :  { %6879 = vst [vmem:[#allocation20_spill] sm:$0xff] %v4788_v62  ;;  %v1991_v19 = vsel %vm1988_vm3, %v1990_v56, %v1986_v54  ;;  %v744_v56 = vperm.slane %v4827_v43, 2  ;;  %vm1750_vm3 = vcmask 1047559  }
 0x14b   :  { %6881 = vst [vmem:[#allocation22_spill] sm:$0xff] %v4802_v38  ;;  %v4818_v2 = vmul.f32 %v1991_v19, %v4713_v10  ;;  %vm313_vm5 = vcmp.gt.f32.partialorder %v4898_v31, 20.0 }
 0x14c   :  { %6882 = vst [vmem:[#allocation23_spill] sm:$0xff] %v4806_v7 }
 0x14d   :  { %3940 = vset.pattern.permute.xlu2 %v4793_v59  ;;  %6885 = vst [vmem:[#allocation26_spill] sm:$0xff] %v4818_v2 }
 0x14e   :  { %424 = vperm.xlu1 %3937, %v419_v4   ;;  %410 = vperm.xlu0 %3936, %v6760_v9  }
 0x14f   :  { %v4799_v60 = vpop.permute.xlu2 %2371 }
 0x150   :  { %6880 = vst [vmem:[#allocation21_spill] sm:$0xff] %v4799_v60  ;;  %v4810_v29 = vpop.permute.xlu0 %3347  ;;  %3910 = vmatmul.msk.f32.gmra.mxu2 %vm82_vm0, %v4802_v38 }
 0x151   :  { %6883 = vst [vmem:[#allocation24_spill] sm:$0xff] %v4810_v29  ;;  %v4825_v58 = vpop.permute.xlu1 %3341 }
 0x152   :  { %6887 = vst [vmem:[#allocation28_spill] sm:$0xff] %v4825_v58 }
 0x155   :  { %495 = vperm.xlu2 %3940, %v398_v24   ;;  %v6758_v24 = vperm.slane %v4827_v43, 0 }
 0x156   :  { %3939 = vset.pattern.permute.xlu1 %v4793_v59  ;;  %417 = vperm.xlu0 %3936, %v412_v63  }
 0x157   :  { %v4815_v28 = vpop.permute.xlu2 %2375 }
 0x158   :  { %6884 = vst [vmem:[#allocation25_spill] sm:$0xff] %v4815_v28  ;;  %v4821_v0 = vpop.permute.xlu0 %2377  ;;  %3911 = vmatmul.msk.f32.gmra.mxu2 %vm82_vm0, %v4818_v2 }
 0x159   :  { %6886 = vst [vmem:[#allocation27_spill] sm:$0xff] %v4821_v0  ;;  %v4838_v15 = vpop.permute.xlu1 %2369 }
 0x15d   :  { %513 = vperm.xlu2 %3940, %v419_v4  }
 0x15e   :  { %489 = vperm.xlu1 %3939, %v391_v55   ;;  %735 = vperm.xlu0 %3936, %v6758_v24   ;;  %v4846_v55 = vpop.f32.mrf.mxu1 }
 0x15f   :  { %v4836_v14 = vpop.permute.xlu2 %2381  ;;  %v6763_v25 = vperm.slane %v4846_v55, 1  ;;  %v6756_v45 = vperm.slane %v4846_v55, 5 }
 0x160   :  { %v4834_v10 = vpop.permute.xlu0 %991  ;;  %6889 = vst [vmem:[#allocation30_spill] sm:$0xff] %v4836_v14 }
 0x161   :  { %6888 = vst [vmem:[#allocation29_spill] sm:$0xff] %v4834_v10  ;;  %v4851_v19 = vpop.permute.xlu1 %2373 }
 0x162   :  { %6892 = vst [vmem:[#allocation33_spill] sm:$0xff] %v4851_v19 }
 0x165   :  { %3942 = vset.pattern.permute.xlu2 %v4685_v46 }
 0x166   :  { %507 = vperm.xlu1 %3939, %v412_v63   ;;  %770 = vperm.xlu0 %3936, %v6757_v26   ;;  %v772_v26 = vperm.slane %v4827_v43, 6 }
 0x167   :  { %v4848_v54 = vpop.permute.xlu2 %3011 }
 0x168   :  { %v4844_v4 = vpop.permute.xlu0 %997  ;;  %6891 = vst [vmem:[#allocation32_spill] sm:$0xff] %v4848_v54 }
 0x169   :  { %6890 = vst [vmem:[#allocation31_spill] sm:$0xff] %v4844_v4  ;;  %v4864_v41 = vpop.permute.xlu1 %2379 }
 0x16a   :  { %6895 = vst [vmem:[#allocation36_spill] sm:$0xff] %v4864_v41 }
 0x16d   :  { %749 = vperm.xlu2 %3942, %v744_v56  }
 0x16e   :  { %3941 = vset.pattern.permute.xlu1 %v4685_v46  ;;  %1092 = vperm.xlu0 %3936, %v6763_v25  }
 0x16f   :  { %v4860_v44 = vpop.permute.xlu2 %995 }
 0x170   :  { %v4857_v63 = vpop.permute.xlu0 %1003  ;;  %6894 = vst [vmem:[#allocation35_spill] sm:$0xff] %v4860_v44 }
 0x171   :  { %6893 = vst [vmem:[#allocation34_spill] sm:$0xff] %v4857_v63  ;;  %v4880_v22 = vpop.permute.xlu1 %993 }
 0x172   :  { %6899 = vst [vmem:[#allocation40_spill] sm:$0xff] %v4880_v22  ;;  %v6782_v22 = vperm.slane %v4846_v55, 7 }
 0x175   :  { %763 = vperm.xlu2 %3942, %v758_v12  }
 0x176   :  { %742 = vperm.xlu1 %3941, %v737_v51   ;;  %1120 = vperm.xlu0 %3936, %v6756_v45   ;;  %v288_v45 = vmin.f32 %v284_v5, 20.0 }
 0x177   :  { %v4875_v52 = vpop.permute.xlu2 %1001 }
 0x178   :  { %v4868_v13 = vpop.permute.xlu0 %3013  ;;  %6897 = vst [vmem:[#allocation38_spill] sm:$0xff] %v4875_v52  ;;  %v292_v8 = vmul.f32 1.442695, %v288_v45 }
 0x179   :  { %6896 = vst [vmem:[#allocation37_spill] sm:$0xff] %v4868_v13  ;;  %v4888_v49 = vpop.permute.xlu1 %999 }
 0x17a   :  { %6902 = vst [vmem:[#allocation43_spill] sm:$0xff] %v4888_v49  ;;  %4036 = vpow2.f32 %v292_v8  ;;  %v289_v8 = vmin.f32 %v4898_v31, 20.0 }
 0x17c   :  { %v294_v30 = vmul.f32 1.442695, %v289_v8 }
 0x17d   :  { %784 = vperm.xlu2 %3942, %v779_v3  }
 0x17e   :  { %756 = vperm.xlu1 %3941, %v751_v18  }
 0x17f   :  { %v4886_v9 = vpop.permute.xlu2 %3019 }
 0x180   :  { %v4877_v37 = vpop.permute.xlu0 %3015  ;;  %6901 = vst [vmem:[#allocation42_spill] sm:$0xff] %v4886_v9  ;;  %v4037_v25 = vpop.eup %4036  ;;  %v6768_v9 = vperm.slane %v4846_v55, 2 }
 0x181   :  { %6898 = vst [vmem:[#allocation39_spill] sm:$0xff] %v4877_v37  ;;  %v300_v62 = vadd.f32 1.0, %v4037_v25  ;;  %v4895_v36 = vpop.permute.xlu1 %3021 }
 0x182   :  { %6905 = vst [vmem:[#allocation46_spill] sm:$0xff] %v4895_v36 }
 0x183   :  { %4038 = vlog2.f32 %v300_v62 }
 0x184   :  { %4040 = vpow2.f32 %v294_v30 }
 0x185   :  { %3944 = vset.pattern.permute.xlu2 %v4793_v59 }
 0x186   :  { %777 = vperm.xlu1 %3941, %v772_v26  }
 0x187   :  { %v4893_v29 = vpop.permute.xlu2 %2691 }
 0x188   :  { %v4884_v24 = vpop.permute.xlu0 %3017  ;;  %6904 = vst [vmem:[#allocation45_spill] sm:$0xff] %v4893_v29 }
 0x189   :  { %6900 = vst [vmem:[#allocation41_spill] sm:$0xff] %v4884_v24  ;;  %v4039_v25 = vpop.eup %4038  ;;  %v4909_v48 = vpop.permute.xlu1 %3025 }
 0x18a   :  { %6908 = vst [vmem:[#allocation49_spill] sm:$0xff] %v4909_v48  ;;  %v4041_v8 = vpop.eup %4040 }
 0x18b   :  { %v301_v30 = vadd.f32 1.0, %v4041_v8 }
 0x18d   :  { %842 = vperm.xlu2 %3944, %v744_v56   ;;  %v4904_v56 = vadd.f32 %v3980_v35, %v4846_v55 }
 0x18e   :  { %3943 = vset.pattern.permute.xlu1 %v4793_v59 }
 0x18f   :  { %v4906_v58 = vpop.permute.xlu2 %2695  ;;  %vm314_vm6 = vcmp.gt.f32.partialorder %v4904_v56, 20.0 }
 0x190   :  { %v4891_v57 = vpop.permute.xlu0 %3023  ;;  %6907 = vst [vmem:[#allocation48_spill] sm:$0xff] %v4906_v58 }
 0x191   :  { %6903 = vst [vmem:[#allocation44_spill] sm:$0xff] %v4891_v57  ;;  %v4920_v41 = vpop.permute.xlu1 %2689 }
 0x192   :  { %6912 = vst [vmem:[#allocation53_spill] sm:$0xff] %v4920_v41 }
 0x195   :  { %854 = vperm.xlu2 %3944, %v758_v12   ;;  %v290_v12 = vmin.f32 %v4904_v56, 20.0 }
 0x196   :  { %836 = vperm.xlu1 %3943, %v737_v51   ;;  %v305_v51 = vmul.f32 0.6931472, %v4039_v25  ;;  %v6765_v25 = vperm.slane %v4846_v55, 0 }
 0x197   :  { %v296_v62 = vmul.f32 1.442695, %v290_v12  ;;  %v4916_v57 = vpop.permute.xlu2 %2701 }
 0x198   :  { %v4900_v45 = vpop.permute.xlu0 %2693  ;;  %v4914_v35 = vsel %vm312_vm4, %v284_v5, %v305_v51  ;;  %6910 = vst [vmem:[#allocation51_spill] sm:$0xff] %v4916_v57  ;;  %vm3477_vm4 = vcmask 523264  }
 0x199   :  { %6906 = vst [vmem:[#allocation47_spill] sm:$0xff] %v4900_v45  ;;  %4042 = vpow2.f32 %v296_v62  ;;  %v325_v57 = vrot.slane %v4914_v35, 5  ;;  %v328_v24 = vperm.slane %v4914_v35, 0 }
 0x19a   :  { %4044 = vlog2.f32 %v301_v30  ;;  %v4941_v30 = vpop.permute.xlu1 %2699 }
 0x19b   :  { %6913 = vst [vmem:[#allocation54_spill] sm:$0xff] %v4941_v30  ;;  %v333_v17 = vperm.slane %v325_v57, 0  ;;  %v4954_v30 = vmul.f32 %v4914_v35, %v4525_v53 }
 0x19d   :  { %872 = vperm.xlu2 %3944, %v779_v3   ;;  %v370_v23 = vrot.slane %v4954_v30, 1 }
 0x19e   :  { %848 = vperm.xlu1 %3943, %v751_v18   ;;  %v324_v18 = vrot.slane %v4914_v35, 4 }
 0x19f   :  { %v4043_v12 = vpop.eup %4042  ;;  %v4932_v62 = vpop.permute.xlu2 %431 }
 0x1a0   :  { %v4911_v40 = vpop.permute.xlu0 %2697  ;;  %v332_v5 = vperm.slane %v324_v18, 0  ;;  %v302_v51 = vadd.f32 1.0, %v4043_v12  ;;  %v6766_v18 = vperm.slane %v4846_v55, 4 }
 0x1a1   :  { %6909 = vst [vmem:[#allocation50_spill] sm:$0xff] %v4911_v40 }
 0x1a2   :  { %4046 = vlog2.f32 %v302_v51 }
 0x1a5   :  { %3946 = vset.pattern.permute.xlu2 %v4685_v46 }
 0x1a6   :  { %866 = vperm.xlu1 %3943, %v772_v26   ;;  %v4930_v26 = vld [vmem:[%s6725_s6] sm:$0xff] }
 0x1a7   :  { %v348_v8 = vmul.f32 %v332_v5, %v4930_v26  ;;  %v344_v57 = vmul.f32 %v328_v24, %v4930_v26 }
 0x1a8   :  { %v4918_v3 = vpop.permute.xlu0 %2703 }
 0x1a9   :  { %6911 = vst [vmem:[#allocation52_spill] sm:$0xff] %v4918_v3  ;;  %v360_v5 = vmul.f32 1.442695, %v348_v8  ;;  %v6769_v8 = vperm.slane %v4846_v55, 6  ;;  %v352_v14 = vmul.f32 1.442695, %v344_v57 }
 0x1aa   :  { %v322_v57 = vrot.slane %v4914_v35, 2 }
 0x1ab   :  { %4048 = vpow2.f32 %v360_v5  ;;  %v373_v5 = vrot.slane %v4954_v30, 4 }
 0x1ad   :  { %1085 = vperm.xlu2 %3946, %v6765_v25   ;;  %v4045_v25 = vpop.eup %4044 }
 0x1ae   :  { %3945 = vset.pattern.permute.xlu1 %v4685_v46  ;;  %v307_v51 = vmul.f32 0.6931472, %v4045_v25 }
 0x1af   :  { %v4956_v36 = vpop.permute.xlu2 %495 }
 0x1b0   :  { %v4934_v3 = vpop.permute.xlu0 %382  ;;  %6914 = vst [vmem:[#allocation55_spill] sm:$0xff] %v4956_v36  ;;  %v4968_v37 = vsel %vm313_vm5, %v4898_v31, %v307_v51  ;;  %v437_v51 = vperm.slane %v373_v5, 0 }
 0x1b1   :  { %v681_v31 = vperm.slane %v4968_v37, 0  ;;  %v676_v21 = vrot.slane %v4968_v37, 3 }
 0x1b3   :  { %v4938_v48 = vpop.f32.mrf.mxu2  ;;  %v697_v13 = vmul.f32 %v681_v31, %v4930_v26 }
 0x1b4   :  { %v6767_v12 = vperm.slane %v4938_v48, 0  ;;  %v6770_v25 = vperm.slane %v4938_v48, 6  ;;  %v6934_v36 = vperm.slane %v4938_v48, 7 }
 0x1b5   :  { %1113 = vperm.xlu2 %3946, %v6766_v18   ;;  %v4047_v18 = vpop.eup %4046 }
 0x1b6   :  { %2136 = vperm.xlu0 %3936, %v6767_v12   ;;  %1099 = vperm.xlu1 %3945, %v6768_v9   ;;  %v349_v12 = vmul.f32 %v333_v17, %v4930_v26  ;;  %v4964_v9 = vpop.permute.xlu1 %396  ;;  %v309_v58 = vmul.f32 0.6931472, %v4047_v18  ;;  %v6771_v17 = vperm.slane %v4846_v55, 3  ;;  %v4049_v45 = vpop.eup %4048 }
 0x1b7   :  { %v4983_v54 = vpop.permute.xlu2 %513 }
 0x1b8   :  { %v4958_v40 = vpop.permute.xlu0 %389  ;;  %v362_v24 = vmul.f32 1.442695, %v349_v12  ;;  %v4981_v18 = vsel %vm314_vm6, %v4904_v56, %v309_v58  ;;  %6915 = vst [vmem:[#allocation56_spill] sm:$0xff] %v4983_v54  ;;  %v374_v58 = vrot.slane %v4954_v30, 5 }
 0x1b9   :  { %v1031_v63 = vperm.slane %v4981_v18, 0  ;;  %v1027_v16 = vrot.slane %v4981_v18, 4  ;;  %v1026_v42 = vrot.slane %v4981_v18, 3 }
 0x1ba   :  { %4050 = vpow2.f32 %v362_v24 }
 0x1bb   :  { %4052 = vpow2.f32 %v352_v14  ;;  %v321_v14 = vrot.slane %v4914_v35, 1  ;;  %v1047_v24 = vmul.f32 %v1031_v63, %v4930_v26 }
 0x1bd   :  { %1127 = vperm.xlu2 %3946, %v6769_v8   ;;  %v329_v4 = vperm.slane %v321_v14, 0 }
 0x1be   :  { %2178 = vperm.xlu0 %3936, %v6770_v25   ;;  %1106 = vperm.xlu1 %3945, %v6771_v17   ;;  %v461_v25 = vmul.f32 0.0, %v4049_v45  ;;  %v4992_v56 = vpop.permute.xlu1 %403  ;;  %v330_v45 = vperm.slane %v322_v57, 0 }
 0x1c0   :  { %v411_v8 = vpop.permute.xlu0 %410  ;;  %v4051_v5 = vpop.eup %4050  ;;  %v346_v57 = vmul.f32 %v330_v45, %v4930_v26  ;;  %v345_v45 = vmul.f32 %v329_v4, %v4930_v26  ;;  %v674_v4 = vrot.slane %v4968_v37, 1 }
 0x1c1   :  { %v453_v12 = vmul.f32 %v437_v51, %v411_v8  ;;  %v705_v8 = vmul.f32 1.442695, %v697_v13  ;;  %v4053_v31 = vpop.eup %4052  ;;  %v433_v51 = vperm.slane %v4954_v30, 0  ;;  %v462_v49 = vmul.f32 0.0, %v4051_v5 }
 0x1c2   :  { %v457_v20 = vmul.f32 0.0, %v4053_v31  ;;  %v1055_v13 = vmul.f32 1.442695, %v1047_v24  ;;  %v675_v5 = vrot.slane %v4968_v37, 2 }
 0x1c3   :  { %v4988_v17 = vadd.f32 %v461_v25, %v453_v12  ;;  %v438_v25 = vperm.slane %v374_v58, 0  ;;  %v449_v52 = vmul.f32 %v433_v51, %v4934_v3  ;;  %4054 = vpow2.f32 %v705_v8 }
 0x1c4   :  { %v5008_v58 = vmul.f32 %v4968_v37, %v4539_v61  ;;  %v6918_v3 = vperm.slane %v4846_v55, 0  ;;  %v356_v8 = vmul.f32 1.442695, %v346_v57  ;;  %4056 = vpow2.f32 %v1055_v13 }
 0x1c5   :  { %6916 = vst [vmem:[#allocation57_spill] sm:$0xff] %v4988_v17  ;;  %3949 = vset.pattern.permute.xlu2 %v4793_v59  ;;  %v5014_v31 = vadd.f32 %v457_v20, %v449_v52  ;;  %v683_v51 = vperm.slane %v675_v5, 0  ;;  %v677_v5 = vrot.slane %v4968_v37, 4 }
 0x1c6   :  { %3947 = vset.pattern.permute.xlu1 %v4793_v59  ;;  %v786_v24 = vperm.slane %v5008_v58, 0  ;;  %4058 = vpow2.f32 %v356_v8 }
 0x1c7   :  { %v4999_v41 = vpop.permute.xlu2 %749  ;;  %v699_v13 = vmul.f32 %v683_v51, %v4930_v26  ;;  %v5047_v51 = vmul.f32 %v4981_v18, %v4565_v33  ;;  %v680_v33 = vrot.slane %v4968_v37, 7 }
 0x1c8   :  { %v418_v12 = vpop.permute.xlu0 %417 }
 0x1c9   :  { %v454_v44 = vmul.f32 %v438_v25, %v418_v12  ;;  %v4055_v25 = vpop.eup %4054  ;;  %v327_v12 = vrot.slane %v4914_v35, 7  ;;  %v688_v19 = vperm.slane %v680_v33, 0 }
 0x1ca   :  { %v810_v20 = vmul.f32 %v4055_v25, %v5014_v31  ;;  %v682_v25 = vperm.slane %v674_v4, 0  ;;  %v724_v4 = vrot.slane %v5008_v58, 2 }
 0x1cb   :  { %v5001_v29 = vpop.f32.mrf.mxu2  ;;  %v5004_v63 = vadd.f32 %v462_v49, %v454_v44  ;;  %v5019_v44 = vpop.permute.xlu1 %424  ;;  %v6919_v49 = vperm.slane %v4846_v55, 1  ;;  %v335_v32 = vperm.slane %v327_v12, 0  ;;  %v709_v12 = vmul.f32 1.442695, %v699_v13 }
 0x1cc   :  { %v6772_v14 = vperm.slane %v5001_v29, 0  ;;  %v6773_v57 = vperm.slane %v5001_v29, 5  ;;  %v698_v13 = vmul.f32 %v682_v25, %v4930_v26  ;;  %v788_v25 = vperm.slane %v724_v4, 0 }
 0x1cd   :  { %6917 = vst [vmem:[#allocation58_spill] sm:$0xff] %v5004_v63  ;;  %1180 = vperm.xlu2 %3949, %v6918_v3  }
 0x1ce   :  { %2461 = vperm.xlu0 %3936, %v6772_v14   ;;  %1186 = vperm.xlu1 %3947, %v6919_v49   ;;  %v354_v14 = vmul.f32 1.442695, %v345_v45  ;;  %v4057_v49 = vpop.eup %4056  ;;  %v804_v60 = vmul.f32 %v788_v25, %v4999_v41 }
 0x1cf   :  { %v5029_v1 = vpop.permute.xlu2 %763 }
 0x1d0   :  { %v736_v52 = vpop.permute.xlu0 %735  ;;  %4060 = vpow2.f32 %v354_v14  ;;  %v6779_v14 = vperm.slane %v4938_v48, 2 }
 0x1d1   :  { %v802_v3 = vmul.f32 %v786_v24, %v736_v52  ;;  %v371_v24 = vrot.slane %v4954_v30, 2  ;;  %v1024_v52 = vrot.slane %v4981_v18, 1  ;;  %4062 = vpow2.f32 %v709_v12 }
 0x1d3   :  { %v5027_v7 = vadd.f32 %v810_v20, %v802_v3  ;;  %v5041_v8 = vpop.permute.xlu1 %489  ;;  %v685_v20 = vperm.slane %v677_v5, 0  ;;  %v4059_v3 = vpop.eup %4058  ;;  %v435_v50 = vperm.slane %v371_v24, 0  ;;  %v1032_v5 = vperm.slane %v1024_v52, 0 }
 0x1d4   :  { %6921 = vst [vmem:[#allocation60_spill] sm:$0xff] %v5041_v8  ;;  %v1073_v24 = vrot.slane %v5047_v51, 1  ;;  %v459_v27 = vmul.f32 0.0, %v4059_v3 }
 0x1d5   :  { %6920 = vst [vmem:[#allocation59_spill] sm:$0xff] %v5027_v7  ;;  %3950 = vset.pattern.permute.xlu2 %v4685_v46  ;;  %v5039_v45 = vmul.f32 %v4057_v49, %v5027_v7  ;;  %v5050_v49 = vpop.f32.mrf.mxu2  ;;  %v451_v0 = vmul.f32 %v435_v50, %v4964_v9  ;;  %v701_v28 = vmul.f32 %v685_v20, %v4930_v26  ;;  %v434_v20 = vperm.slane %v370_v23, 0 }
 0x1d6   :  { %2496 = vperm.xlu0 %3936, %v6773_v57   ;;  %3948 = vset.pattern.permute.xlu1 %v4685_v46  ;;  %v351_v57 = vmul.f32 %v335_v32, %v4930_v26  ;;  %v6781_v32 = vperm.slane %v5050_v49, 2  ;;  %v4061_v50 = vpop.eup %4060  ;;  %v1048_v12 = vmul.f32 %v1032_v5, %v4930_v26  ;;  %v723_v23 = vrot.slane %v5008_v58, 1 }
 0x1d7   :  { %v5066_v9 = vpop.permute.xlu2 %784  ;;  %v5070_v52 = vadd.f32 %v459_v27, %v451_v0  ;;  %v713_v3 = vmul.f32 1.442695, %v701_v28  ;;  %v458_v54 = vmul.f32 0.0, %v4061_v50  ;;  %v4063_v4 = vpop.eup %4062  ;;  %v450_v27 = vmul.f32 %v434_v20, %v4958_v40 }
 0x1d8   :  { %v5052_v39 = vpop.permute.xlu0 %770  ;;  %v366_v10 = vmul.f32 1.442695, %v351_v57  ;;  %v1137_v57 = vperm.slane %v1073_v24, 0  ;;  %v726_v0 = vrot.slane %v5008_v58, 4  ;;  %v1057_v33 = vmul.f32 1.442695, %v1048_v12 }
 0x1d9   :  { %6922 = vst [vmem:[#allocation61_spill] sm:$0xff] %v5070_v52  ;;  %v812_v28 = vmul.f32 %v4063_v4, %v5070_v52  ;;  %v6783_v41 = vperm.slane %v5050_v49, 3  ;;  %v704_v40 = vmul.f32 %v688_v19, %v4930_v26  ;;  %v376_v5 = vrot.slane %v4954_v30, 7 }
 0x1da   :  { %4064 = vpow2.f32 %v366_v10  ;;  %v1077_v10 = vrot.slane %v5047_v51, 5  ;;  %v5097_v50 = vadd.f32 %v458_v54, %v450_v27  ;;  %v790_v20 = vperm.slane %v726_v0, 0 }
 0x1db   :  { %v5076_v7 = vpop.permute.xlu1 %507  ;;  %v5095_v24 = vadd.f32 %v812_v28, %v804_v60  ;;  %v719_v4 = vmul.f32 1.442695, %v704_v40  ;;  %v440_v28 = vperm.slane %v376_v5, 0 }
 0x1dc   :  { %6923 = vst [vmem:[#allocation62_spill] sm:$0xff] %v5076_v7  ;;  %v806_v27 = vmul.f32 %v790_v20, %v5029_v1  ;;  %v6786_v1 = vperm.slane %v5050_v49, 7 }
 0x1dd   :  { %2150 = vperm.xlu2 %3950, %v6779_v14   ;;  %v707_v14 = vmul.f32 1.442695, %v698_v13  ;;  %v6784_v13 = vperm.slane %v4938_v48, 4  ;;  %6924 = vst [vmem:[#allocation63_spill] sm:$0xff] %v5097_v50 }
 0x1de   :  { %2797 = vperm.xlu0 %3936, %v6781_v32   ;;  %1134 = vperm.xlu1 %3948, %v6782_v22  }
 0x1df   :  { %4066 = vpow2.f32 %v707_v14  ;;  %v6785_v14 = vperm.slane %v4938_v48, 1 }
 0x1e0   :  { %v1093_v32 = vpop.permute.xlu0 %1092  ;;  %4068 = vpow2.f32 %v713_v3  ;;  %v4065_v12 = vpop.eup %4064  ;;  %v1141_v3 = vperm.slane %v1077_v10, 0  ;;  %v729_v10 = vrot.slane %v5008_v58, 7 }
 0x1e1   :  { %v1153_v22 = vmul.f32 %v1137_v57, %v1093_v32  ;;  %v5092_v32 = vld [vmem:[%s6724_s11] ss:$0 sm:$0xff]  ;;  %4070 = vpow2.f32 %v1057_v33  ;;  %v787_v57 = vperm.slane %v723_v23, 0  ;;  %v456_v33 = vmul.f32 %v440_v28, %v4932_v62 }
 0x1e2   :  { %v5108_v54 = vadd.f32 %v5092_v32, %v4938_v48  ;;  %4072 = vpow2.f32 %v719_v4  ;;  %v464_v20 = vmul.f32 0.0, %v4065_v12  ;;  %v5137_v12 = vadd.f32 %v5092_v32, %v5001_v29 }
 0x1e4   :  { %v2042_v62 = vmin.f32 %v5108_v54, 20.0  ;;  %v5130_v28 = vadd.f32 %v464_v20, %v456_v33  ;;  %v678_v33 = vrot.slane %v4968_v37, 5  ;;  %vm2066_vm7 = vcmp.gt.f32.partialorder %v5108_v54, 20.0 }
 0x1e5   :  { %2164 = vperm.xlu2 %3950, %v6784_v13   ;;  %v4067_v60 = vpop.eup %4066  ;;  %vm2067_vm8 = vcmp.gt.f32.partialorder %v5137_v12, 20.0 }
 0x1e6   :  { %2804 = vperm.xlu0 %3936, %v6783_v41   ;;  %2143 = vperm.xlu1 %3948, %v6785_v14   ;;  %v4069_v13 = vpop.eup %4068  ;;  %v811_v23 = vmul.f32 %v4067_v60, %v5097_v50  ;;  %6926 = vst [vmem:[#allocation65_spill] sm:$0xff] %v5130_v28 }
 0x1e7   :  { %v843_v25 = vpop.permute.xlu2 %842  ;;  %v814_v40 = vmul.f32 %v4069_v13, %v4988_v17 }
 0x1e8   :  { %v5104_v19 = vmul.f32 %v843_v25, %v5095_v24  ;;  %v743_v41 = vpop.permute.xlu1 %742  ;;  %v1121_v0 = vpop.permute.xlu0 %1120  ;;  %v6787_v25 = vperm.slane %v4938_v48, 7 }
 0x1e9   :  { %v803_v7 = vmul.f32 %v787_v57, %v743_v41  ;;  %v5111_v14 = vmul.f32 %v1141_v3, %v1121_v0  ;;  %v4071_v41 = vpop.eup %4070  ;;  %v2152_v57 = vperm.slane %v4938_v48, 3  ;;  %v5124_v3 = vadd.f32 %v814_v40, %v806_v27 }
 0x1ea   :  { %6925 = vst [vmem:[#allocation64_spill] sm:$0xff] %v5104_v19  ;;  %v793_v0 = vperm.slane %v729_v10, 0  ;;  %v4073_v40 = vpop.eup %4072 }
 0x1eb   :  { %v5121_v5 = vadd.f32 %v811_v23, %v803_v7  ;;  %v5142_v23 = vpop.f32.mrf.mxu2  ;;  %v817_v10 = vmul.f32 %v4073_v40, %v5130_v28 }
 0x1ec   :  { %v809_v27 = vmul.f32 %v793_v0, %v5066_v9  ;;  %v6788_v20 = vperm.slane %v5142_v23, 1 }
 0x1ed   :  { %2185 = vperm.xlu2 %3950, %v6787_v25   ;;  %v1161_v60 = vmul.f32 %v4071_v41, %v5121_v5  ;;  %v2043_v41 = vmin.f32 %v5137_v12, 20.0 }
 0x1ee   :  { %2832 = vperm.xlu0 %3936, %v6786_v1   ;;  %2157 = vperm.xlu1 %3948, %v2152_v57   ;;  %v2046_v1 = vmul.f32 1.442695, %v2042_v62  ;;  %v686_v62 = vperm.slane %v678_v33, 0  ;;  %v6790_v33 = vperm.slane %v5142_v23, 4 }
 0x1ef   :  { %v855_v13 = vpop.permute.xlu2 %854  ;;  %v5139_v4 = vadd.f32 %v1161_v60, %v1153_v22  ;;  %v5150_v22 = vadd.f32 %v817_v10, %v809_v27  ;;  %v326_v60 = vrot.slane %v4914_v35, 6  ;;  %v2048_v25 = vmul.f32 1.442695, %v2043_v41 }
 0x1f0   :  { %v5133_v7 = vmul.f32 %v855_v13, %v5124_v3  ;;  %v6789_v13 = vperm.slane %v4938_v48, 5  ;;  %4074 = vpow2.f32 %v2046_v1  ;;  %v5155_v0 = vpop.permute.xlu1 %756  ;;  %v702_v27 = vmul.f32 %v686_v62, %v4930_v26 }
 0x1f1   :  { %6928 = vst [vmem:[#allocation67_spill] sm:$0xff] %v5139_v4  ;;  %v334_v10 = vperm.slane %v326_v60, 0  ;;  %4076 = vpow2.f32 %v2048_v25  ;;  %v679_v41 = vrot.slane %v4968_v37, 6  ;;  %v727_v25 = vrot.slane %v5008_v58, 5 }
 0x1f2   :  { %6927 = vst [vmem:[#allocation66_spill] sm:$0xff] %v5133_v7  ;;  %v323_v7 = vrot.slane %v4914_v35, 3  ;;  %v1076_v37 = vrot.slane %v5047_v51, 4 }
 0x1f4   :  { %v331_v60 = vperm.slane %v323_v7, 0  ;;  %v6931_v7 = vperm.slane %v4938_v48, 1 }
 0x1f5   :  { %3952 = vset.pattern.permute.xlu2 %v4793_v59 }
 0x1f6   :  { %3112 = vperm.xlu0 %3936, %v6788_v20   ;;  %2171 = vperm.xlu1 %3948, %v6789_v13   ;;  %v4075_v1 = vpop.eup %4074  ;;  %v6930_v20 = vperm.slane %v4938_v48, 2  ;;  %v715_v13 = vmul.f32 1.442695, %v702_v27  ;;  %v6792_v27 = vperm.slane %v5142_v23, 6  ;;  %v347_v8 = vmul.f32 %v331_v60, %v4930_v26  ;;  %v5187_v60 = vpop.f32.mrf.mxu1 }
 0x1f7   :  { %v873_v9 = vpop.permute.xlu2 %872  ;;  %v2054_v19 = vadd.f32 1.0, %v4075_v1  ;;  %v6796_v17 = vperm.slane %v5187_v60, 2 }
 0x1f8   :  { %v5160_v40 = vmul.f32 %v873_v9, %v5150_v22  ;;  %v350_v9 = vmul.f32 %v334_v10, %v4930_v26  ;;  %v5173_v62 = vpop.permute.xlu1 %777  ;;  %4078 = vpow2.f32 %v715_v13  ;;  %v1136_v10 = vperm.slane %v5047_v51, 0 }
 0x1f9   :  { %4080 = vlog2.f32 %v2054_v19 }
 0x1fa   :  { %6929 = vst [vmem:[#allocation68_spill] sm:$0xff] %v5160_v40  ;;  %v364_v35 = vmul.f32 1.442695, %v350_v9  ;;  %v687_v40 = vperm.slane %v679_v41, 0  ;;  %v375_v41 = vrot.slane %v4954_v30, 6 }
 0x1fc   :  { %4082 = vpow2.f32 %v364_v35  ;;  %v703_v13 = vmul.f32 %v687_v40, %v4930_v26  ;;  %v1028_v40 = vrot.slane %v4981_v18, 5  ;;  %v358_v35 = vmul.f32 1.442695, %v347_v8 }
 0x1fd   :  { %2243 = vperm.xlu2 %3952, %v6930_v20   ;;  %v4077_v20 = vpop.eup %4076  ;;  %v372_v8 = vrot.slane %v4954_v30, 3 }
 0x1fe   :  { %3133 = vperm.xlu0 %3936, %v6790_v33   ;;  %3951 = vset.pattern.permute.xlu1 %v4793_v59  ;;  %v2055_v1 = vadd.f32 1.0, %v4077_v20  ;;  %v791_v33 = vperm.slane %v727_v25, 0  ;;  %v4079_v9 = vpop.eup %4078  ;;  %v1025_v25 = vrot.slane %v4981_v18, 2 }
 0x1ff   :  { %v4081_v20 = vpop.eup %4080 }
 0x200   :  { %v807_v19 = vmul.f32 %v791_v33, %v5052_v39  ;;  %4084 = vlog2.f32 %v2055_v1  ;;  %v815_v39 = vmul.f32 %v4079_v9, %v5004_v63  ;;  %v684_v33 = vperm.slane %v676_v21, 0 }
 0x201   :  { %v2059_v28 = vmul.f32 0.6931472, %v4081_v20  ;;  %v439_v1 = vperm.slane %v375_v41, 0  ;;  %v1033_v9 = vperm.slane %v1025_v25, 0  ;;  %v1030_v63 = vrot.slane %v4981_v18, 7 }
 0x202   :  { %v4083_v21 = vpop.eup %4082  ;;  %v6935_v25 = vperm.slane %v4938_v48, 0 }
 0x203   :  { %v5216_v30 = vsel %vm2066_vm7, %v5108_v54, %v2059_v28  ;;  %v1038_v50 = vperm.slane %v1030_v63, 0  ;;  %v5234_v63 = vld [vmem:[%s6726_s12] sm:$0xff] }
 0x204   :  { %v2082_v54 = vperm.slane %v5216_v30, 0 }
 0x205   :  { %2249 = vperm.xlu2 %3952, %v2152_v57  }
 0x206   :  { %3147 = vperm.xlu0 %3936, %v6792_v27   ;;  %2237 = vperm.xlu1 %3951, %v6931_v7   ;;  %v5197_v7 = vadd.f32 %v815_v39, %v807_v19  ;;  %v455_v19 = vmul.f32 %v439_v1, %v5019_v44  ;;  %v4085_v20 = vpop.eup %4084  ;;  %v1035_v39 = vperm.slane %v1027_v16, 0  ;;  %v463_v44 = vmul.f32 0.0, %v4083_v21 }
 0x207   :  { %v1086_v52 = vpop.permute.xlu2 %1085  ;;  %v1049_v1 = vmul.f32 %v1033_v9, %v4930_v26  ;;  %v6800_v21 = vperm.slane %v5187_v60, 5 }
 0x208   :  { %v1152_v57 = vmul.f32 %v1136_v10, %v1086_v52  ;;  %v5189_v27 = vpop.permute.xlu1 %836  ;;  %v717_v10 = vmul.f32 1.442695, %v703_v13  ;;  %6933 = vst [vmem:[#allocation70_spill] sm:$0xff] %v5197_v7  ;;  %v700_v13 = vmul.f32 %v684_v33, %v4930_v26  ;;  %v1051_v28 = vmul.f32 %v1035_v39, %v4930_v26 }
 0x20a   :  { %v5194_v52 = vadd.f32 %v5039_v45, %v1152_v57  ;;  %v728_v45 = vrot.slane %v5008_v58, 6  ;;  %v1140_v57 = vperm.slane %v1076_v37, 0  ;;  %4086 = vpow2.f32 %v717_v10 }
 0x20b   :  { %4088 = vpow2.f32 %v358_v35  ;;  %v711_v10 = vmul.f32 1.442695, %v700_v13  ;;  %v436_v35 = vperm.slane %v372_v8, 0 }
 0x20c   :  { %6932 = vst [vmem:[#allocation69_spill] sm:$0xff] %v5194_v52  ;;  %v792_v33 = vperm.slane %v728_v45, 0  ;;  %v1059_v45 = vmul.f32 1.442695, %v1049_v1  ;;  %v6938_v1 = vperm.slane %v4938_v48, 4 }
 0x20d   :  { %2273 = vperm.xlu2 %3952, %v6934_v36   ;;  %v1036_v36 = vperm.slane %v1028_v40, 0  ;;  %v1078_v40 = vrot.slane %v5047_v51, 6  ;;  %4090 = vpow2.f32 %v711_v10  ;;  %v452_v10 = vmul.f32 %v436_v35, %v4992_v56 }
 0x20e   :  { %1449 = vperm.xlu0 %3936, %v6796_v17   ;;  %2231 = vperm.xlu1 %3951, %v6935_v25   ;;  %v5223_v25 = vadd.f32 %v463_v44, %v455_v19  ;;  %v808_v9 = vmul.f32 %v792_v33, %v5173_v62  ;;  %4092 = vpow2.f32 %v1059_v45 }
 0x20f   :  { %v1114_v41 = vpop.permute.xlu2 %1113  ;;  %v1052_v16 = vmul.f32 %v1036_v36, %v4930_v26  ;;  %v1142_v13 = vperm.slane %v1078_v40, 0  ;;  %v1054_v36 = vmul.f32 %v1038_v50, %v4930_v26  ;;  %v2080_v50 = vrot.slane %v5216_v30, 6 }
 0x210   :  { %v5213_v37 = vmul.f32 %v1140_v57, %v1114_v41  ;;  %v5219_v17 = vpop.permute.xlu1 %848  ;;  %6937 = vst [vmem:[#allocation72_spill] sm:$0xff] %v5223_v25  ;;  %v2061_v57 = vmul.f32 0.6931472, %v4085_v20  ;;  %v4087_v19 = vpop.eup %4086  ;;  %v1034_v41 = vperm.slane %v1026_v42, 0  ;;  %v2098_v42 = vmul.f32 %v2082_v54, %v5234_v63 }
 0x211   :  { %6936 = vst [vmem:[#allocation71_spill] sm:$0xff] %v5219_v17  ;;  %v4089_v8 = vpop.eup %4088  ;;  %v816_v20 = vmul.f32 %v4087_v19, %v5223_v25  ;;  %v1065_v44 = vmul.f32 1.442695, %v1052_v16  ;;  %v1063_v40 = vmul.f32 1.442695, %v1051_v28  ;;  %v6802_v28 = vperm.slane %v5001_v29, 1 }
 0x212   :  { %v5239_v62 = vsel %vm2067_vm8, %v5137_v12, %v2061_v57  ;;  %v1029_v57 = vrot.slane %v4981_v18, 6  ;;  %v2106_v45 = vmul.f32 1.442695, %v2098_v42 }
 0x213   :  { %v5250_v12 = vadd.f32 %v816_v20, %v808_v9  ;;  %v2407_v16 = vperm.slane %v5239_v62, 0  ;;  %4094 = vpow2.f32 %v1065_v44  ;;  %v460_v9 = vmul.f32 0.0, %v4089_v8  ;;  %v4091_v18 = vpop.eup %4090 }
 0x214   :  { %v2088_v20 = vperm.slane %v2080_v50, 0  ;;  %4096 = vpow2.f32 %v1063_v40  ;;  %v1037_v56 = vperm.slane %v1029_v57, 0  ;;  %v6940_v44 = vperm.slane %v4938_v48, 5 }
 0x215   :  { %3953 = vset.pattern.permute.xlu2 %v4685_v46  ;;  %v5263_v35 = vadd.f32 %v460_v9, %v452_v10  ;;  %v2076_v50 = vrot.slane %v5216_v30, 2 }
 0x216   :  { %1470 = vperm.xlu0 %3936, %v6800_v21   ;;  %2255 = vperm.xlu1 %3951, %v6938_v1   ;;  %v1050_v21 = vmul.f32 %v1034_v41, %v4930_v26  ;;  %v1069_v1 = vmul.f32 1.442695, %v1054_v36  ;;  %v2423_v41 = vmul.f32 %v2407_v16, %v5234_v63  ;;  %v4093_v36 = vpop.eup %4092  ;;  %v2104_v42 = vmul.f32 %v2088_v20, %v5234_v63 }
 0x217   :  { %v1128_v39 = vpop.permute.xlu2 %1127  ;;  %v5277_v57 = vmul.f32 %v4093_v36, %v5095_v24  ;;  %v1053_v10 = vmul.f32 %v1037_v56, %v4930_v26  ;;  %v813_v16 = vmul.f32 %v4091_v18, %v5263_v35  ;;  %v2084_v56 = vperm.slane %v2076_v50, 0 }
 0x218   :  { %v5246_v33 = vmul.f32 %v1142_v13, %v1128_v39  ;;  %v867_v19 = vpop.permute.xlu1 %866  ;;  %v725_v13 = vrot.slane %v5008_v58, 3  ;;  %v1061_v58 = vmul.f32 1.442695, %v1050_v21  ;;  %4098 = vpow2.f32 %v1069_v1 }
 0x219   :  { %v5258_v54 = vmul.f32 %v867_v19, %v5250_v12  ;;  %v5268_v39 = vadd.f32 %v5092_v32, %v5050_v49  ;;  %4100 = vpow2.f32 %v2106_v45  ;;  %v4095_v40 = vpop.eup %4094  ;;  %v6801_v1 = vperm.slane %v5001_v29, 4 }
 0x21a   :  { %v789_v8 = vperm.slane %v725_v13, 0  ;;  %v4097_v19 = vpop.eup %4096  ;;  %v2431_v13 = vmul.f32 1.442695, %v2423_v41  ;;  %4102 = vpow2.f32 %v1061_v58  ;;  %v5285_v45 = vmul.f32 %v5216_v30, %v4719_v11 }
 0x21b   :  { %6939 = vst [vmem:[#allocation73_spill] sm:$0xff] %v5258_v54  ;;  %v2044_v9 = vmin.f32 %v5268_v39, 20.0  ;;  %v5289_v24 = vmul.f32 %v4097_v19, %v5124_v3  ;;  %v2118_v26 = vmul.f32 1.442695, %v2104_v42  ;;  %v1074_v18 = vrot.slane %v5047_v51, 2 }
 0x21c   :  { %v805_v21 = vmul.f32 %v789_v8, %v5155_v0  ;;  %v1165_v0 = vmul.f32 %v4095_v40, %v5197_v7  ;;  %4104 = vpow2.f32 %v2431_v13  ;;  %v1067_v3 = vmul.f32 1.442695, %v1053_v10 }
 0x21d   :  { %2468 = vperm.xlu2 %3953, %v6802_v28   ;;  %v6943_v42 = vperm.slane %v4755_v47, 0  ;;  %v2187_v40 = vperm.slane %v5285_v45, 0  ;;  %4106 = vpow2.f32 %v2118_v26  ;;  %v1138_v10 = vperm.slane %v1074_v18, 0 }
 0x21e   :  { %3971 = vset.pattern.permute.xlu0 %v4793_v59  ;;  %2261 = vperm.xlu1 %3951, %v6940_v44   ;;  %v4099_v20 = vpop.eup %4098  ;;  %v5291_v36 = vadd.f32 %v813_v16, %v805_v21  ;;  %v5297_v41 = vadd.f32 %v1165_v0, %v5111_v14  ;;  %v2050_v44 = vmul.f32 1.442695, %v2044_v9  ;;  %v2078_v21 = vrot.slane %v5216_v30, 4 }
 0x21f   :  { %v5300_v58 = vmul.f32 %v4099_v20, %v5150_v22  ;;  %v4101_v8 = vpop.eup %4100  ;;  %v2100_v16 = vmul.f32 %v2084_v56, %v5234_v63  ;;  %4108 = vpow2.f32 %v1067_v3  ;;  %v1075_v56 = vrot.slane %v5047_v51, 3 }
 0x220   :  { %6941 = vst [vmem:[#allocation74_spill] sm:$0xff] %v5291_v36  ;;  %v4103_v19 = vpop.eup %4102  ;;  %v2211_v13 = vmul.f32 0.0, %v4101_v8  ;;  %4110 = vpow2.f32 %v2050_v44  ;;  %v2086_v26 = vperm.slane %v2078_v21, 0  ;;  %vm2068_vm9 = vcmp.gt.f32.partialorder %v5268_v39, 20.0 }
 0x221   :  { %6942 = vst [vmem:[#allocation75_spill] sm:$0xff] %v5297_v41  ;;  %v5312_v0 = vmul.f32 %v4103_v19, %v5291_v36  ;;  %v2110_v18 = vmul.f32 1.442695, %v2100_v16  ;;  %v6804_v19 = vperm.slane %v5001_v29, 2  ;;  %v1139_v21 = vperm.slane %v1075_v56, 0 }
 0x222   :  { %v2102_v44 = vmul.f32 %v2086_v26, %v5234_v63 }
 0x223   :  { %4112 = vpow2.f32 %v2110_v18 }
 0x224   :  { %v2114_v18 = vmul.f32 1.442695, %v2102_v44 }
 0x225   :  { %2489 = vperm.xlu2 %3953, %v6801_v1   ;;  %v2129_v1 = vrot.slane %v5285_v45, 6 }
 0x226   :  { %477 = vperm.xlu0 %3971, %v6943_v42   ;;  %3954 = vset.pattern.permute.xlu1 %v4685_v46  ;;  %v2498_v42 = vperm.slane %v5001_v29, 6  ;;  %4114 = vpow2.f32 %v2114_v18  ;;  %v5359_v18 = vmul.f32 %v5239_v62, %v4775_v34 }
 0x227   :  { %v1181_v50 = vpop.permute.xlu2 %1180  ;;  %v2193_v3 = vperm.slane %v2129_v1, 0  ;;  %v5336_v1 = vadd.f32 %v5092_v32, %v5142_v23  ;;  %v2403_v32 = vrot.slane %v5239_v62, 4 }
 0x228   :  { %v5308_v14 = vmul.f32 %v1181_v50, %v5194_v52  ;;  %v2137_v22 = vpop.permute.xlu0 %2136  ;;  %v1100_v20 = vpop.permute.xlu1 %1099 }
 0x229   :  { %v2203_v9 = vmul.f32 %v2187_v40, %v2137_v22  ;;  %v5316_v28 = vmul.f32 %v1138_v10, %v1100_v20  ;;  %v6945_v22 = vperm.slane %v4755_v47, 1  ;;  %v2081_v20 = vrot.slane %v5216_v30, 7 }
 0x22a   :  { %6944 = vst [vmem:[#allocation76_spill] sm:$0xff] %v5308_v14  ;;  %v4105_v14 = vpop.eup %4104  ;;  %v2045_v17 = vmin.f32 %v5336_v1, 20.0  ;;  %vm2069_vm10 = vcmp.gt.f32.partialorder %v5336_v1, 20.0 }
 0x22b   :  { %v5318_v50 = vadd.f32 %v2211_v13, %v2203_v9  ;;  %v4107_v40 = vpop.eup %4106 }
 0x22c   :  { %v4109_v10 = vpop.eup %4108  ;;  %v2217_v9 = vmul.f32 0.0, %v4107_v40  ;;  %v2405_v40 = vrot.slane %v5239_v62, 6  ;;  %v2052_v36 = vmul.f32 1.442695, %v2045_v17  ;;  %v6948_v17 = vperm.slane %v4755_v47, 7 }
 0x22d   :  { %2503 = vperm.xlu2 %3953, %v2498_v42   ;;  %v5322_v8 = vmul.f32 %v4105_v14, %v5318_v50  ;;  %v4111_v16 = vpop.eup %4110  ;;  %v5332_v52 = vmul.f32 %v4109_v10, %v5250_v12  ;;  %v6808_v10 = vperm.slane %v5001_v29, 3 }
 0x22e   :  { %483 = vperm.xlu0 %3971, %v6945_v22   ;;  %2475 = vperm.xlu1 %3954, %v6804_v19   ;;  %v2125_v22 = vrot.slane %v5285_v45, 2  ;;  %v4113_v12 = vpop.eup %4112  ;;  %v2413_v44 = vperm.slane %v2405_v40, 0  ;;  %v2401_v40 = vrot.slane %v5239_v62, 2 }
 0x230   :  { %v2179_v13 = vpop.permute.xlu0 %2178  ;;  %v1107_v26 = vpop.permute.xlu1 %1106  ;;  %v2189_v19 = vperm.slane %v2125_v22, 0  ;;  %v2411_v22 = vperm.slane %v2403_v32, 0  ;;  %v2429_v7 = vmul.f32 %v2413_v44, %v5234_v63 }
 0x231   :  { %v2209_v14 = vmul.f32 %v2193_v3, %v2179_v13  ;;  %v5339_v54 = vmul.f32 %v1139_v21, %v1107_v26  ;;  %v2056_v3 = vadd.f32 1.0, %v4111_v16  ;;  %v2089_v13 = vperm.slane %v2081_v20, 0 }
 0x232   :  { %v6947_v21 = vperm.slane %v4755_v47, 4  ;;  %v2127_v26 = vrot.slane %v5285_v45, 4  ;;  %v2427_v32 = vmul.f32 %v2411_v22, %v5234_v63  ;;  %v2443_v44 = vmul.f32 1.442695, %v2429_v7 }
 0x233   :  { %v5341_v56 = vadd.f32 %v2217_v9, %v2209_v14  ;;  %4116 = vlog2.f32 %v2056_v3  ;;  %v2213_v14 = vmul.f32 0.0, %v4113_v12  ;;  %v2105_v20 = vmul.f32 %v2089_v13, %v5234_v63  ;;  %v4115_v3 = vpop.eup %4114 }
 0x234   :  { %v6811_v13 = vperm.slane %v5001_v29, 7  ;;  %4118 = vpow2.f32 %v2052_v36  ;;  %v2439_v7 = vmul.f32 1.442695, %v2427_v32 }
 0x235   :  { %6946 = vst [vmem:[#allocation77_spill] sm:$0xff] %v5341_v56  ;;  %3956 = vset.pattern.permute.xlu2 %v4793_v59 }
 0x236   :  { %501 = vperm.xlu0 %3971, %v6947_v21   ;;  %2482 = vperm.xlu1 %3954, %v6808_v10   ;;  %v2191_v21 = vperm.slane %v2127_v26, 0  ;;  %v2130_v26 = vrot.slane %v5285_v45, 7 }
 0x237   :  { %v2151_v9 = vpop.permute.xlu2 %2150 }
 0x238   :  { %v2205_v16 = vmul.f32 %v2189_v19, %v2151_v9  ;;  %v2120_v19 = vmul.f32 1.442695, %v2105_v20  ;;  %v2409_v20 = vperm.slane %v2401_v40, 0 }
 0x239   :  { %v4117_v12 = vpop.eup %4116 }
 0x23a   :  { %v5354_v25 = vadd.f32 %v2213_v14, %v2205_v16  ;;  %v2215_v16 = vmul.f32 0.0, %v4115_v3  ;;  %v2063_v10 = vmul.f32 0.6931472, %v4117_v12  ;;  %4120 = vpow2.f32 %v2120_v19  ;;  %v4119_v12 = vpop.eup %4118 }
 0x23b   :  { %4122 = vpow2.f32 %v2443_v44  ;;  %v2453_v3 = vrot.slane %v5359_v18, 5  ;;  %v2425_v19 = vmul.f32 %v2409_v20, %v5234_v63  ;;  %v6951_v44 = vperm.slane %v4827_v43, 0 }
 0x23c   :  { %4124 = vpow2.f32 %v2439_v7 }
 0x23d   :  { %2592 = vperm.xlu2 %3956, %v2498_v42   ;;  %v2512_v42 = vperm.slane %v5359_v18, 0 }
 0x23e   :  { %519 = vperm.xlu0 %3971, %v6948_v17   ;;  %2510 = vperm.xlu1 %3954, %v6811_v13   ;;  %v2075_v17 = vrot.slane %v5216_v30, 1 }
 0x23f   :  { %v2165_v9 = vpop.permute.xlu2 %2164 }
 0x240   :  { %v2207_v14 = vmul.f32 %v2191_v21, %v2165_v9  ;;  %v2462_v34 = vpop.permute.xlu0 %2461  ;;  %v1187_v22 = vpop.permute.xlu1 %1186  ;;  %v5383_v21 = vsel %vm2068_vm9, %v5268_v39, %v2063_v10  ;;  %v2083_v32 = vperm.slane %v2075_v17, 0  ;;  %v2435_v10 = vmul.f32 1.442695, %v2425_v19 }
 0x241   :  { %v2528_v47 = vmul.f32 %v2512_v42, %v2462_v34  ;;  %v5374_v41 = vmul.f32 %v1187_v22, %v5139_v4  ;;  %v2194_v34 = vperm.slane %v2130_v26, 0  ;;  %v4121_v9 = vpop.eup %4120  ;;  %v2517_v42 = vperm.slane %v2453_v3, 0 }
 0x242   :  { %v5370_v36 = vadd.f32 %v2215_v16, %v2207_v14  ;;  %v5395_v39 = vmul.f32 %v5383_v21, %v4802_v38  ;;  %v4123_v20 = vpop.eup %4122  ;;  %v2077_v22 = vrot.slane %v5216_v30, 3  ;;  %v2218_v17 = vmul.f32 0.0, %v4121_v9 }
 0x243   :  { %6949 = vst [vmem:[#allocation78_spill] sm:$0xff] %v5374_v41  ;;  %v5378_v40 = vadd.f32 %v5322_v8, %v2528_v47  ;;  %v5390_v8 = vadd.f32 %v5289_v24, %v5213_v37  ;;  %v2099_v7 = vmul.f32 %v2083_v32, %v5234_v63  ;;  %v5402_v37 = vmul.f32 %v4123_v20, %v5341_v56  ;;  %v4125_v3 = vpop.eup %4124 }
 0x244   :  { %v6812_v24 = vperm.slane %v5050_v49, 0  ;;  %4126 = vpow2.f32 %v2435_v10  ;;  %v1079_v19 = vrot.slane %v5047_v51, 7  ;;  %v5412_v9 = vmul.f32 %v4125_v3, %v5370_v36 }
 0x245   :  { %6950 = vst [vmem:[#allocation79_spill] sm:$0xff] %v5378_v40  ;;  %3958 = vset.pattern.permute.xlu2 %v4685_v46  ;;  %v2085_v32 = vperm.slane %v2077_v22, 0  ;;  %v2400_v20 = vrot.slane %v5239_v62, 1  ;;  %v2729_v3 = vperm.slane %v5383_v21, 0 }
 0x246   :  { %830 = vperm.xlu0 %3971, %v6951_v44   ;;  %6952 = vst [vmem:[#allocation80_spill] sm:$0xff] %v5390_v8  ;;  %3955 = vset.pattern.permute.xlu1 %v4793_v59  ;;  %v2772_v44 = vrot.slane %v5395_v39, 2  ;;  %v1143_v51 = vperm.slane %v1079_v19, 0  ;;  %v6818_v19 = vperm.slane %v5142_v23, 0 }
 0x247   :  { %v2186_v16 = vpop.permute.xlu2 %2185 }
 0x248   :  { %v2210_v14 = vmul.f32 %v2194_v34, %v2186_v16  ;;  %v2497_v26 = vpop.permute.xlu0 %2496  ;;  %v2057_v34 = vadd.f32 1.0, %v4119_v12  ;;  %v5419_v12 = vadd.f32 %v5332_v52, %v5246_v33  ;;  %v2836_v10 = vperm.slane %v2772_v44, 0 }
 0x249   :  { %v5398_v47 = vmul.f32 %v2517_v42, %v2497_v26  ;;  %v2108_v42 = vmul.f32 1.442695, %v2099_v7  ;;  %v6953_v26 = vperm.slane %v4827_v43, 5  ;;  %v2101_v43 = vmul.f32 %v2085_v32, %v5234_v63 }
 0x24a   :  { %v5406_v16 = vadd.f32 %v2218_v17, %v2210_v14  ;;  %6954 = vst [vmem:[#allocation81_spill] sm:$0xff] %v5419_v12  ;;  %4128 = vlog2.f32 %v2057_v34  ;;  %v6955_v14 = vperm.slane %v5001_v29, 2  ;;  %v4127_v22 = vpop.eup %4126  ;;  %v2813_v52 = vperm.slane %v5050_v49, 5 }
 0x24b   :  { %4130 = vpow2.f32 %v2108_v42  ;;  %v5431_v33 = vmul.f32 %v4127_v22, %v5354_v25  ;;  %v2406_v34 = vrot.slane %v5239_v62, 7  ;;  %v2773_v44 = vrot.slane %v5395_v39, 3 }
 0x24c   :  { %v2745_v32 = vmul.f32 %v2729_v3, %v5234_v63 }
 0x24d   :  { %2783 = vperm.xlu2 %3958, %v6812_v24   ;;  %v2837_v4 = vperm.slane %v2773_v44, 0  ;;  %v2126_v44 = vrot.slane %v5285_v45, 3 }
 0x24e   :  { %860 = vperm.xlu0 %3971, %v6953_v26   ;;  %2568 = vperm.xlu1 %3955, %v6955_v14   ;;  %v2408_v26 = vperm.slane %v2400_v20, 0  ;;  %v2124_v14 = vrot.slane %v5285_v45, 1  ;;  %v2112_v20 = vmul.f32 1.442695, %v2101_v43  ;;  %v2753_v56 = vmul.f32 1.442695, %v2745_v32 }
 0x250   :  { %v2798_v17 = vpop.permute.xlu0 %2797  ;;  %v1135_v7 = vpop.permute.xlu1 %1134  ;;  %v2188_v8 = vperm.slane %v2124_v14, 0  ;;  %4132 = vpow2.f32 %v2112_v20 }
 0x251   :  { %v5424_v13 = vmul.f32 %v2836_v10, %v2798_v17  ;;  %v5427_v24 = vmul.f32 %v1143_v51, %v1135_v7  ;;  %v4129_v42 = vpop.eup %4128  ;;  %v2424_v10 = vmul.f32 %v2408_v26, %v5234_v63  ;;  %v2414_v17 = vperm.slane %v2406_v34, 0 }
 0x252   :  { %v4131_v22 = vpop.eup %4130  ;;  %v6957_v7 = vperm.slane %v5001_v29, 3  ;;  %v2065_v12 = vmul.f32 0.6931472, %v4129_v42  ;;  %4134 = vpow2.f32 %v2753_v56  ;;  %v5462_v42 = vadd.f32 %v5277_v57, %v5316_v28 }
 0x253   :  { %6956 = vst [vmem:[#allocation82_spill] sm:$0xff] %v5424_v13  ;;  %v2433_v26 = vmul.f32 1.442695, %v2424_v10  ;;  %v2212_v13 = vmul.f32 0.0, %v4131_v22  ;;  %v2430_v34 = vmul.f32 %v2414_v17, %v5234_v63  ;;  %v2190_v56 = vperm.slane %v2126_v44, 0 }
 0x254   :  { %6959 = vst [vmem:[#allocation83_spill] sm:$0xff] %v5462_v42  ;;  %v2079_v28 = vrot.slane %v5216_v30, 5  ;;  %v2128_v44 = vrot.slane %v5285_v45, 5 }
 0x255   :  { %2818 = vperm.xlu2 %3958, %v2813_v52   ;;  %4136 = vpow2.f32 %v2433_v26  ;;  %v2445_v32 = vmul.f32 1.442695, %v2430_v34 }
 0x256   :  { %3200 = vperm.xlu0 %3971, %v6818_v19   ;;  %2574 = vperm.xlu1 %3955, %v6957_v7   ;;  %v2777_v7 = vrot.slane %v5395_v39, 7  ;;  %v4133_v20 = vpop.eup %4132  ;;  %v2192_v45 = vperm.slane %v2128_v44, 0  ;;  %v6966_v44 = vperm.slane %v5001_v29, 1 }
 0x257   :  { %v2244_v51 = vpop.permute.xlu2 %2243  ;;  %4138 = vpow2.f32 %v2445_v32  ;;  %v2087_v32 = vperm.slane %v2079_v28, 0  ;;  %v2402_v28 = vrot.slane %v5239_v62, 3 }
 0x258   :  { %v5444_v41 = vmul.f32 %v2244_v51, %v5354_v25  ;;  %v2805_v3 = vpop.permute.xlu0 %2804  ;;  %v2144_v43 = vpop.permute.xlu1 %2143  ;;  %v5452_v25 = vsel %vm2069_vm10, %v5336_v1, %v2065_v12  ;;  %v6960_v1 = vperm.slane %v5001_v29, 7  ;;  %v2841_v12 = vperm.slane %v2777_v7, 0 }
 0x259   :  { %v5446_v38 = vmul.f32 %v2837_v4, %v2805_v3  ;;  %v2204_v19 = vmul.f32 %v2188_v8, %v2144_v43  ;;  %v6958_v4 = vperm.slane %v5050_v49, 0  ;;  %v4135_v17 = vpop.eup %4134  ;;  %v2214_v3 = vmul.f32 0.0, %v4133_v20 }
 0x25a   :  { %v5475_v26 = vmul.f32 %v4135_v17, %v5378_v40  ;;  %v6962_v7 = vperm.slane %v5050_v49, 2  ;;  %v2404_v17 = vrot.slane %v5239_v62, 5  ;;  %v2449_v62 = vrot.slane %v5359_v18, 1 }
 0x25b   :  { %v5456_v14 = vadd.f32 %v2212_v13, %v2204_v19  ;;  %v5468_v13 = vmul.f32 %v5452_v25, %v4818_v2  ;;  %v4137_v57 = vpop.eup %4136 }
 0x25d   :  { %3960 = vset.pattern.permute.xlu2 %v4793_v59  ;;  %6961 = vst [vmem:[#allocation84_spill] sm:$0xff] %v5468_v13  ;;  %v3093_v43 = vrot.slane %v5468_v13, 1 }
 0x25e   :  { %2878 = vperm.xlu0 %3971, %v6958_v4   ;;  %2598 = vperm.xlu1 %3955, %v6960_v1   ;;  %v2537_v4 = vmul.f32 %v4137_v57, %v5456_v14  ;;  %v5488_v1 = vadd.f32 %v5312_v0, %v5339_v54  ;;  %v2806_v54 = vperm.slane %v5050_v49, 4  ;;  %v2103_v0 = vmul.f32 %v2087_v32, %v5234_v63 }
 0x25f   :  { %v2250_v8 = vpop.permute.xlu2 %2249  ;;  %v3096_v57 = vrot.slane %v5468_v13, 4 }
 0x260   :  { %v2833_v19 = vpop.permute.xlu0 %2832  ;;  %v2158_v10 = vpop.permute.xlu1 %2157  ;;  %6963 = vst [vmem:[#allocation85_spill] sm:$0xff] %v5488_v1 }
 0x261   :  { %v5470_v51 = vmul.f32 %v2841_v12, %v2833_v19  ;;  %v2206_v22 = vmul.f32 %v2190_v56, %v2158_v10  ;;  %v3157_v56 = vperm.slane %v3093_v43, 0  ;;  %v4139_v19 = vpop.eup %4138  ;;  %v2412_v43 = vperm.slane %v2404_v17, 0 }
 0x262   :  { %v3098_v17 = vrot.slane %v5468_v13, 6 }
 0x263   :  { %v5477_v34 = vadd.f32 %v2214_v3, %v2206_v22  ;;  %v2428_v32 = vmul.f32 %v2412_v43, %v5234_v63  ;;  %v2513_v43 = vperm.slane %v2449_v62, 0  ;;  %v2452_v62 = vrot.slane %v5359_v18, 4 }
 0x265   :  { %2890 = vperm.xlu2 %3960, %v6962_v7   ;;  %v5484_v20 = vmul.f32 %v2250_v8, %v5477_v34  ;;  %v6819_v7 = vperm.slane %v5050_v49, 1 }
 0x266   :  { %2908 = vperm.xlu0 %3971, %v2813_v52   ;;  %3957 = vset.pattern.permute.xlu1 %v4685_v46  ;;  %v5498_v52 = vmul.f32 %v4139_v19, %v5406_v16 }
 0x267   :  { %v2274_v30 = vpop.permute.xlu2 %2273 }
 0x268   :  { %v5492_v12 = vmul.f32 %v2274_v30, %v5406_v16  ;;  %v3113_v10 = vpop.permute.xlu0 %3112  ;;  %v2172_v8 = vpop.permute.xlu1 %2171  ;;  %v2116_v30 = vmul.f32 1.442695, %v2103_v0  ;;  %v3160_v16 = vperm.slane %v3096_v57, 0  ;;  %v2441_v57 = vmul.f32 1.442695, %v2428_v32 }
 0x269   :  { %v5495_v22 = vmul.f32 %v3157_v56, %v3113_v10  ;;  %v2208_v3 = vmul.f32 %v2192_v45, %v2172_v8  ;;  %v2410_v56 = vperm.slane %v2402_v28, 0  ;;  %v4222_v8 = vld [vmem:[%s6722_s5] ss:$0 sm:$0xff]  ;;  %v6968_v28 = vperm.slane %v5050_v49, 7 }
 0x26a   :  { %6964 = vst [vmem:[#allocation86_spill] sm:$0xff] %v5492_v12  ;;  %4140 = vpow2.f32 %v2116_v30  ;;  %v5519_v0 = vadd.f32 %v4222_v8, %v5187_v60 }
 0x26b   :  { %6965 = vst [vmem:[#allocation87_spill] sm:$0xff] %v5495_v22  ;;  %v2426_v10 = vmul.f32 %v2410_v56, %v5234_v63  ;;  %4142 = vpow2.f32 %v2441_v57  ;;  %v6824_v57 = vperm.slane %v5050_v49, 6 }
 0x26c   :  { %v291_v12 = vmin.f32 %v5519_v0, 20.0  ;;  %vm315_vm12 = vcmp.gt.f32.partialorder %v5519_v0, 20.0 }
 0x26d   :  { %2902 = vperm.xlu2 %3960, %v2806_v54  }
 0x26e   :  { %2562 = vperm.xlu0 %3971, %v6966_v44   ;;  %2790 = vperm.xlu1 %3957, %v6819_v7   ;;  %v6969_v44 = vperm.slane %v5001_v29, 0  ;;  %v2726_v7 = vrot.slane %v5383_v21, 5 }
 0x270   :  { %v3134_v19 = vpop.permute.xlu0 %3133  ;;  %v4141_v1 = vpop.eup %4140 }
 0x271   :  { %v5510_v45 = vmul.f32 %v3160_v16, %v3134_v19  ;;  %v2437_v16 = vmul.f32 1.442695, %v2426_v10  ;;  %v3162_v19 = vperm.slane %v3098_v17, 0  ;;  %v2734_v10 = vperm.slane %v2726_v7, 0 }
 0x272   :  { %v298_v17 = vmul.f32 1.442695, %v291_v12 }
 0x273   :  { %6967 = vst [vmem:[#allocation88_spill] sm:$0xff] %v5510_v45  ;;  %4144 = vpow2.f32 %v2437_v16  ;;  %v2750_v7 = vmul.f32 %v2734_v10, %v5234_v63  ;;  %v6823_v10 = vperm.slane %v5142_v23, 2 }
 0x274   :  { %4146 = vpow2.f32 %v298_v17 }
 0x275   :  { %2920 = vperm.xlu2 %3960, %v6968_v28  }
 0x276   :  { %2556 = vperm.xlu0 %3971, %v6969_v44   ;;  %2811 = vperm.xlu1 %3957, %v2806_v54   ;;  %v2216_v54 = vmul.f32 0.0, %v4141_v1 }
 0x277   :  { %v2469_v30 = vpop.permute.xlu2 %2468 }
 0x278   :  { %v2529_v56 = vmul.f32 %v2513_v43, %v2469_v30  ;;  %v3148_v8 = vpop.permute.xlu0 %3147  ;;  %v2238_v45 = vpop.permute.xlu1 %2237  ;;  %v2516_v30 = vperm.slane %v2452_v62, 0 }
 0x279   :  { %v5529_v32 = vmul.f32 %v3162_v19, %v3148_v8  ;;  %v2276_v28 = vmul.f32 %v2238_v45, %v5456_v14  ;;  %v6972_v19 = vperm.slane %v5001_v29, 4 }
 0x27a   :  { %v5527_v13 = vadd.f32 %v2537_v4, %v2529_v56  ;;  %v5536_v4 = vadd.f32 %v2216_v54, %v2208_v3  ;;  %v4143_v56 = vpop.eup %4142  ;;  %v5547_v3 = vld [vmem:[%s6973_s30] ss:$0 sm:$0xff]  ;;  %v2454_v54 = vrot.slane %v5359_v18, 6 }
 0x27b   :  { %6971 = vst [vmem:[#allocation90_spill] sm:$0xff] %v5529_v32  ;;  %v2290_v43 = vsel %vm82_vm0, %v2276_v28, 0.0  ;;  %v4145_v45 = vpop.eup %4144 }
 0x27c   :  { %6970 = vst [vmem:[#allocation89_spill] sm:$0xff] %v5527_v13  ;;  %v2291_v44 = vrot.slane %v2290_v43, 4  ;;  %v2541_v12 = vmul.f32 %v4143_v56, %v5536_v4 }
 0x27d   :  { %3961 = vset.pattern.permute.xlu2 %v4685_v46 }
 0x27e   :  { %2580 = vperm.xlu0 %3971, %v6972_v19   ;;  %v2292_v14 = vadd.f32 %v2291_v44, %v2290_v43  ;;  %2825 = vperm.xlu1 %3957, %v6824_v57   ;;  %v5554_v43 = vmul.f32 %v4145_v45, %v5477_v34  ;;  %v6827_v19 = vperm.slane %v5142_v23, 7  ;;  %v4147_v45 = vpop.eup %4146 }
 0x27f   :  { %v2490_v8 = vpop.permute.xlu2 %2489  ;;  %v303_v57 = vadd.f32 1.0, %v4147_v45 }
 0x280   :  { %v2532_v1 = vmul.f32 %v2516_v30, %v2490_v8  ;;  %v2293_v16 = vrot.slane %v2292_v14, 2  ;;  %v2232_v62 = vpop.permute.xlu1 %2231  ;;  %v2763_v30 = vmul.f32 1.442695, %v2750_v7  ;;  %v5565_v8 = vmul.f32 %v5547_v3, %v4719_v11 }
 0x281   :  { %v2275_v44 = vmul.f32 %v2232_v62, %v5318_v50  ;;  %v2518_v50 = vperm.slane %v2454_v54, 0  ;;  %v5567_v62 = vpop.permute.xlu0 %1449  ;;  %v5573_v7 = vadd.f32 %v5300_v58, %v5427_v24  ;;  %v6828_v58 = vperm.slane %v5142_v23, 3 }
 0x282   :  { %v5550_v28 = vadd.f32 %v5412_v9, %v2532_v1  ;;  %v2294_v17 = vadd.f32 %v2293_v16, %v2292_v14  ;;  %v2722_v9 = vrot.slane %v5383_v21, 1  ;;  %4148 = vpow2.f32 %v2763_v30 }
 0x283   :  { %v2283_v56 = vsel %vm82_vm0, %v2275_v44, 0.0  ;;  %6975 = vst [vmem:[#allocation92_spill] sm:$0xff] %v5573_v7  ;;  %v2344_v54 = vrot.slane %v5565_v8, 1  ;;  %v5587_v30 = vadd.f32 %v2541_v12, %v5398_v47  ;;  %4150 = vlog2.f32 %v303_v57 }
 0x284   :  { %6974 = vst [vmem:[#allocation91_spill] sm:$0xff] %v5550_v28  ;;  %v2295_v34 = vrot.slane %v2294_v17, 1  ;;  %v2284_v1 = vrot.slane %v2283_v56, 4 }
 0x285   :  { %3119 = vperm.xlu2 %3961, %v6823_v10   ;;  %v2730_v10 = vperm.slane %v2722_v9, 0  ;;  %6976 = vst [vmem:[#allocation93_spill] sm:$0xff] %v5587_v30 }
 0x286   :  { %3242 = vperm.xlu0 %3971, %v6827_v19   ;;  %v2296_v16 = vadd.f32 %v2295_v34, %v2294_v17  ;;  %v2285_v44 = vadd.f32 %v2284_v1, %v2283_v56  ;;  %3959 = vset.pattern.permute.xlu1 %v4793_v59 }
 0x287   :  { %v2504_v14 = vpop.permute.xlu2 %2503  ;;  %v2746_v56 = vmul.f32 %v2730_v10, %v5234_v63 }
 0x288   :  { %v2534_v11 = vmul.f32 %v2518_v50, %v2504_v14  ;;  %v2286_v32 = vrot.slane %v2285_v44, 2  ;;  %v2256_v2 = vpop.permute.xlu1 %2255  ;;  %v2360_v24 = vadd.f32 %v2344_v54, %v2296_v16  ;;  %v4149_v9 = vpop.eup %4148  ;;  %v6978_v50 = vperm.slane %v5050_v49, 1 }
 0x289   :  { %v5581_v19 = vmul.f32 %v2256_v2, %v5370_v36  ;;  %v6977_v2 = vperm.slane %v5001_v29, 5  ;;  %v5594_v36 = vmul.f32 %v4149_v9, %v5587_v30  ;;  %v5599_v47 = vpop.permute.xlu0 %1470  ;;  %v2755_v12 = vmul.f32 1.442695, %v2746_v56  ;;  %v4151_v14 = vpop.eup %4150  ;;  %v3977_v9 = vld [vmem:[%s6982_s8] ss:$0 sm:$0xff]  ;;  %v6993_v30 = vld [vmem:[#allocation4_spill] sm:$0xff] }
 0x28a   :  { %v5578_v40 = vadd.f32 %v5402_v37, %v2534_v11  ;;  %v2287_v17 = vadd.f32 %v2286_v32, %v2285_v44  ;;  %v2725_v37 = vrot.slane %v5383_v21, 4  ;;  %v2392_v32 = vmul.f32 %v4838_v15, %v2360_v24 }
 0x28b   :  { %4152 = vpow2.f32 %v2755_v12  ;;  %v311_v54 = vmul.f32 0.6931472, %v4151_v14  ;;  %v6979_v24 = vperm.slane %v4938_v48, 6 }
 0x28c   :  { %v2288_v34 = vrot.slane %v2287_v17, 1  ;;  %v2733_v45 = vperm.slane %v2725_v37, 0  ;;  %v3439_v16 = vrot.slane %v2392_v32, 7 }
 0x28d   :  { %3126 = vperm.xlu2 %3961, %v6828_v58   ;;  %v5625_v32 = vsel %vm315_vm12, %v5519_v0, %v311_v54 }
 0x28e   :  { %2586 = vperm.xlu0 %3971, %v6977_v2   ;;  %v2289_v1 = vadd.f32 %v2288_v34, %v2287_v17  ;;  %2884 = vperm.xlu1 %3959, %v6978_v50   ;;  %v2749_v11 = vmul.f32 %v2733_v45, %v5234_v63  ;;  %6983 = vst [vmem:[#allocation95_spill] sm:$0xff] %v5625_v32  ;;  %v6985_v45 = vperm.slane %v5142_v23, 1  ;;  %v1375_v14 = vrot.slane %v5625_v32, 2 }
 0x290   :  { %v2359_v57 = vadd.f32 %v5565_v8, %v2289_v1  ;;  %v2262_v10 = vpop.permute.xlu1 %2261  ;;  %v2761_v48 = vmul.f32 1.442695, %v2749_v11  ;;  %v875_v11 = vmul.f32 %v5189_v27, %v5121_v5  ;;  %v1378_v5 = vrot.slane %v5625_v32, 5 }
 0x291   :  { %v5603_v29 = vmul.f32 %v2262_v10, %v5536_v4  ;;  %v6980_v4 = vperm.slane %v5050_v49, 3  ;;  %v4153_v2 = vpop.eup %4152 }
 0x292   :  { %v2391_v44 = vmul.f32 %v4730_v6, %v2359_v57  ;;  %v2727_v6 = vrot.slane %v5383_v21, 6  ;;  %v5629_v50 = vmul.f32 %v4153_v2, %v5527_v13  ;;  %v5632_v57 = vmul.f32 %v3977_v9, %v4525_v53  ;;  %v6989_v2 = vld [vmem:[#allocation63_spill] sm:$0xff] }
 0x293   :  { %4154 = vpow2.f32 %v2761_v48  ;;  %v6987_v53 = vperm.slane %v5050_v49, 6 }
 0x294   :  { %v5608_v15 = vsel %vm1732_vm11, %v3439_v16, %v2391_v44  ;;  %6984 = vst [vmem:[#allocation96_spill] sm:$0xff] %v5629_v50  ;;  %v2735_v12 = vperm.slane %v2727_v6, 0  ;;  %v6986_v16 = vperm.slane %v4846_v55, 2  ;;  %v2723_v44 = vrot.slane %v5383_v21, 2 }
 0x295   :  { %3963 = vset.pattern.permute.xlu2 %v4793_v59 }
 0x296   :  { %2267 = vperm.xlu0 %3971, %v6979_v24   ;;  %2896 = vperm.xlu1 %3959, %v6980_v4   ;;  %v2751_v54 = vmul.f32 %v2735_v12, %v5234_v63  ;;  %v5647_v24 = vmul.f32 %v3977_v9, %v4539_v61  ;;  %v2451_v12 = vrot.slane %v5359_v18, 3  ;;  %v2731_v61 = vperm.slane %v2723_v44, 0 }
 0x297   :  { %v2593_v17 = vpop.permute.xlu2 %2592 }
 0x298   :  { %v5616_v56 = vmul.f32 %v2593_v17, %v5578_v40  ;;  %v478_v34 = vpop.permute.xlu0 %477  ;;  %6988 = vst [vmem:[#allocation97_spill] sm:$0xff] %v5647_v24  ;;  %v2747_v49 = vmul.f32 %v2731_v61, %v5234_v63  ;;  %v2515_v7 = vperm.slane %v2451_v12, 0 }
 0x299   :  { %v521_v37 = vmul.f32 %v478_v34, %v5014_v31  ;;  %v2450_v31 = vrot.slane %v5359_v18, 2  ;;  %v4155_v9 = vpop.eup %4154 }
 0x29a   :  { %6981 = vst [vmem:[#allocation94_spill] sm:$0xff] %v5616_v56 }
 0x29b   :  { %v529_v1 = vsel %vm82_vm0, %v521_v37, 0.0  ;;  %v2514_v6 = vperm.slane %v2450_v31, 0  ;;  %v2297_v31 = vsel %vm82_vm0, %v5444_v41, 0.0  ;;  %v5670_v41 = vld [vmem:[%s6725_s6] sm:$0xff] }
 0x29c   :  { %v530_v10 = vrot.slane %v529_v1, 4  ;;  %6991 = vst [vmem:[#allocation98_spill] sm:$0xff] %v5670_v41  ;;  %v2298_v17 = vrot.slane %v2297_v31, 4 }
 0x29d   :  { %3206 = vperm.xlu2 %3963, %v6985_v45   ;;  %v889_v45 = vsel %vm82_vm0, %v875_v11, 0.0  ;;  %v2834_v11 = vperm.slane %v5395_v39, 0 }
 0x29e   :  { %v531_v0 = vadd.f32 %v530_v10, %v529_v1  ;;  %1192 = vperm.xlu0 %3971, %v6986_v16   ;;  %2914 = vperm.xlu1 %3959, %v6987_v53   ;;  %v1383_v10 = vperm.slane %v1375_v14, 0  ;;  %v2765_v53 = vmul.f32 1.442695, %v2751_v54  ;;  %v2304_v14 = vsel %vm82_vm0, %v5484_v20, 0.0 }
 0x29f   :  { %v890_v37 = vrot.slane %v889_v45, 4  ;;  %v2305_v58 = vrot.slane %v2304_v14, 4  ;;  %v2299_v12 = vadd.f32 %v2298_v17, %v2297_v31 }
 0x2a0   :  { %v532_v4 = vrot.slane %v531_v0, 2  ;;  %v484_v34 = vpop.permute.xlu0 %483  ;;  %v2476_v48 = vpop.permute.xlu1 %2475  ;;  %v1399_v54 = vmul.f32 %v5670_v41, %v1383_v10  ;;  %4156 = vpow2.f32 %v2765_v53  ;;  %v2455_v53 = vrot.slane %v5359_v18, 7 }
 0x2a1   :  { %v522_v1 = vmul.f32 %v484_v34, %v6989_v2  ;;  %v2530_v27 = vmul.f32 %v2514_v6, %v2476_v48  ;;  %v5663_v6 = vmul.f32 %v4155_v9, %v5550_v28  ;;  %v1386_v48 = vperm.slane %v1378_v5, 0 }
 0x2a2   :  { %v533_v34 = vadd.f32 %v532_v4, %v531_v0  ;;  %v590_v0 = vrot.slane %v5632_v57, 1  ;;  %v1409_v63 = vmul.f32 1.442695, %v1399_v54  ;;  %v891_v22 = vadd.f32 %v890_v37, %v889_v45 }
 0x2a3   :  { %v536_v16 = vsel %vm82_vm0, %v522_v1, 0.0  ;;  %6990 = vst [vmem:[#allocation63_spill] sm:$0xff] %v5663_v6  ;;  %v6992_v1 = vperm.slane %v4846_v55, 5  ;;  %v1402_v61 = vmul.f32 %v5670_v41, %v1386_v48  ;;  %v2306_v50 = vadd.f32 %v2305_v58, %v2304_v14 }
 0x2a4   :  { %v537_v2 = vrot.slane %v536_v16, 4  ;;  %v534_v10 = vrot.slane %v533_v34, 1  ;;  %v5696_v54 = vadd.f32 %v5431_v33, %v2530_v27  ;;  %4158 = vpow2.f32 %v1409_v63  ;;  %v7001_v63 = vld [vmem:[#allocation65_spill] sm:$0xff] }
 0x2a5   :  { %3965 = vset.pattern.permute.xlu2 %v4685_v46  ;;  %v1415_v58 = vmul.f32 1.442695, %v1402_v61  ;;  %v2300_v14 = vrot.slane %v2299_v12, 2  ;;  %v6999_v33 = vperm.slane %v5142_v23, 0  ;;  %v2519_v27 = vperm.slane %v2455_v53, 0 }
 0x2a6   :  { %v538_v4 = vadd.f32 %v537_v2, %v536_v16  ;;  %1210 = vperm.xlu0 %3971, %v6992_v1   ;;  %3962 = vset.pattern.permute.xlu1 %v4685_v46  ;;  %v5683_v16 = vmul.f32 %v5625_v32, %v6993_v30  ;;  %v6995_v1 = vld [vmem:[#allocation57_spill] sm:$0xff]  ;;  %v2311_v30 = vsel %vm82_vm0, %v5581_v19, 0.0  ;;  %v535_v32 = vadd.f32 %v534_v10, %v533_v34  ;;  %v4157_v17 = vpop.eup %4156 }
 0x2a7   :  { %v2784_v9 = vpop.permute.xlu2 %2783  ;;  %v6998_v19 = vperm.slane %v5187_v60, 2  ;;  %v2312_v34 = vrot.slane %v2311_v30, 4  ;;  %v892_v48 = vrot.slane %v891_v22, 2 }
 0x2a8   :  { %v5679_v44 = vmul.f32 %v2834_v11, %v2784_v9  ;;  %v539_v5 = vrot.slane %v538_v4, 2  ;;  %v502_v20 = vpop.permute.xlu0 %501  ;;  %6994 = vst [vmem:[#allocation99_spill] sm:$0xff] %v5683_v16  ;;  %v2483_v2 = vpop.permute.xlu1 %2482  ;;  %v2757_v11 = vmul.f32 1.442695, %v2747_v49  ;;  %v2728_v9 = vrot.slane %v5383_v21, 7 }
 0x2a9   :  { %v5686_v56 = vmul.f32 %v502_v20, %v6995_v1  ;;  %v2531_v6 = vmul.f32 %v2515_v7, %v2483_v2  ;;  %v6996_v20 = vperm.slane %v5142_v23, 7  ;;  %v6997_v7 = vld [vmem:[#allocation55_spill] sm:$0xff]  ;;  %v1424_v37 = vrot.slane %v5683_v16, 2 }
 0x2aa   :  { %v540_v28 = vadd.f32 %v539_v5, %v538_v4  ;;  %v524_v49 = vmul.f32 %v6997_v7, %v5263_v35  ;;  %v1427_v18 = vrot.slane %v5683_v16, 5  ;;  %4160 = vpow2.f32 %v2757_v11 }
 0x2ab   :  { %v2736_v31 = vperm.slane %v2728_v9, 0  ;;  %v5707_v35 = vmul.f32 %v4157_v17, %v5578_v40  ;;  %v2307_v4 = vrot.slane %v2306_v50, 2  ;;  %v605_v10 = vadd.f32 %v5632_v57, %v535_v32  ;;  %v7002_v9 = vld [vmem:[#allocation6_spill] sm:$0xff] }
 0x2ac   :  { %v541_v13 = vrot.slane %v540_v28, 1  ;;  %v1488_v2 = vperm.slane %v1424_v37, 0  ;;  %4162 = vpow2.f32 %v1415_v58  ;;  %v2318_v11 = vsel %vm82_vm0, %v5603_v29, 0.0  ;;  %v5720_v32 = vld [vmem:[%s6726_s12] sm:$0xff] }
 0x2ad   :  { %3154 = vperm.xlu2 %3965, %v6996_v20   ;;  %7000 = vst [vmem:[#allocation57_spill] sm:$0xff] %v5707_v35  ;;  %v4159_v20 = vpop.eup %4158  ;;  %v2301_v7 = vadd.f32 %v2300_v14, %v2299_v12  ;;  %v2313_v37 = vadd.f32 %v2312_v34, %v2311_v30  ;;  %v6835_v58 = vperm.slane %v5142_v23, 5  ;;  %v2308_v29 = vadd.f32 %v2307_v4, %v2306_v50 }
 0x2ae   :  { %v542_v45 = vadd.f32 %v541_v13, %v540_v28  ;;  %1542 = vperm.xlu0 %3971, %v6998_v19   ;;  %3105 = vperm.xlu1 %3962, %v6999_v33   ;;  %v550_v28 = vsel %vm82_vm0, %v524_v49, 0.0  ;;  %v1504_v49 = vmul.f32 %v1488_v2, %v5567_v62  ;;  %v7003_v19 = vld [vmem:[#allocation11_spill] sm:$0xff]  ;;  %v1512_v12 = vmul.f32 %v4159_v20, %v5462_v42 }
 0x2af   :  { %v665_v33 = vmul.f32 %v7003_v19, %v605_v10  ;;  %v551_v62 = vrot.slane %v550_v28, 4  ;;  %v2724_v14 = vrot.slane %v5383_v21, 3  ;;  %v2314_v4 = vrot.slane %v2313_v37, 2  ;;  %v7008_v21 = vld [vmem:[#allocation60_spill] sm:$0xff] }
 0x2b0   :  { %v606_v5 = vadd.f32 %v590_v0, %v542_v45  ;;  %v520_v13 = vpop.permute.xlu0 %519  ;;  %v2511_v1 = vpop.permute.xlu1 %2510  ;;  %v2752_v0 = vmul.f32 %v5720_v32, %v2736_v31  ;;  %v893_v45 = vadd.f32 %v892_v48, %v891_v22  ;;  %v5729_v31 = vadd.f32 %v5554_v43, %v2531_v6  ;;  %v7005_v43 = vld [vmem:[#allocation82_spill] sm:$0xff] }
 0x2b1   :  { %v5712_v61 = vmul.f32 %v520_v13, %v7001_v63  ;;  %v2535_v53 = vmul.f32 %v2519_v27, %v2511_v1  ;;  %v4161_v17 = vpop.eup %4160  ;;  %v7004_v22 = vperm.slane %v5187_v60, 5  ;;  %v2302_v48 = vrot.slane %v2301_v7, 1 }
 0x2b2   :  { %v666_v40 = vmul.f32 %v7002_v9, %v606_v5  ;;  %v2319_v5 = vrot.slane %v2318_v11, 4  ;;  %v2860_v13 = vmul.f32 %v4161_v17, %v5696_v54  ;;  %v2767_v50 = vmul.f32 1.442695, %v2752_v0  ;;  %v4163_v34 = vpop.eup %4162  ;;  %v7007_v0 = vld [vmem:[#allocation61_spill] sm:$0xff] }
 0x2b3   :  { %v5743_v10 = vadd.f32 %v1512_v12, %v1504_v49  ;;  %v894_v2 = vrot.slane %v893_v45, 1  ;;  %v2346_v1 = vrot.slane %v5565_v8, 3  ;;  %v2309_v63 = vrot.slane %v2308_v29, 1 }
 0x2b4   :  { %v1731_v27 = vrot.slane %v666_v40, 7  ;;  %v5741_v6 = vadd.f32 %v2860_v13, %v7005_v43  ;;  %v2775_v9 = vrot.slane %v5395_v39, 5  ;;  %v523_v20 = vmul.f32 %v7008_v21, %v7007_v0  ;;  %v7015_v21 = vld [vmem:[#allocation70_spill] sm:$0xff] }
 0x2b5   :  { %3966 = vset.pattern.permute.xlu2 %v4793_v59  ;;  %7006 = vst [vmem:[#allocation55_spill] sm:$0xff] %v5743_v10  ;;  %v1491_v17 = vperm.slane %v1427_v18, 0  ;;  %v2320_v19 = vadd.f32 %v2319_v5, %v2318_v11  ;;  %v6840_v13 = vperm.slane %v5187_v60, 7  ;;  %4164 = vpow2.f32 %v2767_v50  ;;  %v2819_v10 = vpop.permute.xlu2 %2818 }
 0x2b6   :  { %v5733_v30 = vsel %vm1732_vm11, %v1731_v27, %v665_v33  ;;  %1560 = vperm.xlu0 %3971, %v7004_v22   ;;  %3140 = vperm.xlu1 %3962, %v6835_v58   ;;  %v7009_v33 = vld [vmem:[#allocation59_spill] sm:$0xff]  ;;  %v552_v22 = vadd.f32 %v551_v62, %v550_v28  ;;  %v2732_v49 = vperm.slane %v2724_v14, 0  ;;  %v2303_v12 = vadd.f32 %v2302_v48, %v2301_v7 }
 0x2b7   :  { %v2315_v43 = vadd.f32 %v2314_v4, %v2313_v37  ;;  %v1507_v58 = vmul.f32 %v1491_v17, %v5599_v47  ;;  %v895_v16 = vadd.f32 %v894_v2, %v893_v45  ;;  %v2310_v41 = vadd.f32 %v2309_v63, %v2308_v29  ;;  %v7011_v7 = vld [vmem:[#allocation75_spill] sm:$0xff] }
 0x2b8   :  { %v831_v40 = vpop.permute.xlu0 %830  ;;  %v2839_v35 = vperm.slane %v2775_v9, 0  ;;  %v7010_v18 = vperm.slane %v5142_v23, 4  ;;  %v543_v28 = vsel %vm82_vm0, %v523_v20, 0.0  ;;  %v2321_v11 = vrot.slane %v2320_v19, 2 }
 0x2b9   :  { %v874_v27 = vmul.f32 %v831_v40, %v7009_v33  ;;  %v5757_v5 = vadd.f32 %v5498_v52, %v2535_v53  ;;  %v1515_v37 = vmul.f32 %v4163_v34, %v7011_v7  ;;  %v553_v62 = vrot.slane %v552_v22, 2 }
 0x2ba   :  { %v2347_v47 = vrot.slane %v5565_v8, 4  ;;  %v2855_v50 = vmul.f32 %v2839_v35, %v2819_v10  ;;  %v7012_v45 = vrot.slane %v5565_v8, 2  ;;  %v2316_v48 = vrot.slane %v2315_v43, 1 }
 0x2bb   :  { %v882_v42 = vsel %vm82_vm0, %v874_v27, 0.0  ;;  %v2748_v4 = vmul.f32 %v5720_v32, %v2732_v49  ;;  %v5767_v52 = vadd.f32 %v1515_v37, %v1507_v58  ;;  %v4165_v53 = vpop.eup %4164  ;;  %v544_v34 = vrot.slane %v543_v28, 4 }
 0x2bc   :  { %v883_v0 = vrot.slane %v882_v42, 4  ;;  %v2361_v29 = vadd.f32 %v7012_v45, %v2303_v12  ;;  %v7014_v2 = vrot.slane %v5647_v24, 1  ;;  %v2362_v35 = vadd.f32 %v2346_v1, %v2310_v41  ;;  %v7016_v1 = vld [vmem:[#allocation21_spill] sm:$0xff] }
 0x2bd   :  { %3224 = vperm.xlu2 %3966, %v7010_v18   ;;  %7013 = vst [vmem:[#allocation65_spill] sm:$0xff] %v5767_v52  ;;  %v2322_v9 = vadd.f32 %v2321_v11, %v2320_v19  ;;  %v2865_v17 = vmul.f32 %v4165_v53, %v5757_v5  ;;  %v5777_v33 = vadd.f32 %v5475_v26, %v5679_v44  ;;  %v3050_v41 = vrot.slane %v5452_v25, 7  ;;  %v7017_v18 = vld [vmem:[#allocation72_spill] sm:$0xff] }
 0x2be   :  { %v884_v14 = vadd.f32 %v883_v0, %v882_v42  ;;  %1572 = vperm.xlu0 %3971, %v6840_v13   ;;  %3964 = vset.pattern.permute.xlu1 %v4793_v59  ;;  %v956_v63 = vadd.f32 %v7014_v2, %v895_v16  ;;  %v5783_v16 = vadd.f32 %v5594_v36, %v2855_v50  ;;  %v2759_v0 = vmul.f32 1.442695, %v2748_v4  ;;  %v7018_v11 = vld [vmem:[#allocation56_spill] sm:$0xff]  ;;  %v7020_v50 = vld [vmem:[#allocation33_spill] sm:$0xff] }
 0x2bf   :  { %v2393_v19 = vmul.f32 %v7016_v1, %v2361_v29  ;;  %v2317_v49 = vadd.f32 %v2316_v48, %v2315_v43  ;;  %v5788_v12 = vadd.f32 %v2865_v17, %v5470_v51  ;;  %v527_v26 = vmul.f32 %v7018_v11, %v7017_v18  ;;  %v7021_v51 = vld [vmem:[#allocation58_spill] sm:$0xff]  ;;  %v7023_v53 = vld [vmem:[#allocation40_spill] sm:$0xff] }
 0x2c0   :  { %v885_v42 = vrot.slane %v884_v14, 2  ;;  %v861_v10 = vpop.permute.xlu0 %860  ;;  %v2569_v40 = vpop.permute.xlu1 %2568  ;;  %v545_v44 = vadd.f32 %v544_v34, %v543_v28  ;;  %v2348_v37 = vrot.slane %v5565_v8, 5  ;;  %v5795_v36 = vadd.f32 %v553_v62, %v552_v22  ;;  %v7022_v48 = vld [vmem:[#allocation62_spill] sm:$0xff]  ;;  %v7024_v28 = vld [vmem:[#allocation7_spill] sm:$0xff] }
 0x2c1   :  { %v5772_v20 = vmul.f32 %v861_v10, %v7015_v21  ;;  %v5780_v27 = vmul.f32 %v2569_v40, %v5696_v54  ;;  %v2394_v45 = vmul.f32 %v7020_v50, %v2362_v35  ;;  %v2323_v29 = vrot.slane %v2322_v9, 1 }
 0x2c2   :  { %v886_v58 = vadd.f32 %v885_v42, %v884_v14  ;;  %v7019_v14 = vperm.slane %v5142_v23, 6  ;;  %v3045_v43 = vrot.slane %v5452_v25, 2  ;;  %v526_v4 = vmul.f32 %v7022_v48, %v7021_v51 }
 0x2c3   :  { %v1016_v2 = vmul.f32 %v7023_v53, %v956_v63  ;;  %v7025_v34 = vrot.slane %v7024_v28, 2  ;;  %v3058_v10 = vperm.slane %v3050_v41, 0  ;;  %v3441_v40 = vrot.slane %v2393_v19, 6 }
 0x2c4   :  { %v887_v54 = vrot.slane %v886_v58, 1  ;;  %v2363_v21 = vadd.f32 %v2347_v47, %v2317_v49  ;;  %v7026_v22 = vperm.slane %v5142_v23, 2  ;;  %4166 = vpow2.f32 %v2759_v0  ;;  %v7028_v49 = vld [vmem:[#allocation29_spill] sm:$0xff] }
 0x2c5   :  { %3236 = vperm.xlu2 %3966, %v7019_v14   ;;  %v571_v62 = vsel %vm82_vm0, %v527_v26, 0.0  ;;  %v546_v35 = vrot.slane %v545_v44, 2  ;;  %v3443_v63 = vrot.slane %v2394_v45, 5  ;;  %v3053_v11 = vperm.slane %v3045_v43, 0 }
 0x2c6   :  { %v888_v42 = vadd.f32 %v887_v54, %v886_v58  ;;  %1345 = vrot.lane.b32.xlu0 %v7025_v34, %s4233_s4  ;;  %3212 = vperm.xlu1 %3964, %v7026_v22   ;;  %v2324_v58 = vadd.f32 %v2323_v29, %v2322_v9  ;;  %v3442_v47 = vsel %vm1735_vm13, %v3441_v40, %v5608_v15  ;;  %v564_v41 = vsel %vm82_vm0, %v526_v4, 0.0  ;;  %v7029_v54 = vld [vmem:[#allocation25_spill] sm:$0xff] }
 0x2c7   :  { %v1761_v19 = vrot.slane %v1016_v2, 7  ;;  %v2395_v14 = vmul.f32 %v7029_v54, %v2363_v21  ;;  %v557_v50 = vsel %vm82_vm0, %v5686_v56, 0.0  ;;  %v3074_v9 = vmul.f32 %v5720_v32, %v3058_v10  ;;  %v7033_v54 = vld [vmem:[#allocation27_spill] sm:$0xff]  ;;  %v7049_v29 = vld [vmem:[#allocation13_spill] sm:$0xff] }
 0x2c8   :  { %v955_v17 = vadd.f32 %v5647_v24, %v888_v42  ;;  %v5809_v1 = vpop.permute.xlu0 %3200  ;;  %v2575_v18 = vpop.permute.xlu1 %2574  ;;  %v3444_v45 = vsel %vm1738_vm14, %v3443_v63, %v3442_v47  ;;  %v7030_v43 = vperm.slane %v4846_v55, 4  ;;  %v3051_v51 = vperm.slane %v5452_v25, 0 }
 0x2c9   :  { %7027 = vst [vmem:[#allocation6_spill] sm:$0xff] %v5809_v1  ;;  %v5816_v26 = vmul.f32 %v2575_v18, %v5729_v31  ;;  %v3046_v48 = vrot.slane %v5452_v25, 3  ;;  %v555_v53 = vrot.slane %v5795_v36, 1  ;;  %v2364_v2 = vadd.f32 %v2348_v37, %v2324_v58  ;;  %v5841_v37 = vpop.permute.xlu2 %2890 }
 0x2ca   :  { %v1015_v0 = vmul.f32 %v7028_v49, %v955_v17  ;;  %v4167_v4 = vpop.eup %4166  ;;  %v3069_v42 = vmul.f32 %v5720_v32, %v3053_v11  ;;  %v572_v34 = vrot.slane %v571_v62, 4  ;;  %v565_v10 = vrot.slane %v564_v41, 4 }
 0x2cb   :  { %v558_v40 = vrot.slane %v557_v50, 4  ;;  %v7031_v21 = vrot.slane %v7024_v28, 4  ;;  %v2861_v22 = vmul.f32 %v4167_v4, %v5729_v31  ;;  %v547_v17 = vadd.f32 %v546_v35, %v545_v44 }
 0x2cc   :  { %v5825_v15 = vsel %vm1732_vm11, %v1761_v19, %v1015_v0  ;;  %v3445_v63 = vrot.slane %v2395_v14, 4  ;;  %v7032_v18 = vperm.slane %v5142_v23, 3  ;;  %v3044_v47 = vrot.slane %v5452_v25, 1 }
 0x2cd   :  { %1204 = vperm.xlu2 %3966, %v7030_v43   ;;  %v3089_v19 = vmul.f32 1.442695, %v3074_v9  ;;  %v5844_v11 = vadd.f32 %v2861_v22, %v5446_v38  ;;  %v3067_v49 = vmul.f32 %v5720_v32, %v3051_v51  ;;  %v3054_v0 = vperm.slane %v3046_v48, 0  ;;  %v7048_v48 = vld [vmem:[#allocation18_spill] sm:$0xff] }
 0x2ce   :  { %1349 = vrot.lane.b32.xlu0 %v7031_v21, %s4233_s4  ;;  %3218 = vperm.xlu1 %3964, %v7032_v18   ;;  %v2396_v31 = vmul.f32 %v7033_v54, %v2364_v2  ;;  %v3079_v14 = vmul.f32 1.442695, %v3069_v42  ;;  %v3048_v43 = vrot.slane %v5452_v25, 5  ;;  %v573_v9 = vadd.f32 %v572_v34, %v571_v62 }
 0x2cf   :  { %v566_v4 = vadd.f32 %v565_v10, %v564_v41  ;;  %v559_v21 = vadd.f32 %v558_v40, %v557_v50  ;;  %v548_v38 = vrot.slane %v547_v17, 1  ;;  %v3052_v22 = vperm.slane %v3044_v47, 0 }
 0x2d0   :  { %v2879_v58 = vpop.permute.xlu0 %2878  ;;  %v2599_v44 = vpop.permute.xlu1 %2598  ;;  %4168 = vpow2.f32 %v3089_v19  ;;  %v3446_v51 = vsel %vm1741_vm15, %v3445_v63, %v3444_v45  ;;  %v3075_v42 = vmul.f32 1.442695, %v3067_v49  ;;  %v3070_v62 = vmul.f32 %v5720_v32, %v3054_v0 }
 0x2d1   :  { %v5849_v35 = vmul.f32 %v2879_v58, %v5777_v33  ;;  %v5853_v18 = vmul.f32 %v2599_v44, %v5757_v5  ;;  %v7035_v58 = vperm.slane %v4846_v55, 6  ;;  %v3447_v41 = vrot.slane %v2396_v31, 3  ;;  %v7038_v31 = vld [vmem:[#allocation17_spill] sm:$0xff] }
 0x2d2   :  { %4170 = vpow2.f32 %v3079_v14  ;;  %v3056_v5 = vperm.slane %v3048_v43, 0  ;;  %v567_v34 = vrot.slane %v566_v4, 2  ;;  %v560_v10 = vrot.slane %v559_v21, 2 }
 0x2d3   :  { %7034 = vst [vmem:[#allocation11_spill] sm:$0xff] %v5853_v18  ;;  %v7036_v45 = vrot.slane %v7024_v28, 6  ;;  %v556_v47 = vadd.f32 %v555_v53, %v5795_v36  ;;  %v574_v19 = vrot.slane %v573_v9, 2  ;;  %v549_v49 = vadd.f32 %v548_v38, %v547_v17  ;;  %v7040_v38 = vld [vmem:[#allocation64_spill] sm:$0xff] }
 0x2d4   :  { %v7037_v0 = vperm.slane %v5142_v23, 5  ;;  %v3068_v54 = vmul.f32 %v5720_v32, %v3052_v22  ;;  %v5873_v44 = vmul.f32 %v5547_v3, %v7038_v31  ;;  %4172 = vpow2.f32 %v3075_v42  ;;  %v5886_v42 = vpop.permute.xlu2 %2902 }
 0x2d5   :  { %1216 = vperm.xlu2 %3966, %v7035_v58   ;;  %v3081_v43 = vmul.f32 1.442695, %v3070_v62  ;;  %v3072_v23 = vmul.f32 %v5720_v32, %v3056_v5  ;;  %v5882_v53 = vsel %vm1744_vm1, %v3447_v41, %v3446_v51  ;;  %v568_v17 = vadd.f32 %v567_v34, %v566_v4  ;;  %v7043_v41 = vld [vmem:[#allocation74_spill] sm:$0xff]  ;;  %v7044_v4 = vld [vmem:[#allocation71_spill] sm:$0xff] }
 0x2d6   :  { %1353 = vrot.lane.b32.xlu0 %v7036_v45, %s4233_s4  ;;  %3230 = vperm.xlu1 %3964, %v7037_v0   ;;  %v4169_v58 = vpop.eup %4168  ;;  %v578_v45 = vsel %vm82_vm0, %v5712_v61, 0.0  ;;  %7039 = vst [vmem:[#allocation82_spill] sm:$0xff] %v5882_v53  ;;  %v896_v3 = vsel %vm82_vm0, %v7040_v38, 0.0  ;;  %v561_v22 = vadd.f32 %v560_v10, %v559_v21  ;;  %v7041_v61 = vrot.slane %v5632_v57, 3 }
 0x2d7   :  { %v5889_v62 = vmul.f32 %v4169_v58, %v5788_v12  ;;  %v7042_v5 = vrot.slane %v5632_v57, 2  ;;  %v3077_v51 = vmul.f32 1.442695, %v3068_v54  ;;  %v877_v34 = vmul.f32 %v7044_v4, %v7043_v41 }
 0x2d8   :  { %v2909_v14 = vpop.permute.xlu0 %2908  ;;  %v4171_v0 = vpop.eup %4170  ;;  %v608_v31 = vadd.f32 %v7041_v61, %v556_v47  ;;  %v579_v2 = vrot.slane %v578_v45, 4  ;;  %v2771_v21 = vrot.slane %v5395_v39, 1  ;;  %v897_v58 = vrot.slane %v896_v3, 4 }
 0x2d9   :  { %v5878_v36 = vmul.f32 %v2909_v14, %v5783_v16  ;;  %v575_v14 = vadd.f32 %v574_v19, %v573_v9  ;;  %v607_v13 = vadd.f32 %v7042_v5, %v549_v49  ;;  %v5900_v10 = vmul.f32 %v4171_v0, %v5741_v6  ;;  %v7045_v49 = vld [vmem:[#allocation66_spill] sm:$0xff] }
 0x2da   :  { %4174 = vpow2.f32 %v3081_v43  ;;  %v3085_v9 = vmul.f32 1.442695, %v3072_v23  ;;  %v4173_v47 = vpop.eup %4172  ;;  %v569_v19 = vrot.slane %v568_v17, 1  ;;  %v910_v54 = vsel %vm82_vm0, %v7045_v49, 0.0  ;;  %v7046_v5 = vld [vmem:[#allocation2_spill] sm:$0xff] }
 0x2db   :  { %v562_v61 = vrot.slane %v561_v22, 1  ;;  %v7047_v41 = vrot.slane %v7046_v5, 2  ;;  %v5910_v0 = vmul.f32 %v7048_v48, %v608_v31  ;;  %v576_v56 = vrot.slane %v575_v14, 1  ;;  %v7052_v31 = vld [vmem:[#allocation89_spill] sm:$0xff] }
 0x2dc   :  { %v5913_v40 = vmul.f32 %v7049_v29, %v607_v13  ;;  %v7050_v43 = vperm.slane %v4846_v55, 3  ;;  %4176 = vpow2.f32 %v3077_v51  ;;  %v903_v23 = vsel %vm82_vm0, %v877_v34, 0.0 }
 0x2dd   :  { %3969 = vset.pattern.permute.xlu2 %v4685_v46  ;;  %v580_v49 = vadd.f32 %v579_v2, %v578_v45  ;;  %v2835_v63 = vperm.slane %v2771_v21, 0  ;;  %v898_v4 = vadd.f32 %v897_v58, %v896_v3  ;;  %v911_v38 = vrot.slane %v910_v54, 4  ;;  %v5926_v3 = vpop.permute.xlu2 %2920  ;;  %v7053_v58 = vld [vmem:[#allocation96_spill] sm:$0xff] }
 0x2de   :  { %1695 = vrot.lane.b32.xlu0 %v7047_v41, %s4233_s4  ;;  %1198 = vperm.xlu1 %3964, %v7050_v43   ;;  %v5919_v41 = vmul.f32 %v4173_v47, %v5777_v33  ;;  %4178 = vpow2.f32 %v3085_v9  ;;  %v570_v13 = vadd.f32 %v569_v19, %v568_v17  ;;  %v563_v29 = vadd.f32 %v562_v61, %v561_v22 }
 0x2df   :  { %v1737_v34 = vrot.slane %v5910_v0, 5  ;;  %v904_v2 = vrot.slane %v903_v23, 4  ;;  %v2774_v33 = vrot.slane %v5395_v39, 4  ;;  %v581_v21 = vrot.slane %v580_v49, 2 }
 0x2e0   :  { %v2563_v50 = vpop.permute.xlu0 %2562  ;;  %7051 = vst [vmem:[#allocation61_spill] sm:$0xff] %v5919_v41  ;;  %v2791_v48 = vpop.permute.xlu1 %2790  ;;  %v7054_v17 = vperm.slane %v5187_v60, 0  ;;  %v577_v9 = vadd.f32 %v576_v56, %v575_v14  ;;  %v1734_v19 = vrot.slane %v5913_v40, 6  ;;  %v912_v61 = vadd.f32 %v911_v38, %v910_v54  ;;  %v7059_v56 = vld [vmem:[#allocation73_spill] sm:$0xff] }
 0x2e1   :  { %v2601_v52 = vmul.f32 %v2563_v50, %v7052_v31  ;;  %v2851_v7 = vmul.f32 %v2835_v63, %v2791_v48  ;;  %v4175_v51 = vpop.eup %4174  ;;  %v7056_v0 = vrot.slane %v5632_v57, 5  ;;  %v7057_v31 = vrot.slane %v5632_v57, 4 }
 0x2e2   :  { %v5934_v63 = vmul.f32 %v4175_v51, %v5844_v11  ;;  %v4177_v22 = vpop.eup %4176  ;;  %v7058_v43 = vrot.slane %v7046_v5, 4  ;;  %v905_v53 = vadd.f32 %v904_v2, %v903_v23  ;;  %v924_v40 = vsel %vm82_vm0, %v7059_v56, 0.0 }
 0x2e3   :  { %v2615_v45 = vsel %vm82_vm0, %v2601_v52, 0.0  ;;  %v5929_v47 = vadd.f32 %v7053_v58, %v2851_v7  ;;  %v899_v52 = vrot.slane %v898_v4, 2  ;;  %v610_v48 = vadd.f32 %v7056_v0, %v570_v13  ;;  %v7062_v0 = vld [vmem:[#allocation79_spill] sm:$0xff] }
 0x2e4   :  { %v2616_v50 = vrot.slane %v2615_v45, 4  ;;  %7055 = vst [vmem:[#allocation60_spill] sm:$0xff] %v5934_v63  ;;  %v609_v7 = vadd.f32 %v7057_v31, %v563_v29  ;;  %v917_v14 = vsel %vm82_vm0, %v5772_v20, 0.0  ;;  %v2838_v38 = vperm.slane %v2774_v33, 0  ;;  %v7063_v20 = vld [vmem:[#allocation8_spill] sm:$0xff] }
 0x2e5   :  { %1435 = vperm.xlu2 %3969, %v7054_v17   ;;  %v3181_v51 = vmul.f32 %v4177_v22, %v5929_v47  ;;  %v4179_v17 = vpop.eup %4178  ;;  %v582_v54 = vadd.f32 %v581_v21, %v580_v49  ;;  %v900_v22 = vadd.f32 %v899_v52, %v898_v4  ;;  %v913_v23 = vrot.slane %v912_v61, 2  ;;  %v5962_v4 = vpop.permute.xlu2 %3119 }
 0x2e6   :  { %v2617_v58 = vadd.f32 %v2616_v50, %v2615_v45  ;;  %1699 = vrot.lane.b32.xlu0 %v7058_v43, %s4233_s4  ;;  %3967 = vset.pattern.permute.xlu1 %v4685_v46  ;;  %v7060_v45 = vld [vmem:[#allocation87_spill] sm:$0xff]  ;;  %v5954_v43 = vmul.f32 %v4179_v17, %v5783_v16  ;;  %v3047_v56 = vrot.slane %v5452_v25, 4  ;;  %v669_v1 = vmul.f32 %v7063_v20, %v609_v7 }
 0x2e7   :  { %v5951_v50 = vadd.f32 %v3181_v51, %v7060_v45  ;;  %v918_v41 = vrot.slane %v917_v14, 4  ;;  %v906_v21 = vrot.slane %v905_v53, 2  ;;  %v925_v63 = vrot.slane %v924_v40, 4  ;;  %v7064_v45 = vld [vmem:[#allocation63_spill] sm:$0xff] }
 0x2e8   :  { %v2618_v13 = vrot.slane %v2617_v58, 2  ;;  %v2557_v29 = vpop.permute.xlu0 %2556  ;;  %7061 = vst [vmem:[#allocation59_spill] sm:$0xff] %v5954_v43  ;;  %v2812_v2 = vpop.permute.xlu1 %2811  ;;  %v1736_v16 = vsel %vm1735_vm13, %v1734_v19, %v5733_v30  ;;  %v583_v17 = vrot.slane %v582_v54, 1  ;;  %v7065_v7 = vperm.slane %v5187_v60, 4 }
 0x2e9   :  { %v2600_v31 = vmul.f32 %v2557_v29, %v7062_v0  ;;  %v2854_v49 = vmul.f32 %v2838_v38, %v2812_v2  ;;  %v7067_v2 = vrot.slane %v5632_v57, 6  ;;  %v1739_v20 = vsel %vm1738_vm14, %v1737_v34, %v1736_v16  ;;  %v7071_v16 = vld [vmem:[#allocation23_spill] sm:$0xff] }
 0x2ea   :  { %v2619_v33 = vadd.f32 %v2618_v13, %v2617_v58  ;;  %v7066_v58 = vld [vmem:[#allocation16_spill] sm:$0xff]  ;;  %v3055_v13 = vperm.slane %v3047_v56, 0  ;;  %v1740_v30 = vrot.slane %v669_v1, 4  ;;  %v919_v19 = vadd.f32 %v918_v41, %v917_v14  ;;  %v7070_v14 = vld [vmem:[#allocation91_spill] sm:$0xff] }
 0x2eb   :  { %v2608_v51 = vsel %vm82_vm0, %v2600_v31, 0.0  ;;  %v5965_v29 = vadd.f32 %v7064_v45, %v2854_v49  ;;  %v670_v38 = vmul.f32 %v7066_v58, %v610_v48  ;;  %v611_v31 = vadd.f32 %v7067_v2, %v577_v9 }
 0x2ec   :  { %v2620_v52 = vrot.slane %v2619_v33, 1  ;;  %v2609_v0 = vrot.slane %v2608_v51, 4  ;;  %v7068_v49 = vrot.slane %v7046_v5, 6  ;;  %v914_v45 = vadd.f32 %v913_v23, %v912_v61 }
 0x2ed   :  { %1463 = vperm.xlu2 %3969, %v7065_v7   ;;  %v907_v28 = vadd.f32 %v906_v21, %v905_v53  ;;  %v2666_v7 = vrot.slane %v5873_v44, 1  ;;  %v7069_v48 = vperm.slane %v5187_v60, 1  ;;  %v1472_v56 = vperm.slane %v5187_v60, 6 }
 0x2ee   :  { %v2621_v43 = vadd.f32 %v2620_v52, %v2619_v33  ;;  %v2610_v18 = vadd.f32 %v2609_v0, %v2608_v51  ;;  %1703 = vrot.lane.b32.xlu0 %v7068_v49, %s4233_s4  ;;  %v901_v9 = vrot.slane %v900_v22, 1  ;;  %v926_v58 = vadd.f32 %v925_v63, %v924_v40 }
 0x2ef   :  { %1442 = vperm.xlu1 %3967, %v7069_v48   ;;  %v584_v34 = vadd.f32 %v583_v17, %v582_v54  ;;  %v3071_v51 = vmul.f32 %v5720_v32, %v3055_v13  ;;  %v671_v61 = vmul.f32 %v7071_v16, %v611_v31  ;;  %v1743_v53 = vrot.slane %v670_v38, 3 }
 0x2f0   :  { %v2611_v1 = vrot.slane %v2610_v18, 2  ;;  %v2581_v41 = vpop.permute.xlu0 %2580  ;;  %v920_v23 = vrot.slane %v919_v19, 2  ;;  %v2682_v21 = vadd.f32 %v2666_v7, %v2621_v43  ;;  %v1742_v0 = vsel %vm1741_vm15, %v1740_v30, %v1739_v20  ;;  %v7073_v20 = vld [vmem:[#allocation45_spill] sm:$0xff]  ;;  %v5996_v7 = vpop.permute.xlu2 %3126 }
 0x2f1   :  { %v5981_v33 = vmul.f32 %v2581_v41, %v7070_v14  ;;  %v915_v2 = vrot.slane %v914_v45, 1  ;;  %v908_v49 = vrot.slane %v907_v28, 1  ;;  %v2776_v63 = vrot.slane %v5395_v39, 6 }
 0x2f2   :  { %v2612_v52 = vadd.f32 %v2611_v1, %v2610_v18  ;;  %v1745_v40 = vsel %vm1744_vm1, %v1743_v53, %v1742_v0  ;;  %v927_v54 = vrot.slane %v926_v58, 2  ;;  %v7072_v17 = vrot.slane %v5632_v57, 7 }
 0x2f3   :  { %v944_v13 = vrot.slane %v5647_v24, 5  ;;  %v902_v43 = vadd.f32 %v901_v9, %v900_v22  ;;  %v3083_v18 = vmul.f32 1.442695, %v3071_v51  ;;  %v1746_v38 = vrot.slane %v671_v61, 2  ;;  %v4225_v61 = vld [vmem:[%s6973_s30] ss:$0 sm:$0xff] }
 0x2f4   :  { %v612_v48 = vadd.f32 %v7072_v17, %v584_v34  ;;  %v2613_v41 = vrot.slane %v2612_v52, 1  ;;  %v921_v31 = vadd.f32 %v920_v23, %v919_v19  ;;  %v2930_v39 = vsel %vm82_vm0, %v5849_v35, 0.0  ;;  %v2826_v34 = vpop.permute.xlu1 %2825  ;;  %v7074_v19 = vld [vmem:[#allocation9_spill] sm:$0xff]  ;;  %v7075_v23 = vld [vmem:[#allocation22_spill] sm:$0xff] }
 0x2f5   :  { %1477 = vperm.xlu2 %3969, %v1472_v56   ;;  %v2714_v30 = vmul.f32 %v7073_v20, %v2682_v21  ;;  %v916_v1 = vadd.f32 %v915_v2, %v914_v45  ;;  %v909_v14 = vadd.f32 %v908_v49, %v907_v28  ;;  %v2350_v16 = vrot.slane %v5565_v8, 7  ;;  %v7077_v49 = vld [vmem:[#allocation53_spill] sm:$0xff] }
 0x2f6   :  { %v2614_v57 = vadd.f32 %v2613_v41, %v2612_v52  ;;  %v2840_v53 = vperm.slane %v2776_v63, 0  ;;  %v928_v22 = vadd.f32 %v927_v54, %v926_v58  ;;  %v672_v51 = vmul.f32 %v7074_v19, %v612_v48  ;;  %v7078_v54 = vld [vmem:[#allocation26_spill] sm:$0xff]  ;;  %v7082_v19 = vld [vmem:[#allocation35_spill] sm:$0xff] }
 0x2f7   :  { %3968 = vset.pattern.permute.xlu1 %v4793_v59  ;;  %v1748_v35 = vsel %vm1747_vm2, %v1746_v38, %v1745_v40  ;;  %v6007_v21 = vmul.f32 %v4225_v61, %v7075_v23  ;;  %v7076_v28 = vrot.slane %v5647_v24, 2  ;;  %v2931_v52 = vrot.slane %v2930_v39, 4 }
 0x2f8   :  { %v2681_v9 = vadd.f32 %v5873_v44, %v2614_v57  ;;  %v2856_v0 = vmul.f32 %v2840_v53, %v2826_v34  ;;  %v922_v2 = vrot.slane %v921_v31, 1  ;;  %v3417_v58 = vrot.slane %v2714_v30, 7  ;;  %v6052_v30 = vpop.permute.xlu0 %3242 }
 0x2f9   :  { %v957_v45 = vadd.f32 %v7076_v28, %v902_v43  ;;  %4180 = vpow2.f32 %v3083_v18  ;;  %v6013_v17 = vmul.f32 %v4225_v61, %v7078_v54  ;;  %v7079_v40 = vrot.slane %v5647_v24, 4  ;;  %v6031_v28 = vpop.permute.xlu2 %3206 }
 0x2fa   :  { %v2713_v63 = vmul.f32 %v7077_v49, %v2681_v9  ;;  %v7080_v41 = vrot.slane %v5647_v24, 3  ;;  %v929_v20 = vrot.slane %v928_v22, 1  ;;  %v1749_v57 = vrot.slane %v672_v51, 1  ;;  %v7081_v9 = vld [vmem:[#allocation57_spill] sm:$0xff]  ;;  %v7084_v49 = vld [vmem:[#allocation43_spill] sm:$0xff] }
 0x2fb   :  { %v959_v48 = vadd.f32 %v7079_v40, %v916_v1  ;;  %v2932_v53 = vadd.f32 %v2931_v52, %v2930_v39  ;;  %v6027_v1 = vadd.f32 %v7081_v9, %v2856_v0  ;;  %v923_v23 = vadd.f32 %v922_v2, %v921_v31  ;;  %v7087_v52 = vld [vmem:[#allocation84_spill] sm:$0xff] }
 0x2fc   :  { %v958_v38 = vadd.f32 %v7080_v41, %v909_v14  ;;  %v6020_v43 = vsel %vm1732_vm11, %v3417_v58, %v2713_v63  ;;  %v1017_v14 = vmul.f32 %v7082_v19, %v957_v45  ;;  %v6034_v58 = vsel %vm1750_vm3, %v1749_v57, %v1748_v35  ;;  %v7085_v63 = vld [vmem:[#allocation31_spill] sm:$0xff]  ;;  %v7089_v2 = vld [vmem:[#allocation88_spill] sm:$0xff] }
 0x2fd   :  { %3974 = vset.pattern.permute.xlu2 %v4793_v59  ;;  %7083 = vst [vmem:[#allocation70_spill] sm:$0xff] %v6034_v58  ;;  %v1019_v51 = vmul.f32 %v7084_v49, %v959_v48  ;;  %v7086_v39 = vperm.slane %v4846_v55, 7  ;;  %v3099_v0 = vrot.slane %v7087_v52, 7  ;;  %v930_v41 = vadd.f32 %v929_v20, %v928_v22  ;;  %v7088_v20 = vld [vmem:[#allocation95_spill] sm:$0xff] }
 0x2fe   :  { %v1018_v54 = vmul.f32 %v7085_v63, %v958_v38  ;;  %v3049_v35 = vrot.slane %v5452_v25, 6  ;;  %v2933_v57 = vrot.slane %v2932_v53, 2  ;;  %v1763_v55 = vrot.slane %v1017_v14, 6 }
 0x2ff   :  { %1222 = vperm.xlu1 %3968, %v7086_v39   ;;  %v4181_v45 = vpop.eup %4180  ;;  %v960_v49 = vadd.f32 %v944_v13, %v923_v23  ;;  %v1381_v63 = vperm.slane %v7088_v20, 0  ;;  %v1767_v39 = vrot.slane %v1019_v51, 4  ;;  %v3163_v25 = vperm.slane %v3099_v0, 0 }
 0x300   :  { %v2885_v9 = vpop.permute.xlu1 %2884  ;;  %v3184_v19 = vmul.f32 %v4181_v45, %v5965_v29  ;;  %v1765_v31 = vrot.slane %v1018_v54, 5  ;;  %v7090_v38 = vrot.slane %v5647_v24, 6  ;;  %v7091_v45 = vld [vmem:[#allocation86_spill] sm:$0xff]  ;;  %v3057_v23 = vperm.slane %v3049_v35, 0 }
 0x301   :  { %v2923_v22 = vmul.f32 %v2885_v9, %v5929_v47  ;;  %v2332_v14 = vsel %vm82_vm0, %v7091_v45, 0.0  ;;  %v7092_v47 = vperm.slane %v5187_v60, 0  ;;  %v2924_v51 = vmul.f32 %v5841_v37, %v5741_v6  ;;  %v7093_v9 = vld [vmem:[#allocation38_spill] sm:$0xff] }
 0x302   :  { %v6055_v48 = vadd.f32 %v3184_v19, %v7089_v2  ;;  %v961_v18 = vadd.f32 %v7090_v38, %v930_v41  ;;  %v2934_v54 = vadd.f32 %v2933_v57, %v2932_v53  ;;  %v1764_v2 = vsel %vm1735_vm13, %v1763_v55, %v5825_v15  ;;  %v7094_v45 = vld [vmem:[#allocation98_spill] sm:$0xff] }
 0x303   :  { %v2937_v13 = vsel %vm82_vm0, %v2923_v22, 0.0  ;;  %v1020_v19 = vmul.f32 %v7093_v9, %v960_v49  ;;  %v1397_v40 = vmul.f32 %v7094_v45, %v1381_v63  ;;  %v1766_v22 = vsel %vm1738_vm14, %v1765_v31, %v1764_v2  ;;  %v7095_v37 = vld [vmem:[#allocation94_spill] sm:$0xff] }
 0x304   :  { %v2938_v0 = vrot.slane %v2937_v13, 4  ;;  %v2333_v34 = vrot.slane %v2332_v14, 4  ;;  %v1768_v6 = vsel %vm1741_vm15, %v1767_v39, %v1766_v22  ;;  %v2650_v53 = vsel %vm82_vm0, %v7095_v37, 0.0  ;;  %v7096_v55 = vld [vmem:[#allocation34_spill] sm:$0xff] }
 0x305   :  { %1530 = vperm.xlu2 %3974, %v7092_v47   ;;  %v3073_v57 = vmul.f32 %v5720_v32, %v3057_v23  ;;  %v1021_v49 = vmul.f32 %v7096_v55, %v961_v18  ;;  %v2944_v63 = vsel %vm82_vm0, %v2924_v51, 0.0  ;;  %v2935_v9 = vrot.slane %v2934_v54, 1 }
 0x306   :  { %v2939_v47 = vadd.f32 %v2938_v0, %v2937_v13  ;;  %v1769_v39 = vrot.slane %v1020_v19, 3  ;;  %v2988_v0 = vrot.slane %v6007_v21, 1  ;;  %v1405_v2 = vmul.f32 1.442695, %v1397_v40  ;;  %v6092_v40 = vpop.permute.xlu0 %2586 }
 0x307   :  { %v3155_v38 = vpop.permute.xlu2 %3154  ;;  %3970 = vset.pattern.permute.xlu1 %v4685_v46  ;;  %v2651_v45 = vrot.slane %v2650_v53, 4  ;;  %v6842_v32 = vperm.slane %v5187_v60, 3  ;;  %v2945_v18 = vrot.slane %v2944_v63, 4  ;;  %v3094_v23 = vrot.slane %v7087_v52, 2 }
 0x308   :  { %v3179_v35 = vmul.f32 %v3163_v25, %v3155_v38  ;;  %v2940_v31 = vrot.slane %v2939_v47, 2  ;;  %v2622_v25 = vsel %vm82_vm0, %v5780_v27, 0.0  ;;  %v2334_v38 = vadd.f32 %v2333_v34, %v2332_v14 }
 0x309   :  { %v7097_v51 = vperm.slane %v5187_v60, 4  ;;  %v2623_v37 = vrot.slane %v2622_v25, 4  ;;  %v2629_v27 = vsel %vm82_vm0, %v5816_v26, 0.0  ;;  %v2936_v19 = vadd.f32 %v2935_v9, %v2934_v54 }
 0x30a   :  { %v6081_v13 = vadd.f32 %v5889_v62, %v3179_v35  ;;  %v2941_v22 = vadd.f32 %v2940_v31, %v2939_v47  ;;  %v3087_v62 = vmul.f32 1.442695, %v3073_v57  ;;  %v1771_v35 = vrot.slane %v1021_v49, 2  ;;  %v2897_v47 = vpop.permute.xlu1 %2896 }
 0x30b   :  { %4182 = vpow2.f32 %v1405_v2  ;;  %v1770_v31 = vsel %vm1744_vm1, %v1769_v39, %v1768_v6  ;;  %v2335_v15 = vrot.slane %v2334_v38, 2  ;;  %v2946_v54 = vadd.f32 %v2945_v18, %v2944_v63  ;;  %v7100_v18 = vld [vmem:[#allocation37_spill] sm:$0xff] }
 0x30c   :  { %v2942_v55 = vrot.slane %v2941_v22, 1  ;;  %v6100_v26 = vsel %vm1747_vm2, %v1771_v35, %v1770_v31  ;;  %v2630_v49 = vrot.slane %v2629_v27, 4  ;;  %v3158_v9 = vperm.slane %v3094_v23, 0  ;;  %v7101_v31 = vld [vmem:[#allocation32_spill] sm:$0xff] }
 0x30d   :  { %1554 = vperm.xlu2 %3974, %v7097_v51   ;;  %v2652_v51 = vadd.f32 %v2651_v45, %v2650_v53  ;;  %7098 = vst [vmem:[#allocation21_spill] sm:$0xff] %v6100_v26  ;;  %v3095_v34 = vrot.slane %v7087_v52, 3  ;;  %v2624_v41 = vadd.f32 %v2623_v37, %v2622_v25  ;;  %v3003_v14 = vadd.f32 %v6007_v21, %v2936_v19  ;;  %v7099_v45 = vld [vmem:[#allocation99_spill] sm:$0xff] }
 0x30e   :  { %v2943_v57 = vadd.f32 %v2942_v55, %v2941_v22  ;;  %4184 = vpow2.f32 %v3087_v62  ;;  %v3174_v6 = vmul.f32 %v3158_v9, %v5962_v4  ;;  %v3097_v39 = vrot.slane %v7087_v52, 5 }
 0x30f   :  { %1456 = vperm.xlu1 %3970, %v6842_v32   ;;  %v2336_v35 = vadd.f32 %v2335_v15, %v2334_v38  ;;  %v2653_v55 = vrot.slane %v2652_v51, 2  ;;  %v2636_v63 = vsel %vm82_vm0, %v5981_v33, 0.0  ;;  %v2947_v37 = vrot.slane %v2946_v54, 2  ;;  %v7105_v32 = vld [vmem:[#allocation90_spill] sm:$0xff] }
 0x310   :  { %v3004_v2 = vadd.f32 %v2988_v0, %v2943_v57  ;;  %v2631_v19 = vadd.f32 %v2630_v49, %v2629_v27  ;;  %v3159_v0 = vperm.slane %v3095_v34, 0  ;;  %v2625_v62 = vrot.slane %v2624_v41, 2  ;;  %v7102_v27 = vld [vmem:[#allocation69_spill] sm:$0xff] }
 0x311   :  { %v4183_v25 = vpop.eup %4182  ;;  %v3035_v57 = vmul.f32 %v7101_v31, %v3003_v14  ;;  %v2925_v15 = vmul.f32 %v2897_v47, %v5844_v11  ;;  %v2637_v38 = vrot.slane %v2636_v63, 4  ;;  %v6118_v33 = vperm.slane %v3097_v39, 0  ;;  %v2268_v11 = vpop.permute.xlu0 %2267 }
 0x312   :  { %v3036_v23 = vmul.f32 %v7100_v18, %v3004_v2  ;;  %v6121_v2 = vadd.f32 %v5900_v10, %v3174_v6  ;;  %v6124_v34 = vmul.f32 %v4183_v25, %v7102_v27  ;;  %v2337_v49 = vrot.slane %v2336_v35, 1  ;;  %v2915_v39 = vpop.permute.xlu1 %2914 }
 0x313   :  { %v2654_v18 = vadd.f32 %v2653_v55, %v2652_v51  ;;  %v2929_v14 = vmul.f32 %v5926_v3, %v5788_v12  ;;  %v2632_v47 = vrot.slane %v2631_v19, 2  ;;  %v2965_v10 = vsel %vm82_vm0, %v5878_v36, 0.0 }
 0x314   :  { %v3395_v9 = vrot.slane %v3036_v23, 7  ;;  %7103 = vst [vmem:[#allocation72_spill] sm:$0xff] %v6124_v34  ;;  %v3245_v6 = vmul.f32 %v6031_v28, %v5951_v50  ;;  %v2626_v51 = vadd.f32 %v2625_v62, %v2624_v41  ;;  %v2948_v55 = vadd.f32 %v2947_v37, %v2946_v54  ;;  %v7106_v37 = vld [vmem:[#allocation7_spill] sm:$0xff] }
 0x315   :  { %1566 = vperm.xlu2 %3974, %v1472_v56   ;;  %v4185_v56 = vpop.eup %4184  ;;  %v2926_v12 = vmul.f32 %v5886_v42, %v5965_v29  ;;  %v2951_v3 = vsel %vm82_vm0, %v2925_v15, 0.0  ;;  %v3175_v31 = vmul.f32 %v3159_v0, %v5996_v7  ;;  %v2338_v53 = vadd.f32 %v2337_v49, %v2336_v35  ;;  %v7108_v62 = vld [vmem:[#allocation11_spill] sm:$0xff] }
 0x316   :  { %v6129_v23 = vsel %vm1732_vm11, %v3395_v9, %v3035_v57  ;;  %v3186_v25 = vmul.f32 %v4185_v56, %v6027_v1  ;;  %v2638_v57 = vadd.f32 %v2637_v38, %v2636_v63  ;;  %v7104_v9 = vld [vmem:[#allocation77_spill] sm:$0xff]  ;;  %v2655_v50 = vrot.slane %v2654_v18, 1 }
 0x317   :  { %v6116_v22 = vpop.permute.xlu2 %3224  ;;  %3972 = vset.pattern.permute.xlu1 %v4793_v59  ;;  %v2281_v27 = vmul.f32 %v2268_v11, %v7104_v9  ;;  %v2966_v28 = vrot.slane %v2965_v10, 4  ;;  %v2928_v56 = vmul.f32 %v2915_v39, %v6027_v1  ;;  %v2633_v41 = vadd.f32 %v2632_v47, %v2631_v19  ;;  %v7109_v38 = vld [vmem:[#allocation93_spill] sm:$0xff] }
 0x318   :  { %v6143_v36 = vadd.f32 %v3186_v25, %v7105_v32  ;;  %v2979_v54 = vsel %vm82_vm0, %v2929_v14, 0.0  ;;  %v3259_v42 = vsel %vm82_vm0, %v3245_v6, 0.0  ;;  %v2952_v29 = vrot.slane %v2951_v3, 4  ;;  %v7110_v14 = vld [vmem:[#allocation60_spill] sm:$0xff] }
 0x319   :  { %v7107_v7 = vrot.slane %v7106_v37, 1  ;;  %v2627_v63 = vrot.slane %v2626_v51, 1  ;;  %v2949_v0 = vrot.slane %v2948_v55, 1  ;;  %v2657_v32 = vsel %vm82_vm0, %v7108_v62, 0.0 }
 0x31a   :  { %v2958_v35 = vsel %vm82_vm0, %v2926_v12, 0.0  ;;  %v2639_v15 = vrot.slane %v2638_v57, 2  ;;  %v2605_v1 = vmul.f32 %v6092_v40, %v7109_v38  ;;  %v2325_v19 = vsel %vm82_vm0, %v2281_v27, 0.0 }
 0x31b   :  { %v6160_v11 = vadd.f32 %v7110_v14, %v3175_v31  ;;  %v2980_v47 = vrot.slane %v2979_v54, 4  ;;  %v2967_v6 = vadd.f32 %v2966_v28, %v2965_v10  ;;  %v3260_v39 = vrot.slane %v3259_v42, 4 }
 0x31c   :  { %v2972_v25 = vsel %vm82_vm0, %v2928_v56, 0.0  ;;  %v7111_v9 = vperm.slane %v5187_v60, 1  ;;  %v2366_v12 = vadd.f32 %v2350_v16, %v2338_v53  ;;  %v2959_v40 = vrot.slane %v2958_v35, 4 }
 0x31d   :  { %1343 = vrot.lane.b32.xlu2 %v7107_v7, %s4233_s4  ;;  %v2634_v7 = vrot.slane %v2633_v41, 1  ;;  %v2953_v62 = vadd.f32 %v2952_v29, %v2951_v3  ;;  %v2628_v27 = vadd.f32 %v2627_v63, %v2626_v51  ;;  %v2950_v38 = vadd.f32 %v2949_v0, %v2948_v55  ;;  %v7113_v3 = vld [vmem:[#allocation61_spill] sm:$0xff] }
 0x31e   :  { %v2658_v61 = vrot.slane %v2657_v32, 4  ;;  %v2326_v4 = vrot.slane %v2325_v19, 4  ;;  %v2640_v14 = vadd.f32 %v2639_v15, %v2638_v57  ;;  %v2643_v10 = vsel %vm82_vm0, %v2605_v1, 0.0 }
 0x31f   :  { %v6157_v49 = vpop.permute.xlu2 %3236  ;;  %1536 = vperm.xlu1 %3972, %v7111_v9   ;;  %v2973_v28 = vrot.slane %v2972_v25, 4  ;;  %v7112_v56 = vperm.slane %v7087_v52, 0  ;;  %v2656_v26 = vadd.f32 %v2655_v50, %v2654_v18  ;;  %v2981_v9 = vadd.f32 %v2980_v47, %v2979_v54 }
 0x320   :  { %v3106_v31 = vpop.permute.xlu1 %3105  ;;  %v2968_v24 = vrot.slane %v2967_v6, 2  ;;  %v3261_v20 = vadd.f32 %v3260_v39, %v3259_v42  ;;  %v2635_v16 = vadd.f32 %v2634_v7, %v2633_v41  ;;  %v2960_v53 = vadd.f32 %v2959_v40, %v2958_v35  ;;  %v7117_v41 = vld [vmem:[#allocation6_spill] sm:$0xff]  ;;  %v7118_v39 = vld [vmem:[#allocation80_spill] sm:$0xff] }
 0x321   :  { %v3172_v58 = vmul.f32 %v7112_v56, %v3106_v31  ;;  %v2954_v34 = vrot.slane %v2953_v62, 2  ;;  %v7114_v55 = vrot.slane %v7106_v37, 3  ;;  %v7115_v57 = vrot.slane %v6007_v21, 2 }
 0x322   :  { %v2659_v63 = vadd.f32 %v2658_v61, %v2657_v32  ;;  %v2644_v0 = vrot.slane %v2643_v10, 4  ;;  %v2327_v52 = vadd.f32 %v2326_v4, %v2325_v19  ;;  %v7116_v18 = vrot.slane %v5873_v44, 2 }
 0x323   :  { %v3188_v51 = vadd.f32 %v7113_v3, %v3172_v58  ;;  %v3005_v29 = vadd.f32 %v7115_v57, %v2950_v38  ;;  %v2641_v54 = vrot.slane %v2640_v14, 1  ;;  %v2974_v42 = vadd.f32 %v2973_v28, %v2972_v25 }
 0x324   :  { %v2683_v50 = vadd.f32 %v7116_v18, %v2628_v27  ;;  %v2982_v1 = vrot.slane %v2981_v9, 2  ;;  %v2969_v58 = vadd.f32 %v2968_v24, %v2967_v6  ;;  %v3262_v47 = vrot.slane %v3261_v20, 2  ;;  %v7121_v6 = vld [vmem:[#allocation47_spill] sm:$0xff] }
 0x325   :  { %1347 = vrot.lane.b32.xlu2 %v7114_v55, %s4233_s4  ;;  %v3244_v35 = vmul.f32 %v7117_v41, %v3188_v51  ;;  %v7119_v61 = vrot.slane %v5873_v44, 3  ;;  %v2961_v4 = vrot.slane %v2960_v53, 2  ;;  %v2955_v19 = vadd.f32 %v2954_v34, %v2953_v62  ;;  %v7123_v34 = vld [vmem:[#allocation48_spill] sm:$0xff] }
 0x326   :  { %v2660_v27 = vrot.slane %v2659_v63, 2  ;;  %v2645_v25 = vadd.f32 %v2644_v0, %v2643_v10  ;;  %v2328_v38 = vrot.slane %v2327_v52, 2  ;;  %v7120_v28 = vrot.slane %v5873_v44, 6 }
 0x327   :  { %v1205_v15 = vpop.permute.xlu2 %1204  ;;  %3973 = vset.pattern.permute.xlu1 %v4685_v46  ;;  %v2684_v32 = vadd.f32 %v7119_v61, %v2635_v16  ;;  %v3252_v40 = vsel %vm82_vm0, %v3244_v35, 0.0  ;;  %v2715_v46 = vmul.f32 %v7121_v6, %v2683_v50  ;;  %v2642_v56 = vadd.f32 %v2641_v54, %v2640_v14  ;;  %v7122_v16 = vld [vmem:[#allocation30_spill] sm:$0xff] }
 0x328   :  { %v6181_v7 = vmul.f32 %v1205_v15, %v7118_v39  ;;  %v3253_v31 = vrot.slane %v3252_v40, 4  ;;  %v6188_v24 = vadd.f32 %v7120_v28, %v2656_v26  ;;  %v2975_v3 = vrot.slane %v2974_v42, 2  ;;  %v7125_v26 = vld [vmem:[#allocation39_spill] sm:$0xff] }
 0x329   :  { %v2983_v51 = vadd.f32 %v2982_v1, %v2981_v9  ;;  %v2970_v55 = vrot.slane %v2969_v58, 1  ;;  %v3263_v57 = vadd.f32 %v3262_v47, %v3261_v20  ;;  %v6192_v18 = vmul.f32 %v7122_v16, %v2366_v12  ;;  %v3141_v47 = vpop.permute.xlu1 %3140 }
 0x32a   :  { %v2716_v62 = vmul.f32 %v7123_v34, %v2684_v32  ;;  %v2962_v41 = vadd.f32 %v2961_v4, %v2960_v53  ;;  %v2956_v10 = vrot.slane %v2955_v19, 1  ;;  %v3254_v0 = vadd.f32 %v3253_v31, %v3252_v40 }
 0x32b   :  { %v7124_v35 = vrot.slane %v7106_v37, 5  ;;  %v6199_v15 = vmul.f32 %v7125_v26, %v3005_v29  ;;  %v2661_v14 = vadd.f32 %v2660_v27, %v2659_v63  ;;  %v2646_v50 = vrot.slane %v2645_v25, 2  ;;  %v7128_v29 = vld [vmem:[#allocation81_spill] sm:$0xff] }
 0x32c   :  { %v2329_v9 = vadd.f32 %v2328_v38, %v2327_v52  ;;  %v3419_v54 = vrot.slane %v2715_v46, 6  ;;  %v7126_v20 = vrot.slane %v5873_v44, 4  ;;  %v2976_v1 = vadd.f32 %v2975_v3, %v2974_v42 }
 0x32d   :  { %1351 = vrot.lane.b32.xlu2 %v7124_v35, %s4233_s4  ;;  %v3248_v53 = vmul.f32 %v6116_v22, %v6055_v48  ;;  %v2984_v32 = vrot.slane %v2983_v51, 1  ;;  %v2971_v4 = vadd.f32 %v2970_v55, %v2969_v58  ;;  %v3264_v40 = vrot.slane %v3263_v57, 1  ;;  %v7129_v22 = vld [vmem:[#allocation50_spill] sm:$0xff] }
 0x32e   :  { %v2685_v12 = vadd.f32 %v7126_v20, %v2642_v56  ;;  %v7127_v31 = vperm.slane %v5187_v60, 7  ;;  %v3421_v52 = vrot.slane %v2716_v62, 5  ;;  %v2963_v27 = vrot.slane %v2962_v41, 1 }
 0x32f   :  { %v1217_v61 = vpop.permute.xlu2 %1216  ;;  %v2957_v38 = vadd.f32 %v2956_v10, %v2955_v19  ;;  %v3255_v28 = vrot.slane %v3254_v0, 2  ;;  %v2662_v6 = vrot.slane %v2661_v14, 1  ;;  %v2647_v42 = vadd.f32 %v2646_v50, %v2645_v25 }
 0x330   :  { %1484 = vperm.xlu1 %3973, %v7127_v31   ;;  %v6208_v63 = vmul.f32 %v1217_v61, %v7128_v29  ;;  %v2330_v46 = vrot.slane %v2329_v9, 1  ;;  %v3177_v48 = vmul.f32 %v6118_v33, %v3141_v47  ;;  %v2717_v56 = vmul.f32 %v7129_v22, %v2685_v12 }
 0x331   :  { %v2977_v3 = vrot.slane %v2976_v1, 1  ;;  %v3280_v58 = vsel %vm82_vm0, %v3248_v53, 0.0  ;;  %v3420_v55 = vsel %vm1735_vm13, %v3419_v54, %v6020_v43  ;;  %v7130_v16 = vrot.slane %v6007_v21, 5  ;;  %v7133_v53 = vld [vmem:[#allocation59_spill] sm:$0xff] }
 0x332   :  { %v3265_v62 = vadd.f32 %v3264_v40, %v3263_v57  ;;  %v3251_v19 = vmul.f32 %v6052_v30, %v6081_v13  ;;  %v3422_v25 = vsel %vm1738_vm14, %v3421_v52, %v3420_v55  ;;  %v2985_v10 = vadd.f32 %v2984_v32, %v2983_v51 }
 0x333   :  { %v3008_v34 = vadd.f32 %v7130_v16, %v2971_v4  ;;  %v2964_v35 = vadd.f32 %v2963_v27, %v2962_v41  ;;  %v7131_v33 = vrot.slane %v6007_v21, 3  ;;  %v3256_v50 = vadd.f32 %v3255_v28, %v3254_v0  ;;  %v7134_v41 = vld [vmem:[#allocation46_spill] sm:$0xff] }
 0x334   :  { %v7132_v20 = vrot.slane %v7046_v5, 1  ;;  %v2648_v43 = vrot.slane %v2647_v42, 1  ;;  %v2331_v54 = vadd.f32 %v2330_v46, %v2329_v9  ;;  %v3281_v12 = vrot.slane %v3280_v58, 4 }
 0x335   :  { %v3006_v26 = vadd.f32 %v7131_v33, %v2957_v38  ;;  %v6226_v57 = vadd.f32 %v7133_v53, %v3177_v48  ;;  %v2663_v47 = vadd.f32 %v2662_v6, %v2661_v14  ;;  %v3423_v30 = vrot.slane %v2717_v56, 4 }
 0x336   :  { %1693 = vrot.lane.b32.xlu2 %v7132_v20, %s4233_s4  ;;  %v2978_v13 = vadd.f32 %v2977_v3, %v2976_v1  ;;  %v3451_v51 = vrot.slane %v6192_v18, 1  ;;  %v3040_v61 = vmul.f32 %v7134_v41, %v3008_v34  ;;  %v7135_v32 = vrot.slane %v6013_v17, 1  ;;  %v7137_v1 = vld [vmem:[#allocation41_spill] sm:$0xff]  ;;  %v7142_v34 = vld [vmem:[#allocation10_spill] sm:$0xff]  ;;  %v7146_v20 = vld [vmem:[#allocation36_spill] sm:$0xff] }
 0x337   :  { %v3301_v4 = vsel %vm82_vm0, %v3251_v19, 0.0  ;;  %v3250_v40 = vmul.f32 %v6157_v49, %v6143_v36  ;;  %v3397_v9 = vrot.slane %v6199_v15, 6  ;;  %v7136_v14 = vrot.slane %v6007_v21, 4 }
 0x338   :  { %v3326_v0 = vadd.f32 %v7135_v32, %v3265_v62  ;;  %3975 = vset.pattern.permute.xlu1 %v4793_v59  ;;  %v3038_v52 = vmul.f32 %v7137_v1, %v3006_v26  ;;  %v3257_v18 = vrot.slane %v3256_v50, 1  ;;  %v7138_v27 = vrot.slane %v6007_v21, 7  ;;  %v3213_v22 = vpop.permute.xlu1 %3212 }
 0x339   :  { %v3007_v31 = vadd.f32 %v7136_v14, %v2964_v35  ;;  %v2649_v28 = vadd.f32 %v2648_v43, %v2647_v42  ;;  %v7139_v6 = vrot.slane %v5565_v8, 6  ;;  %v3282_v48 = vadd.f32 %v3281_v12, %v3280_v58 }
 0x33a   :  { %v3010_v38 = vadd.f32 %v7138_v27, %v2985_v10  ;;  %v3302_v36 = vrot.slane %v3301_v4, 4  ;;  %v7140_v59 = vrot.slane %v6007_v21, 6  ;;  %v3246_v15 = vmul.f32 %v3213_v22, %v6121_v2  ;;  %v7144_v2 = vld [vmem:[#allocation42_spill] sm:$0xff] }
 0x33b   :  { %v2365_v46 = vadd.f32 %v7139_v6, %v2331_v54  ;;  %v6248_v56 = vsel %vm1741_vm15, %v3423_v30, %v3422_v25  ;;  %v7141_v3 = vrot.slane %v5873_v44, 7  ;;  %v3403_v16 = vrot.slane %v3040_v61, 3 }
 0x33c   :  { %v3009_v49 = vadd.f32 %v7140_v59, %v2978_v13  ;;  %v3358_v42 = vmul.f32 %v7142_v34, %v3326_v0  ;;  %v3294_v8 = vsel %vm82_vm0, %v3250_v40, 0.0  ;;  %v3399_v62 = vrot.slane %v3038_v52, 5  ;;  %v7150_v0 = vld [vmem:[#allocation49_spill] sm:$0xff]  ;;  %v7151_v52 = vld [vmem:[#allocation54_spill] sm:$0xff] }
 0x33d   :  { %v2688_v55 = vadd.f32 %v7141_v3, %v2663_v47  ;;  %v3258_v58 = vadd.f32 %v3257_v18, %v3256_v50  ;;  %v3266_v19 = vsel %vm82_vm0, %v3246_v15, 0.0  ;;  %v7143_v21 = vrot.slane %v7046_v5, 3  ;;  %v7147_v47 = vld [vmem:[#allocation44_spill] sm:$0xff] }
 0x33e   :  { %v3039_v10 = vmul.f32 %v7144_v2, %v3007_v31  ;;  %v7145_v25 = vrot.slane %v5873_v44, 5  ;;  %v3283_v33 = vrot.slane %v3282_v48, 2  ;;  %v3267_v26 = vrot.slane %v3266_v19, 4  ;;  %v7153_v15 = vld [vmem:[#allocation72_spill] sm:$0xff] }
 0x33f   :  { %1697 = vrot.lane.b32.xlu2 %v7143_v21, %s4233_s4  ;;  %v2397_v43 = vmul.f32 %v7146_v20, %v2365_v46  ;;  %v3303_v54 = vadd.f32 %v3302_v36, %v3301_v4  ;;  %v3295_v12 = vrot.slane %v3294_v8, 4  ;;  %v1436_v53 = vpop.permute.xlu2 %1435  ;;  %v3041_v50 = vmul.f32 %v7147_v47, %v3009_v49  ;;  %v7157_v2 = vld [vmem:[#allocation52_spill] sm:$0xff]  ;;  %v7158_v47 = vld [vmem:[#allocation5_spill] sm:$0xff] }
 0x340   :  { %v2686_v35 = vadd.f32 %v7145_v25, %v2649_v28  ;;  %v3398_v30 = vsel %vm1735_vm13, %v3397_v9, %v6129_v23  ;;  %v3268_v13 = vadd.f32 %v3267_v26, %v3266_v19  ;;  %v7148_v41 = vperm.slane %v5187_v60, 3  ;;  %v3219_v9 = vpop.permute.xlu1 %3218  ;;  %v7152_v28 = vld [vmem:[#allocation82_spill] sm:$0xff] }
 0x341   :  { %v7149_v61 = vperm.slane %v7099_v45, 0  ;;  %v3449_v32 = vrot.slane %v2397_v43, 2  ;;  %v3042_v40 = vmul.f32 %v7150_v0, %v3010_v38  ;;  %v3325_v14 = vadd.f32 %v6013_v17, %v3258_v58 }
 0x342   :  { %1548 = vperm.xlu1 %3975, %v7148_v41   ;;  %v3400_v4 = vsel %vm1738_vm14, %v3399_v62, %v3398_v30  ;;  %v3401_v31 = vrot.slane %v3039_v10, 4  ;;  %v3405_v1 = vrot.slane %v3041_v50, 2  ;;  %v2718_v18 = vmul.f32 %v7151_v52, %v2686_v35 }
 0x343   :  { %v1502_v44 = vmul.f32 %v7149_v61, %v1436_v53  ;;  %v3284_v27 = vadd.f32 %v3283_v33, %v3282_v48  ;;  %v3269_v23 = vrot.slane %v3268_v13, 2  ;;  %v3450_v60 = vsel %vm1747_vm2, %v3449_v32, %v7152_v28  ;;  %v7154_v48 = vld [vmem:[#allocation14_spill] sm:$0xff] }
 0x344   :  { %v3296_v6 = vadd.f32 %v3295_v12, %v3294_v8  ;;  %v3247_v46 = vmul.f32 %v3219_v9, %v6160_v11  ;;  %v3452_v22 = vsel %vm1750_vm3, %v3451_v51, %v3450_v60  ;;  %v3402_v38 = vsel %vm1741_vm15, %v3401_v31, %v3400_v4  ;;  %v7156_v51 = vld [vmem:[#allocation51_spill] sm:$0xff] }
 0x345   :  { %v3270_v36 = vadd.f32 %v3269_v23, %v3268_v13  ;;  %v3404_v59 = vsel %vm1744_vm1, %v3403_v16, %v3402_v38  ;;  %v3407_v49 = vrot.slane %v3042_v40, 1  ;;  %v6280_v3 = vadd.f32 %v7153_v15, %v1502_v44 }
 0x346   :  { %v3357_v34 = vmul.f32 %v7154_v48, %v3325_v14  ;;  %v3273_v62 = vsel %vm82_vm0, %v3247_v46, 0.0  ;;  %v7155_v8 = vrot.slane %v7046_v5, 5  ;;  %v3406_v11 = vsel %vm1747_vm2, %v3405_v1, %v3404_v59  ;;  %v7160_v14 = vld [vmem:[#allocation12_spill] sm:$0xff] }
 0x347   :  { %v2719_v58 = vmul.f32 %v7156_v51, %v6188_v24  ;;  %v3271_v19 = vrot.slane %v3270_v36, 1  ;;  %v3274_v21 = vrot.slane %v3273_v62, 4  ;;  %v6291_v16 = vsel %vm1750_vm3, %v3407_v49, %v3406_v11  ;;  %v7161_v49 = vld [vmem:[#allocation28_spill] sm:$0xff]  ;;  %v7163_v11 = vld [vmem:[#allocation15_spill] sm:$0xff] }
 0x348   :  { %1701 = vrot.lane.b32.xlu2 %v7155_v8, %s4233_s4  ;;  %v2720_v10 = vmul.f32 %v7157_v2, %v2688_v55  ;;  %v3373_v25 = vrot.slane %v3358_v42, 7  ;;  %v3425_v35 = vrot.slane %v2718_v18, 3  ;;  %v3285_v33 = vrot.slane %v3284_v27, 1  ;;  %v3231_v41 = vpop.permute.xlu1 %3230 }
 0x349   :  { %v3297_v26 = vrot.slane %v3296_v6, 2  ;;  %v3304_v20 = vrot.slane %v3303_v54, 2  ;;  %v3311_v43 = vrot.slane %v6013_v17, 2  ;;  %v3272_v12 = vadd.f32 %v3271_v19, %v3270_v36 }
 0x34a   :  { %v3275_v53 = vadd.f32 %v3274_v21, %v3273_v62  ;;  %v7159_v50 = vrot.slane %v7158_v47, 7  ;;  %v3374_v24 = vsel %vm1732_vm11, %v3373_v25, %v3357_v34  ;;  %v3427_v61 = vrot.slane %v2719_v58, 2  ;;  %v7162_v34 = vld [vmem:[#allocation85_spill] sm:$0xff]  ;;  %v7165_v47 = vld [vmem:[#allocation95_spill] sm:$0xff] }
 0x34b   :  { %v3327_v30 = vadd.f32 %v3311_v43, %v3272_v12  ;;  %v3429_v55 = vrot.slane %v2720_v10, 1  ;;  %v3286_v42 = vadd.f32 %v3285_v33, %v3284_v27  ;;  %v3298_v44 = vadd.f32 %v3297_v26, %v3296_v6 }
 0x34c   :  { %1005 = vrot.lane.b32.xlu1 %v7159_v50, %s4233_s4  ;;  %v3276_v13 = vrot.slane %v3275_v53, 2  ;;  %v3249_v32 = vmul.f32 %v3231_v41, %v6226_v57  ;;  %v3426_v0 = vsel %vm1744_vm1, %v3425_v35, %v6248_v56  ;;  %v3305_v40 = vadd.f32 %v3304_v20, %v3303_v54  ;;  %v7167_v41 = vld [vmem:[#allocation20_spill] sm:$0xff] }
 0x34d   :  { %v3359_v4 = vmul.f32 %v7160_v14, %v3327_v30  ;;  %v3428_v1 = vsel %vm1747_vm2, %v3427_v61, %v3426_v0  ;;  %v3313_v52 = vrot.slane %v6013_v17, 4  ;;  %v3299_v60 = vrot.slane %v3298_v44, 1  ;;  %v7166_v30 = vld [vmem:[#allocation19_spill] sm:$0xff]  ;;  %v6336_v14 = vld [vmem:[%s6725_s6] sm:$0xff] }
 0x34e   :  { %v3277_v31 = vadd.f32 %v3276_v13, %v3275_v53  ;;  %v3287_v18 = vsel %vm82_vm0, %v3249_v32, 0.0  ;;  %v3430_v27 = vsel %vm1750_vm3, %v3429_v55, %v3428_v1  ;;  %v3312_v56 = vrot.slane %v6013_v17, 3  ;;  %v7168_v55 = vld [vmem:[#allocation24_spill] sm:$0xff] }
 0x34f   :  { %v3375_v23 = vrot.slane %v3359_v4, 6  ;;  %v3288_v57 = vrot.slane %v3287_v18, 4  ;;  %v3329_v28 = vadd.f32 %v3313_v52, %v3286_v42  ;;  %v3306_v54 = vrot.slane %v3305_v40, 1 }
 0x350   :  { %3459 = vrot.lane.b32.xlu2 %v3452_v22, %s4234_s25  ;;  %v3278_v9 = vrot.slane %v3277_v31, 1  ;;  %v1199_v22 = vpop.permute.xlu1 %1198  ;;  %v3300_v48 = vadd.f32 %v3299_v60, %v3298_v44  ;;  %v3315_v19 = vrot.slane %v6013_v17, 6  ;;  %v3316_v10 = vrot.slane %v6013_v17, 7 }
 0x351   :  { %v3289_v46 = vadd.f32 %v3288_v57, %v3287_v18  ;;  %v3376_v38 = vsel %vm1735_vm13, %v3375_v23, %v3374_v24  ;;  %v3361_v15 = vmul.f32 %v7161_v49, %v3329_v28  ;;  %v6314_v62 = vmul.f32 %v1199_v22, %v7162_v34  ;;  %v7169_v57 = vld [vmem:[#allocation67_spill] sm:$0xff] }
 0x352   :  { %v3279_v6 = vadd.f32 %v3278_v9, %v3277_v31  ;;  %v3307_v8 = vadd.f32 %v3306_v54, %v3305_v40  ;;  %v3331_v35 = vadd.f32 %v3315_v19, %v3300_v48  ;;  %v3314_v33 = vrot.slane %v6013_v17, 5  ;;  %v7170_v54 = vld [vmem:[#allocation92_spill] sm:$0xff] }
 0x353   :  { %v3290_v59 = vrot.slane %v3289_v46, 2  ;;  %v3379_v25 = vrot.slane %v3361_v15, 4  ;;  %v7164_v20 = vrot.slane %v7106_v37, 7  ;;  %v1374_v50 = vrot.slane %v7165_v47, 1 }
 0x354   :  { %1341 = vrot.lane.b32.xlu1 %v7106_v37, %s4233_s4  ;;  %v3328_v36 = vadd.f32 %v3312_v56, %v3279_v6  ;;  %v3332_v43 = vadd.f32 %v3316_v10, %v3307_v8  ;;  %v3363_v13 = vmul.f32 %v7166_v30, %v3331_v35  ;;  %v1423_v52 = vrot.slane %v7099_v45, 1 }
 0x355   :  { %v3291_v58 = vadd.f32 %v3290_v59, %v3289_v46  ;;  %v1382_v17 = vperm.slane %v1374_v50, 0  ;;  %v1193_v46 = vpop.permute.xlu0 %1192  ;;  %v1379_v35 = vrot.slane %v7165_v47, 6 }
 0x356   :  { %v3360_v51 = vmul.f32 %v7163_v11, %v3328_v36  ;;  %v3364_v42 = vmul.f32 %v7168_v55, %v3332_v43  ;;  %v3383_v32 = vrot.slane %v3363_v13, 2  ;;  %v1487_v18 = vperm.slane %v1423_v52, 0  ;;  %v7172_v11 = vld [vmem:[#allocation68_spill] sm:$0xff] }
 0x357   :  { %v3292_v2 = vrot.slane %v3291_v58, 1  ;;  %v1398_v4 = vmul.f32 %v6336_v14, %v1382_v17  ;;  %v7171_v36 = vrot.slane %v7046_v5, 7  ;;  %v1253_v13 = vsel %vm82_vm0, %v6314_v62, 0.0 }
 0x358   :  { %v3377_v21 = vrot.slane %v3360_v51, 5  ;;  %v3385_v0 = vrot.slane %v3364_v42, 1 }
 0x359   :  { %v3293_v26 = vadd.f32 %v3292_v2, %v3291_v58  ;;  %v1407_v1 = vmul.f32 1.442695, %v1398_v4  ;;  %v7173_v58 = vld [vmem:[#allocation83_spill] sm:$0xff]  ;;  %v1254_v4 = vrot.slane %v1253_v13, 4 }
 0x35a   :  { %v3378_v12 = vsel %vm1738_vm14, %v3377_v21, %v3376_v38  ;;  %v6351_v38 = vpop.permute.xlu2 %1463  ;;  %v1226_v19 = vmul.f32 %v1193_v46, %v7173_v58  ;;  %v7174_v21 = vld [vmem:[#allocation78_spill] sm:$0xff]  ;;  %v1274_v46 = vsel %vm82_vm0, %v6208_v63, 0.0 }
 0x35b   :  { %v3380_v53 = vsel %vm1741_vm15, %v3379_v25, %v3378_v12  ;;  %v3330_v24 = vadd.f32 %v3314_v33, %v3293_v26  ;;  %4186 = vpow2.f32 %v1407_v1  ;;  %v1239_v2 = vsel %vm82_vm0, %v7174_v21, 0.0  ;;  %v7175_v26 = vld [vmem:[#allocation75_spill] sm:$0xff] }
 0x35c   :  { %1355 = vrot.lane.b32.xlu1 %v7164_v20, %s4233_s4  ;;  %v1246_v10 = vsel %vm82_vm0, %v1226_v19, 0.0  ;;  %v1377_v25 = vrot.slane %v7165_v47, 4  ;;  %v1376_v12 = vrot.slane %v7165_v47, 3 }
 0x35d   :  { %v3362_v61 = vmul.f32 %v7167_v41, %v3330_v24  ;;  %v1211_v59 = vpop.permute.xlu0 %1210  ;;  %v1240_v24 = vrot.slane %v1239_v2, 4  ;;  %v1247_v30 = vrot.slane %v1246_v10, 4  ;;  %v6387_v41 = vld [vmem:[%s6982_s8] ss:$0 sm:$0xff] }
 0x35e   :  { %v1229_v20 = vmul.f32 %v1211_v59, %v7175_v26  ;;  %v1385_v42 = vperm.slane %v1377_v25, 0 }
 0x35f   :  { %v3381_v44 = vrot.slane %v3362_v61, 3  ;;  %v7177_v61 = vld [vmem:[#allocation3_spill] sm:$0xff]  ;;  %v1241_v1 = vadd.f32 %v1240_v24, %v1239_v2  ;;  %v1248_v52 = vadd.f32 %v1247_v30, %v1246_v10  ;;  %v1275_v10 = vrot.slane %v1274_v46, 4 }
 0x360   :  { %v6391_v55 = vmul.f32 %v6387_v41, %v7177_v61  ;;  %v1267_v62 = vsel %vm82_vm0, %v1229_v20, 0.0 }
 0x361   :  { %v3382_v37 = vsel %vm1744_vm1, %v3381_v44, %v3380_v53  ;;  %v4187_v9 = vpop.eup %4186  ;;  %v7176_v53 = vld [vmem:[#allocation76_spill] sm:$0xff]  ;;  %v1249_v21 = vrot.slane %v1248_v52, 2 }
 0x362   :  { %v3384_v40 = vsel %vm1747_vm2, %v3383_v32, %v3382_v37  ;;  %v1511_v28 = vmul.f32 %v4187_v9, %v7169_v57  ;;  %v6356_v22 = vpop.permute.xlu2 %1477  ;;  %v1232_v50 = vsel %vm82_vm0, %v7176_v53, 0.0  ;;  %v1387_v32 = vperm.slane %v1379_v35, 0  ;;  %v7178_v57 = vld [vmem:[#allocation97_spill] sm:$0xff] }
 0x363   :  { %v3386_v31 = vsel %vm1750_vm3, %v3385_v0, %v3384_v40  ;;  %v1380_v37 = vrot.slane %v7165_v47, 7  ;;  %v1233_v0 = vrot.slane %v1232_v50, 4  ;;  %v1260_v40 = vsel %vm82_vm0, %v6181_v7, 0.0 }
 0x364   :  { %3455 = vrot.lane.b32.xlu1 %v6291_v16, %s4234_s25  ;;  %v1443_v16 = vpop.permute.xlu1 %1442  ;;  %v1401_v9 = vmul.f32 %v6336_v14, %v1385_v42  ;;  %v1268_v47 = vrot.slane %v1267_v62, 4  ;;  %v1403_v7 = vmul.f32 %v6336_v14, %v1387_v32  ;;  %v1295_v59 = vrot.slane %v6391_v55, 6 }
 0x365   :  { %v1503_v23 = vmul.f32 %v1487_v18, %v1443_v16  ;;  %v6360_v15 = vpop.permute.xlu0 %1542  ;;  %v1384_v16 = vperm.slane %v1376_v12, 0  ;;  %v1291_v18 = vrot.slane %v6391_v55, 2  ;;  %v1388_v58 = vperm.slane %v1380_v37, 0 }
 0x366   :  { %v1290_v25 = vrot.slane %v6391_v55, 1  ;;  %v1292_v35 = vrot.slane %v6391_v55, 3  ;;  %v1294_v63 = vrot.slane %v6391_v55, 5  ;;  %v1269_v26 = vadd.f32 %v1268_v47, %v1267_v62 }
 0x367   :  { %v6345_v56 = vadd.f32 %v1511_v28, %v1503_v23  ;;  %v1293_v23 = vrot.slane %v6391_v55, 4  ;;  %v946_v28 = vrot.slane %v7178_v57, 7  ;;  %v1400_v2 = vmul.f32 %v6336_v14, %v1384_v16 }
 0x368   :  { %v1413_v12 = vmul.f32 1.442695, %v1401_v9  ;;  %v1417_v53 = vmul.f32 1.442695, %v1403_v7  ;;  %v1404_v42 = vmul.f32 %v6336_v14, %v1388_v58  ;;  %v1250_v37 = vadd.f32 %v1249_v21, %v1248_v52 }
 0x369   :  { %v1411_v62 = vmul.f32 1.442695, %v1400_v2  ;;  %v1426_v16 = vrot.slane %v7099_v45, 4  ;;  %v1425_v9 = vrot.slane %v7099_v45, 3  ;;  %v1270_v14 = vrot.slane %v1269_v26, 2 }
 0x36a   :  { %v6358_v49 = vpop.permute.xlu2 %1530  ;;  %4188 = vpow2.f32 %v1413_v12  ;;  %v1419_v7 = vmul.f32 1.442695, %v1404_v42  ;;  %v3471_v42 = vld [vmem:[%s6727_s14 + $0x10] sm:$0xff] }
 0x36b   :  { %4190 = vpow2.f32 %v1417_v53 }
 0x36c   :  { %3453 = vrot.lane.b32.xlu1 %v3386_v31, %s4234_s25  ;;  %4192 = vpow2.f32 %v1411_v62 }
 0x36d   :  { %v6368_v51 = vpop.permute.xlu0 %1560  ;;  %4194 = vpow2.f32 %v1419_v7 }
 0x371   :  { %v1223_v60 = vpop.permute.xlu1 %1222 }
 0x372   :  { %v6348_v6 = vmul.f32 %v1223_v60, %v7170_v54  ;;  %v6362_v48 = vpop.permute.xlu2 %1554  ;;  %v1261_v60 = vrot.slane %v1260_v40, 4 }
 0x374   :  { %1691 = vrot.lane.b32.xlu1 %v7046_v5, %s4233_s4  ;;  %v1262_v20 = vadd.f32 %v1261_v60, %v1260_v40 }
 0x375   :  { %v6395_v44 = vpop.permute.xlu0 %1572 }
 0x376   :  { %v1263_v47 = vrot.slane %v1262_v20, 2 }
 0x37a   :  { %v6393_v17 = vpop.permute.xlu2 %1566 }
 0x37c   :  { %3457 = vrot.lane.b32.xlu1 %v3430_v27, %s4234_s25  ;;  %v931_v27 = vsel %vm82_vm0, %v7172_v11, 0.0  ;;  %v1255_v11 = vadd.f32 %v1254_v4, %v1253_v13  ;;  %v1281_v13 = vsel %vm82_vm0, %v6348_v6, 0.0  ;;  %v3474_v4 = vld [vmem:[%s6727_s14 + $0x28] sm:$0xff]  ;;  %v1428_v6 = vrot.slane %v7099_v45, 6 }
 0x37d   :  { %v932_v5 = vrot.slane %v931_v27, 4 }
 0x37e   :  { %v1256_v30 = vrot.slane %v1255_v11, 2 }
 0x37f   :  { %v933_v33 = vadd.f32 %v932_v5, %v931_v27  ;;  %v1242_v5 = vrot.slane %v1241_v1, 2 }
 0x380   :  { %v1257_v60 = vadd.f32 %v1256_v30, %v1255_v11  ;;  %v1492_v11 = vperm.slane %v1428_v6, 0  ;;  %v1429_v30 = vrot.slane %v7099_v45, 7 }
 0x381   :  { %v6364_v8 = vpop.permute.xlu1 %1456  ;;  %v934_v31 = vrot.slane %v933_v33, 2  ;;  %v1243_v32 = vadd.f32 %v1242_v5, %v1241_v1  ;;  %v1282_v1 = vrot.slane %v1281_v13, 4  ;;  %v1251_v5 = vrot.slane %v1250_v37, 1 }
 0x382   :  { %v6423_v61 = vpop.permute.xlu2 %1343  ;;  %v1258_v62 = vrot.slane %v1257_v60, 1 }
 0x383   :  { %v935_v19 = vadd.f32 %v934_v31, %v933_v33  ;;  %v3475_v33 = vld [vmem:[%s6727_s14 + $0x30] sm:$0xff]  ;;  %v1276_v31 = vadd.f32 %v1275_v10, %v1274_v46  ;;  %v3473_v46 = vld [vmem:[%s6727_s14 + $0x20] sm:$0xff]  ;;  %v1244_v21 = vrot.slane %v1243_v32, 1  ;;  %v3472_v10 = vld [vmem:[%s6727_s14 + $0x18] sm:$0xff]  ;;  %v1252_v53 = vadd.f32 %v1251_v5, %v1250_v37 }
 0x384   :  { %1705 = vrot.lane.b32.xlu1 %v7171_v36, %s4233_s4  ;;  %v1234_v36 = vadd.f32 %v1233_v0, %v1232_v50  ;;  %v3476_v50 = vld [vmem:[%s6727_s14 + $0x38] sm:$0xff]  ;;  %v6426_v0 = vpop.permute.xlu0 %1345 }
 0x385   :  { %3498 = vmatpush.msrb.mxu3 %v3476_v50  ;;  %v936_v40 = vrot.slane %v935_v19, 1  ;;  %v1277_v12 = vrot.slane %v1276_v31, 2  ;;  %v1271_v50 = vadd.f32 %v1270_v14, %v1269_v26 }
 0x386   :  { %v1235_v24 = vrot.slane %v1234_v36, 2 }
 0x387   :  { %3499 = vmatpush.msrb.mxu3 %v3475_v33  ;;  %v937_v2 = vadd.f32 %v936_v40, %v935_v19  ;;  %v1264_v33 = vadd.f32 %v1263_v47, %v1262_v20  ;;  %v1489_v19 = vperm.slane %v1425_v9, 0  ;;  %v3470_v20 = vld [vmem:[%s6727_s14 + $0x8] sm:$0xff]  ;;  %v1278_v14 = vadd.f32 %v1277_v12, %v1276_v31 }
 0x388   :  { %v1236_v52 = vadd.f32 %v1235_v24, %v1234_v36  ;;  %v1490_v36 = vperm.slane %v1426_v16, 0  ;;  %v1283_v24 = vadd.f32 %v1282_v1, %v1281_v13  ;;  %v7179_v16 = vld [vmem:[#allocation55_spill] sm:$0xff] }
 0x389   :  { %3500 = vmatpush.msrb.mxu3 %v3474_v4  ;;  %v4189_v4 = vpop.eup %4188  ;;  %v1576_v6 = vmul.f32 %v6360_v15, %v7179_v16  ;;  %v962_v26 = vadd.f32 %v946_v28, %v937_v2  ;;  %v1505_v1 = vmul.f32 %v1489_v19, %v6364_v8  ;;  %v1265_v37 = vrot.slane %v1264_v33, 1  ;;  %v7180_v8 = vld [vmem:[#allocation65_spill] sm:$0xff] }
 0x38a   :  { %v1237_v40 = vrot.slane %v1236_v52, 1  ;;  %v4191_v13 = vpop.eup %4190  ;;  %v1506_v9 = vmul.f32 %v1490_v36, %v6351_v38  ;;  %v1514_v47 = vmul.f32 %v4189_v4, %v7118_v39  ;;  %v1348_v7 = vpop.permute.xlu2 %1347  ;;  %v1284_v5 = vrot.slane %v1283_v24, 2 }
 0x38b   :  { %3501 = vmatpush.msrb.mxu3 %v3473_v46  ;;  %v1245_v46 = vadd.f32 %v1244_v21, %v1243_v32  ;;  %v4193_v15 = vpop.eup %4192  ;;  %v1516_v57 = vmul.f32 %v4191_v13, %v7128_v29  ;;  %v1272_v28 = vrot.slane %v1271_v50, 1  ;;  %v1508_v21 = vmul.f32 %v1492_v11, %v6356_v22  ;;  %v3469_v22 = vld [vmem:[%s6727_s14] sm:$0xff] }
 0x38c   :  { %v1350_v32 = vpop.permute.xlu0 %1349  ;;  %v1259_v2 = vadd.f32 %v1258_v62, %v1257_v60  ;;  %v1513_v31 = vmul.f32 %v4193_v15, %v7162_v34  ;;  %v1238_v38 = vadd.f32 %v1237_v40, %v1236_v52  ;;  %v1596_v39 = vsel %vm82_vm0, %v1576_v6, 0.0  ;;  %v6470_v60 = vpop.eup %4194 }
 0x38d   :  { %3502 = vmatpush.msrb.mxu3 %v3472_v10  ;;  %v1579_v12 = vmul.f32 %v6368_v51, %v7180_v8  ;;  %v1307_v36 = vadd.f32 %v1291_v18, %v1252_v53  ;;  %v1306_v29 = vadd.f32 %v1290_v25, %v1245_v46  ;;  %v1279_v34 = vrot.slane %v1278_v14, 1  ;;  %v7181_v8 = vld [vmem:[#allocation21_spill] sm:$0xff] }
 0x38e   :  { %v1522_v52 = vadd.f32 %v1514_v47, %v1506_v9  ;;  %v1266_v19 = vadd.f32 %v1265_v37, %v1264_v33  ;;  %v1285_v18 = vadd.f32 %v1284_v5, %v1283_v24  ;;  %v1273_v53 = vadd.f32 %v1272_v28, %v1271_v50 }
 0x38f   :  { %3503 = vmatpush.msrb.mxu3 %v3471_v42  ;;  %v1521_v42 = vadd.f32 %v1513_v31, %v1505_v1  ;;  %v1367_v51 = vmul.f32 %v6426_v0, %v1307_v36  ;;  %v1524_v62 = vadd.f32 %v1516_v57, %v1508_v21  ;;  %v1308_v40 = vadd.f32 %v1292_v35, %v1259_v2 }
 0x390   :  { %v1578_v25 = vmul.f32 %v6362_v48, %v1522_v52  ;;  %v1597_v16 = vrot.slane %v1596_v39, 4  ;;  %v1366_v6 = vmul.f32 %v6423_v61, %v1306_v29  ;;  %v1617_v48 = vsel %vm82_vm0, %v1579_v12, 0.0 }
 0x391   :  { %v6377_v43 = vpop.permute.xlu1 %1536  ;;  %3504 = vmatpush.msrb.mxu3 %v3470_v20  ;;  %v1580_v0 = vmul.f32 %v6393_v17, %v1524_v62  ;;  %v1368_v33 = vmul.f32 %v1348_v7, %v1308_v40  ;;  %v1786_v24 = vrot.slane %v1367_v51, 6  ;;  %v1309_v35 = vadd.f32 %v1293_v23, %v1266_v19 }
 0x392   :  { %v1575_v11 = vmul.f32 %v6377_v43, %v6345_v56  ;;  %v1305_v56 = vadd.f32 %v6391_v55, %v1238_v38  ;;  %v1280_v43 = vadd.f32 %v1279_v34, %v1278_v14  ;;  %v1286_v20 = vrot.slane %v1285_v18, 1  ;;  %v1352_v13 = vpop.permute.xlu2 %1351 }
 0x393   :  { %3505 = vmatpush.msrb.mxu3 %v3469_v22  ;;  %v1610_v61 = vsel %vm82_vm0, %v1578_v25, 0.0  ;;  %v1784_v47 = vrot.slane %v1366_v6, 7  ;;  %v1369_v37 = vmul.f32 %v1350_v32, %v1309_v35  ;;  %v1493_v32 = vperm.slane %v1429_v30, 0 }
 0x394   :  { %v1589_v50 = vsel %vm82_vm0, %v1575_v11, 0.0  ;;  %v1354_v9 = vpop.permute.xlu0 %1353  ;;  %v1311_v23 = vadd.f32 %v1295_v59, %v1280_v43  ;;  %v1287_v28 = vadd.f32 %v1286_v20, %v1285_v18  ;;  %v1611_v31 = vrot.slane %v1610_v61, 4 }
 0x395   :  { %v1590_v1 = vrot.slane %v1589_v50, 4  ;;  %v1598_v36 = vadd.f32 %v1597_v16, %v1596_v39  ;;  %v1618_v29 = vrot.slane %v1617_v48, 4  ;;  %v1790_v22 = vrot.slane %v1369_v37, 4 }
 0x396   :  { %v1371_v21 = vmul.f32 %v1354_v9, %v1311_v23  ;;  %v7182_v51 = vrot.slane %v6391_v55, 7  ;;  %v7183_v9 = vld [vmem:[#allocation4_spill] sm:$0xff] }
 0x397   :  { %v1591_v38 = vadd.f32 %v1590_v1, %v1589_v50 }
 0x398   :  { %v1312_v19 = vadd.f32 %v7182_v51, %v1287_v28  ;;  %v1794_v18 = vrot.slane %v1371_v21, 2 }
 0x399   :  { %v1592_v62 = vrot.slane %v1591_v38, 2 }
 0x39a   :  { %v1694_v6 = vpop.permute.xlu2 %1693 }
 0x39b   :  { %v1593_v35 = vadd.f32 %v1592_v62, %v1591_v38 }
 0x3a2   :  { %v6409_v27 = vpop.permute.xlu1 %1484 }
 0x3a3   :  { %v1509_v45 = vmul.f32 %v1493_v32, %v6409_v27 }
 0x3b4   :  { %v6434_v58 = vpop.permute.xlu1 %1548 }
 0x3b5   :  { %v1577_v4 = vmul.f32 %v6434_v58, %v1521_v42  ;;  %v1574_v58 = vmul.f32 %v6358_v49, %v6280_v3  ;;  %v1624_v3 = vsel %vm82_vm0, %v1580_v0, 0.0  ;;  %v1788_v49 = vrot.slane %v1368_v33, 5 }
 0x3b6   :  { %v1625_v34 = vrot.slane %v1624_v3, 4  ;;  %v1599_v33 = vrot.slane %v1598_v36, 2 }
 0x3b7   :  { %v1603_v17 = vsel %vm82_vm0, %v1577_v4, 0.0  ;;  %v1582_v2 = vsel %vm82_vm0, %v1574_v58, 0.0  ;;  %v1619_v4 = vadd.f32 %v1618_v29, %v1617_v48 }
 0x3b8   :  { %v1604_v57 = vrot.slane %v1603_v17, 4  ;;  %v1583_v52 = vrot.slane %v1582_v2, 4  ;;  %v1626_v16 = vadd.f32 %v1625_v34, %v1624_v3 }
 0x3b9   :  { %v1620_v58 = vrot.slane %v1619_v4, 2 }
 0x3ba   :  { %v1605_v42 = vadd.f32 %v1604_v57, %v1603_v17  ;;  %v1627_v48 = vrot.slane %v1626_v16, 2 }
 0x3bb   :  { %v1621_v1 = vadd.f32 %v1620_v58, %v1619_v4 }
 0x3bc   :  { %v1606_v43 = vrot.slane %v1605_v42, 2 }
 0x3be   :  { %v1006_v10 = vpop.permute.xlu1 %1005 }
 0x3bf   :  { %v1022_v46 = vmul.f32 %v1006_v10, %v962_v26  ;;  %v1310_v26 = vadd.f32 %v1294_v63, %v1273_v53  ;;  %v1612_v53 = vadd.f32 %v1611_v31, %v1610_v61 }
 0x3c1   :  { %v1773_v7 = vrot.slane %v1022_v46, 1  ;;  %v1370_v5 = vmul.f32 %v1352_v13, %v1310_v26  ;;  %v1517_v46 = vmul.f32 %v6470_v60, %v7170_v54  ;;  %v1613_v27 = vrot.slane %v1612_v53, 2 }
 0x3c2   :  { %v1607_v26 = vadd.f32 %v1606_v43, %v1605_v42  ;;  %v1600_v13 = vadd.f32 %v1599_v33, %v1598_v36  ;;  %v7184_v36 = vld [vmem:[#allocation70_spill] sm:$0xff] }
 0x3c3   :  { %v6503_v12 = vsel %vm1750_vm3, %v1773_v7, %v7181_v8  ;;  %v1792_v11 = vrot.slane %v1370_v5, 3  ;;  %v1525_v50 = vadd.f32 %v1517_v46, %v1509_v45  ;;  %v1614_v17 = vadd.f32 %v1613_v27, %v1612_v53 }
 0x3c4   :  { %v1628_v7 = vadd.f32 %v1627_v48, %v1626_v16  ;;  %v1608_v37 = vrot.slane %v1607_v26, 1  ;;  %v1601_v23 = vrot.slane %v1600_v13, 1 }
 0x3c5   :  { %v1581_v54 = vmul.f32 %v6395_v44, %v1525_v50  ;;  %v1615_v3 = vrot.slane %v1614_v17, 1  ;;  %v1622_v44 = vrot.slane %v1621_v1, 1 }
 0x3c6   :  { %v1342_v14 = vpop.permute.xlu1 %1341  ;;  %v1609_v31 = vadd.f32 %v1608_v37, %v1607_v26 }
 0x3c7   :  { %v1365_v15 = vmul.f32 %v1342_v14, %v1305_v56  ;;  %v1584_v56 = vadd.f32 %v1583_v52, %v1582_v2  ;;  %v1594_v14 = vrot.slane %v1593_v35, 1  ;;  %v1631_v5 = vsel %vm82_vm0, %v1581_v54, 0.0 }
 0x3c8   :  { %v1632_v2 = vrot.slane %v1631_v5, 4  ;;  %v1616_v38 = vadd.f32 %v1615_v3, %v1614_v17  ;;  %v1623_v42 = vadd.f32 %v1622_v44, %v1621_v1 }
 0x3c9   :  { %v1785_v63 = vsel %vm1732_vm11, %v1784_v47, %v1365_v15  ;;  %v1585_v61 = vrot.slane %v1584_v56, 2  ;;  %v6519_v47 = vmul.f32 %v6387_v41, %v7183_v9  ;;  %v1595_v57 = vadd.f32 %v1594_v14, %v1593_v35 }
 0x3ca   :  { %v1787_v10 = vsel %vm1735_vm13, %v1786_v24, %v1785_v63  ;;  %v1696_v24 = vpop.permute.xlu0 %1695  ;;  %v1629_v63 = vrot.slane %v1628_v7, 1 }
 0x3cb   :  { %v1789_v59 = vsel %vm1738_vm14, %v1788_v49, %v1787_v10  ;;  %v1586_v15 = vadd.f32 %v1585_v61, %v1584_v56  ;;  %v1698_v49 = vpop.permute.xlu2 %1697  ;;  %v1640_v28 = vrot.slane %v6519_v47, 1  ;;  %v1602_v10 = vadd.f32 %v1601_v23, %v1600_v13 }
 0x3cc   :  { %v1791_v25 = vsel %vm1741_vm15, %v1790_v22, %v1789_v59  ;;  %v1642_v8 = vrot.slane %v6519_v47, 3  ;;  %v1641_v22 = vrot.slane %v6519_v47, 2  ;;  %v1643_v34 = vrot.slane %v6519_v47, 4 }
 0x3cd   :  { %v1793_v39 = vsel %vm1744_vm1, %v1792_v11, %v1791_v25  ;;  %v1587_v41 = vrot.slane %v1586_v15, 1  ;;  %v1656_v59 = vadd.f32 %v1640_v28, %v1595_v57  ;;  %v1630_v52 = vadd.f32 %v1629_v63, %v1628_v7 }
 0x3ce   :  { %v1356_v30 = vpop.permute.xlu1 %1355  ;;  %v1795_v55 = vsel %vm1747_vm2, %v1794_v18, %v1793_v39  ;;  %v1633_v11 = vadd.f32 %v1632_v2, %v1631_v5  ;;  %v1658_v51 = vadd.f32 %v1642_v8, %v1609_v31  ;;  %v1657_v18 = vadd.f32 %v1641_v22, %v1602_v10  ;;  %v4231_v22 = vld [vmem:[%s6855_s1 + $0x18] sm:$0xff] }
 0x3cf   :  { %v1372_v40 = vmul.f32 %v1356_v30, %v1312_v19  ;;  %v1588_v19 = vadd.f32 %v1587_v41, %v1586_v15  ;;  %v1659_v53 = vadd.f32 %v1643_v34, %v1616_v38  ;;  %v1645_v45 = vrot.slane %v6519_v47, 6  ;;  %v4229_v41 = vld [vmem:[%s6855_s1 + $0x8] sm:$0xff] }
 0x3d0   :  { %v1716_v30 = vmul.f32 %v1694_v6, %v1656_v59  ;;  %v1644_v25 = vrot.slane %v6519_v47, 5  ;;  %v1717_v62 = vmul.f32 %v1696_v24, %v1657_v18  ;;  %v1718_v16 = vmul.f32 %v1698_v49, %v1658_v51  ;;  %v4230_v59 = vld [vmem:[%s6855_s1 + $0x10] sm:$0xff] }
 0x3d1   :  { %v1796_v0 = vrot.slane %v1372_v40, 1  ;;  %v1661_v40 = vadd.f32 %v1645_v45, %v1630_v52  ;;  %v1655_v46 = vadd.f32 %v6519_v47, %v1588_v19  ;;  %v1646_v23 = vrot.slane %v6519_v47, 7 }
 0x3d2   :  { %v1700_v21 = vpop.permute.xlu0 %1699  ;;  %v1660_v4 = vadd.f32 %v1644_v25, %v1623_v42  ;;  %v1807_v33 = vrot.slane %v1716_v30, 7  ;;  %v1809_v6 = vrot.slane %v1717_v62, 6  ;;  %v1811_v58 = vrot.slane %v1718_v16, 5 }
 0x3d3   :  { %v6514_v20 = vsel %vm1750_vm3, %v1796_v0, %v1795_v55  ;;  %v1702_v39 = vpop.permute.xlu2 %1701  ;;  %v1634_v55 = vrot.slane %v1633_v11, 2  ;;  %v1719_v56 = vmul.f32 %v1700_v21, %v1659_v53 }
 0x3d4   :  { %v1720_v27 = vmul.f32 %v1702_v39, %v1660_v4 }
 0x3d5   :  { %v1635_v61 = vadd.f32 %v1634_v55, %v1633_v11  ;;  %v1813_v26 = vrot.slane %v1719_v56, 4  ;;  %v4235_v11 = vmov 32.0  }
 0x3d6   :  { %v3456_v60 = vpop.permute.xlu1 %3455  ;;  %v1815_v17 = vrot.slane %v1720_v27, 3  ;;  %4196 = vrcp.f32 %v4235_v11 }
 0x3d7   :  { %v3466_v35 = vsel %vm82_vm0, %v6503_v12, %v3456_v60  ;;  %v1636_v1 = vrot.slane %v1635_v61, 1 }
 0x3d9   :  { %v1637_v37 = vadd.f32 %v1636_v1, %v1635_v61 }
 0x3da   :  { %v1704_v0 = vpop.permute.xlu0 %1703 }
 0x3db   :  { %v1721_v24 = vmul.f32 %v1704_v0, %v1661_v40  ;;  %v1662_v3 = vadd.f32 %v1646_v23, %v1637_v37  ;;  %v3460_v63 = vpop.permute.xlu2 %3459 }
 0x3dc   :  { %v4197_v42 = vpop.eup %4196 }
 0x3dd   :  { %v1817_v9 = vrot.slane %v1721_v24, 2  ;;  %v3538_v51 = vmul.f32 32.0, %v4197_v42  ;;  %vm3542_vm5 = vweird.f32 %v4197_v42 }
 0x3de   :  { %v3454_v32 = vpop.permute.xlu1 %3453 }
 0x3df   :  { %v3465_v29 = vsel %vm82_vm0, %v7184_v36, %v3454_v32  ;;  %v3539_v19 = vsub.f32 1.0, %v3538_v51 }
 0x3e0   :  { %3912 = vmatmul.msk.f32.vlgmr.msrb.gmra.mxu3 %vm3477_vm4, %v3465_v29 }
 0x3e1   :  { %v3540_v18 = vmul.f32 %v4197_v42, %v3539_v19 }
 0x3e3   :  { %v3541_v53 = vadd.f32 %v4197_v42, %v3540_v18 }
 0x3e5   :  { %v6564_v45 = vsel %vm3542_vm5, %v4197_v42, %v3541_v53 }
 0x3e6   :  { %v1692_v43 = vpop.permute.xlu1 %1691 }
 0x3e7   :  { %v1715_v50 = vmul.f32 %v1692_v43, %v1655_v46 }
 0x3e8   :  { %3913 = vmatmul.msk.f32.gmra.mxu3 %vm3477_vm4, %v3466_v35 }
 0x3e9   :  { %v1808_v48 = vsel %vm1732_vm11, %v1807_v33, %v1715_v50 }
 0x3ea   :  { %v1810_v13 = vsel %vm1735_vm13, %v1809_v6, %v1808_v48 }
 0x3eb   :  { %v1812_v54 = vsel %vm1738_vm14, %v1811_v58, %v1810_v13 }
 0x3ec   :  { %v1814_v14 = vsel %vm1741_vm15, %v1813_v26, %v1812_v54  ;;  %v3636_v54 = vld [vmem:[%s6731_s17 + $0x10] sm:$0xff] }
 0x3ed   :  { %v1816_v12 = vsel %vm1744_vm1, %v1815_v17, %v1814_v14  ;;  %v3637_v17 = vld [vmem:[%s6731_s17 + $0x18] sm:$0xff] }
 0x3ee   :  { %v3458_v60 = vpop.permute.xlu1 %3457  ;;  %v1818_v7 = vsel %vm1747_vm2, %v1817_v9, %v1816_v12  ;;  %3666 = vmatpush.msrb.mxu0 %v3637_v17  ;;  %v3635_v9 = vld [vmem:[%s6731_s17 + $0x8] sm:$0xff]  ;;  %v3634_v12 = vld [vmem:[%s6731_s17] sm:$0xff] }
 0x3ef   :  { %v3467_v15 = vsel %vm82_vm0, %v6514_v20, %v3458_v60  ;;  %v4228_v20 = vld [vmem:[%s6855_s1] sm:$0xff] }
 0x3f0   :  { %3914 = vmatmul.msk.f32.gmra.mxu3 %vm3477_vm4, %v3467_v15  ;;  %3667 = vmatpush.msrb.mxu0 %v3636_v54  ;;  %v3719_v17 = vld [vmem:[%s6733_s19] sm:$0xff] }
 0x3f2   :  { %3668 = vmatpush.msrb.mxu0 %v3635_v9 }
 0x3f4   :  { %3669 = vmatpush.msrb.mxu0 %v3634_v12 }
 0x3f6   :  { %v1706_v49 = vpop.permute.xlu1 %1705 }
 0x3f7   :  { %v1722_v5 = vmul.f32 %v1706_v49, %v1662_v3 }
 0x3f9   :  { %v1819_v57 = vrot.slane %v1722_v5, 1 }
 0x3fb   :  { %v1820_v28 = vsel %vm1750_vm3, %v1819_v57, %v1818_v7 }
 0x3fc   :  { %v3468_v44 = vsel %vm82_vm0, %v1820_v28, %v3460_v63 }
 0x3fd   :  { %3915 = vmatmul.msk.f32.gmra.mxu3 %vm3477_vm4, %v3468_v44 }
 0x463   :  { %v3507_v21 = vpop.f32.mrf.mxu3 }
 0x464   :  { %v3519_v2 = vadd.f32 %v4228_v20, %v3507_v21  ;;  %v3982_v21 = vld [vmem:[%s6728_s15] ss:$0 sm:$0xff] }
 0x466   :  { %v3525_v31 = vsel %vm82_vm0, %v3519_v2, 0.0 }
 0x467   :  { %3526 = vadd.xlane.f32.xlu0 %v3525_v31 }
 0x46b   :  { %v3510_v47 = vpop.f32.mrf.mxu3 }
 0x46c   :  { %v3520_v10 = vadd.f32 %v4229_v41, %v3510_v47  ;;  %v3983_v47 = vld [vmem:[%s6729_s16] ss:$0 sm:$0xff] }
 0x46e   :  { %v3528_v38 = vsel %vm82_vm0, %v3520_v10, 0.0 }
 0x46f   :  { %3529 = vadd.xlane.f32.xlu1 %v3528_v38 }
 0x473   :  { %v3513_v32 = vpop.f32.mrf.mxu3 }
 0x474   :  { %v3521_v8 = vadd.f32 %v4230_v59, %v3513_v32 }
 0x476   :  { %v3531_v36 = vsel %vm82_vm0, %v3521_v8, 0.0 }
 0x477   :  { %3532 = vadd.xlane.f32.xlu2 %v3531_v36 }
 0x480   :  { %v3516_v29 = vpop.f32.mrf.mxu3 }
 0x481   :  { %v3522_v34 = vadd.f32 %v4231_v22, %v3516_v29 }
 0x483   :  { %v3534_v52 = vsel %vm82_vm0, %v3522_v34, 0.0 }
 0x484   :  { %3535 = vadd.xlane.f32.xlu2 %v3534_v52 }
 0x4da   :  { %v3527_v30 = vpop.xlane.xlu0 %3526 }
 0x4db   :  { %v3544_v25 = vmul.f32 %v6564_v45, %v3527_v30 }
 0x4dd   :  { %v3548_v62 = vsub.f32 %v3519_v2, %v3544_v25 }
 0x4df   :  { %v3552_v40 = vmul.f32 %v3548_v62, %v3548_v62 }
 0x4e1   :  { %v3556_v39 = vsel %vm82_vm0, %v3552_v40, 0.0 }
 0x4e2   :  { %3557 = vadd.xlane.f32.xlu0 %v3556_v39  ;;  %v3530_v4 = vpop.xlane.xlu1 %3529 }
 0x4e3   :  { %v3545_v16 = vmul.f32 %v6564_v45, %v3530_v4 }
 0x4e5   :  { %v6569_v46 = vsub.f32 %v3520_v10, %v3545_v16 }
 0x4e7   :  { %v3553_v55 = vmul.f32 %v6569_v46, %v6569_v46 }
 0x4e9   :  { %v3559_v56 = vsel %vm82_vm0, %v3553_v55, 0.0 }
 0x4ea   :  { %3560 = vadd.xlane.f32.xlu1 %v3559_v56  ;;  %v3533_v43 = vpop.xlane.xlu2 %3532 }
 0x4eb   :  { %v3546_v0 = vmul.f32 %v6564_v45, %v3533_v43 }
 0x4ed   :  { %v6575_v33 = vsub.f32 %v3521_v8, %v3546_v0 }
 0x4ef   :  { %v3554_v27 = vmul.f32 %v6575_v33, %v6575_v33 }
 0x4f1   :  { %v3562_v50 = vsel %vm82_vm0, %v3554_v27, 0.0 }
 0x4f2   :  { %3563 = vadd.xlane.f32.xlu2 %v3562_v50 }
 0x4f7   :  { %v3536_v35 = vpop.xlane.xlu2 %3535 }
 0x4f8   :  { %v3547_v6 = vmul.f32 %v6564_v45, %v3536_v35  ;;  %v3726_v35 = vld [vmem:[%s6733_s19 + $0x38] sm:$0xff] }
 0x4f9   :  { %3751 = vmatpush.msrb.mxu1 %v3726_v35 }
 0x4fa   :  { %v6581_v24 = vsub.f32 %v3522_v34, %v3547_v6  ;;  %v3725_v6 = vld [vmem:[%s6733_s19 + $0x30] sm:$0xff] }
 0x4fb   :  { %3752 = vmatpush.msrb.mxu1 %v3725_v6 }
 0x4fc   :  { %v3555_v58 = vmul.f32 %v6581_v24, %v6581_v24 }
 0x4fe   :  { %v3565_v48 = vsel %vm82_vm0, %v3555_v58, 0.0  ;;  %v3724_v58 = vld [vmem:[%s6733_s19 + $0x28] sm:$0xff] }
 0x4ff   :  { %3566 = vadd.xlane.f32.xlu0 %v3565_v48  ;;  %3753 = vmatpush.msrb.mxu1 %v3724_v58  ;;  %v3722_v48 = vld [vmem:[%s6733_s19 + $0x18] sm:$0xff] }
 0x555   :  { %v3558_v61 = vpop.xlane.xlu0 %3557 }
 0x556   :  { %v3568_v26 = vmul.f32 %v3558_v61, %v6564_v45  ;;  %v3721_v61 = vld [vmem:[%s6733_s19 + $0x10] sm:$0xff] }
 0x558   :  { %v3572_v13 = vadd.f32 1e-05, %v3568_v26  ;;  %v3984_v26 = vld [vmem:[%s6730_s18] ss:$0 sm:$0xff] }
 0x55a   :  { %4198 = vrsqrt.f32 %v3572_v13  ;;  %vm3582_vm7 = vweird.f32 %v3572_v13 }
 0x55d   :  { %v3561_v14 = vpop.xlane.xlu1 %3560 }
 0x55e   :  { %v3569_v1 = vmul.f32 %v3561_v14, %v6564_v45 }
 0x560   :  { %v4199_v60 = vpop.eup %4198  ;;  %v3573_v7 = vadd.f32 1e-05, %v3569_v1 }
 0x561   :  { %v3577_v15 = vmul.f32 %v4199_v60, %v3572_v13  ;;  %vm3583_vm6 = vweird.f32 %v4199_v60  ;;  %v3720_v13 = vld [vmem:[%s6733_s19 + $0x8] sm:$0xff] }
 0x562   :  { %4200 = vrsqrt.f32 %v3573_v7  ;;  %vm3584_vm8 = vmor %vm3582_vm7, %vm3583_vm6  ;;  %vm3592_vm10 = vweird.f32 %v3573_v7 }
 0x563   :  { %v3578_v37 = vmul.f32 %v4199_v60, %v3577_v15 }
 0x565   :  { %v3579_v23 = vmul.f32 0.5, %v3578_v37  ;;  %v3564_v3 = vpop.xlane.xlu2 %3563 }
 0x566   :  { %v3570_v49 = vmul.f32 %v3564_v3, %v6564_v45 }
 0x567   :  { %v3580_v5 = vsub.f32 1.5, %v3579_v23 }
 0x568   :  { %v4201_v57 = vpop.eup %4200  ;;  %v3574_v63 = vadd.f32 1e-05, %v3570_v49 }
 0x569   :  { %v3581_v28 = vmul.f32 %v4199_v60, %v3580_v5  ;;  %v3587_v44 = vmul.f32 %v4201_v57, %v3573_v7  ;;  %vm3593_vm9 = vweird.f32 %v4201_v57 }
 0x56a   :  { %4202 = vrsqrt.f32 %v3574_v63  ;;  %vm3594_vm11 = vmor %vm3592_vm10, %vm3593_vm9  ;;  %vm3602_vm13 = vweird.f32 %v3574_v63 }
 0x56b   :  { %v3585_v20 = vsel %vm3584_vm8, %v4199_v60, %v3581_v28  ;;  %v3588_v2 = vmul.f32 %v4201_v57, %v3587_v44 }
 0x56c   :  { %v3616_v31 = vmul.f32 %v3585_v20, %v3548_v62 }
 0x56d   :  { %v3589_v41 = vmul.f32 0.5, %v3588_v2 }
 0x56e   :  { %v3623_v10 = vmul.f32 %v3982_v21, %v3616_v31 }
 0x56f   :  { %v3590_v38 = vsub.f32 1.5, %v3589_v41 }
 0x570   :  { %v4203_v32 = vpop.eup %4202  ;;  %v6607_v59 = vadd.f32 %v3983_v47, %v3623_v10 }
 0x571   :  { %v3591_v8 = vmul.f32 %v4201_v57, %v3590_v38  ;;  %v3597_v36 = vmul.f32 %v4203_v32, %v3574_v63  ;;  %vm3603_vm12 = vweird.f32 %v4203_v32 }
 0x572   :  { %3916 = vmatmul.msk.f32.vlgmr.msrb.gmra.mxu0 %vm82_vm0, %v6607_v59  ;;  %v3567_v29 = vpop.xlane.xlu0 %3566  ;;  %vm3604_vm14 = vmor %vm3602_vm13, %vm3603_vm12 }
 0x573   :  { %v3595_v22 = vsel %vm3594_vm11, %v4201_v57, %v3591_v8  ;;  %v3598_v34 = vmul.f32 %v4203_v32, %v3597_v36  ;;  %v3571_v52 = vmul.f32 %v3567_v29, %v6564_v45 }
 0x574   :  { %v3617_v11 = vmul.f32 %v3595_v22, %v6569_v46 }
 0x575   :  { %v3599_v42 = vmul.f32 0.5, %v3598_v34  ;;  %v3575_v51 = vadd.f32 1e-05, %v3571_v52 }
 0x576   :  { %v3624_v19 = vmul.f32 %v3982_v21, %v3617_v11 }
 0x577   :  { %v3600_v18 = vsub.f32 1.5, %v3599_v42  ;;  %4204 = vrsqrt.f32 %v3575_v51  ;;  %vm3612_vm1 = vweird.f32 %v3575_v51 }
 0x578   :  { %v6613_v53 = vadd.f32 %v3983_v47, %v3624_v19 }
 0x579   :  { %v3601_v30 = vmul.f32 %v4203_v32, %v3600_v18 }
 0x57a   :  { %3917 = vmatmul.msk.f32.gmra.mxu0 %vm82_vm0, %v6613_v53 }
 0x57b   :  { %v3605_v25 = vsel %vm3604_vm14, %v4203_v32, %v3601_v30 }
 0x57c   :  { %v3618_v62 = vmul.f32 %v3605_v25, %v6575_v33 }
 0x57d   :  { %v4205_v40 = vpop.eup %4204 }
 0x57e   :  { %v3607_v39 = vmul.f32 %v4205_v40, %v3575_v51  ;;  %v3625_v4 = vmul.f32 %v3982_v21, %v3618_v62  ;;  %vm3613_vm15 = vweird.f32 %v4205_v40 }
 0x57f   :  { %vm3614_vm2 = vmor %vm3612_vm1, %vm3613_vm15 }
 0x580   :  { %v3608_v16 = vmul.f32 %v4205_v40, %v3607_v39  ;;  %v6618_v46 = vadd.f32 %v3983_v47, %v3625_v4 }
 0x582   :  { %v3609_v55 = vmul.f32 0.5, %v3608_v16  ;;  %3918 = vmatmul.msk.f32.gmra.mxu0 %vm82_vm0, %v6618_v46 }
 0x584   :  { %v3610_v56 = vsub.f32 1.5, %v3609_v55  ;;  %v3985_v55 = vld [vmem:[%s6732_s20] ss:$0 sm:$0xff] }
 0x586   :  { %v3611_v43 = vmul.f32 %v4205_v40, %v3610_v56 }
 0x588   :  { %v3615_v0 = vsel %vm3614_vm2, %v4205_v40, %v3611_v43 }
 0x589   :  { %v3619_v27 = vmul.f32 %v3615_v0, %v6581_v24  ;;  %v3723_v24 = vld [vmem:[%s6733_s19 + $0x20] sm:$0xff] }
 0x58a   :  { %3754 = vmatpush.msrb.mxu1 %v3723_v24 }
 0x58b   :  { %v3626_v50 = vmul.f32 %v3982_v21, %v3619_v27 }
 0x58c   :  { %3755 = vmatpush.msrb.mxu1 %v3722_v48 }
 0x58d   :  { %v6623_v33 = vadd.f32 %v3983_v47, %v3626_v50 }
 0x58e   :  { %3756 = vmatpush.msrb.mxu1 %v3721_v61 }
 0x58f   :  { %3919 = vmatmul.msk.f32.gmra.mxu0 %vm82_vm0, %v6623_v33 }
 0x590   :  { %3757 = vmatpush.msrb.mxu1 %v3720_v13 }
 0x592   :  { %3758 = vmatpush.msrb.mxu1 %v3719_v17 }
 0x5ef   :  { %v3671_v54 = vpop.f32.mrf.mxu0 }
 0x5f0   :  { %v3672_v14 = vadd.f32 %v3984_v26, %v3671_v54 }
 0x5f2   :  { %v3683_v9 = vmul.f32 %v3672_v14, %v3672_v14 }
 0x5f4   :  { %v3687_v1 = vmul.f32 %v3683_v9, %v3672_v14 }
 0x5f6   :  { %v3691_v12 = vmul.f32 0.044715, %v3687_v1 }
 0x5f7   :  { %v3674_v60 = vpop.f32.mrf.mxu0 }
 0x5f8   :  { %v3695_v7 = vadd.f32 %v3691_v12, %v3672_v14  ;;  %v3675_v15 = vadd.f32 %v3984_v26, %v3674_v60 }
 0x5fa   :  { %v3699_v37 = vmul.f32 0.7978846, %v3695_v7  ;;  %v3684_v23 = vmul.f32 %v3675_v15, %v3675_v15 }
 0x5fc   :  { %4206 = vtanh.f32 %v3699_v37  ;;  %v3688_v3 = vmul.f32 %v3684_v23, %v3675_v15 }
 0x5fe   :  { %v3692_v49 = vmul.f32 0.044715, %v3688_v3 }
 0x5ff   :  { %v3677_v5 = vpop.f32.mrf.mxu0 }
 0x600   :  { %v3696_v57 = vadd.f32 %v3692_v49, %v3675_v15  ;;  %v3678_v63 = vadd.f32 %v3984_v26, %v3677_v5 }
 0x602   :  { %v4207_v28 = vpop.eup %4206  ;;  %v3685_v44 = vmul.f32 %v3678_v63, %v3678_v63  ;;  %v3700_v21 = vmul.f32 0.7978846, %v3696_v57 }
 0x603   :  { %v3707_v20 = vadd.f32 1.0, %v4207_v28 }
 0x604   :  { %v3689_v2 = vmul.f32 %v3685_v44, %v3678_v63  ;;  %4208 = vtanh.f32 %v3700_v21 }
 0x605   :  { %v3711_v31 = vmul.f32 0.5, %v3707_v20 }
 0x606   :  { %v3693_v47 = vmul.f32 0.044715, %v3689_v2 }
 0x607   :  { %v3715_v41 = vmul.f32 %v3711_v31, %v3672_v14 }
 0x608   :  { %v3697_v10 = vadd.f32 %v3693_v47, %v3678_v63 }
 0x609   :  { %3920 = vmatmul.msk.f32.vlgmr.msrb.gmra.mxu1 %vm3477_vm4, %v3715_v41 }
 0x60a   :  { %v4209_v38 = vpop.eup %4208  ;;  %v3701_v32 = vmul.f32 0.7978846, %v3697_v10 }
 0x60b   :  { %v3708_v8 = vadd.f32 1.0, %v4209_v38 }
 0x60c   :  { %v3680_v36 = vpop.f32.mrf.mxu0  ;;  %4210 = vtanh.f32 %v3701_v32 }
 0x60d   :  { %v3681_v29 = vadd.f32 %v3984_v26, %v3680_v36  ;;  %v3712_v22 = vmul.f32 0.5, %v3708_v8 }
 0x60f   :  { %v3686_v34 = vmul.f32 %v3681_v29, %v3681_v29  ;;  %v3716_v52 = vmul.f32 %v3712_v22, %v3675_v15 }
 0x611   :  { %v3690_v11 = vmul.f32 %v3686_v34, %v3681_v29  ;;  %3921 = vmatmul.msk.f32.gmra.mxu1 %vm3477_vm4, %v3716_v52 }
 0x612   :  { %v4211_v42 = vpop.eup %4210 }
 0x613   :  { %v3694_v51 = vmul.f32 0.044715, %v3690_v11  ;;  %v3709_v19 = vadd.f32 1.0, %v4211_v42 }
 0x615   :  { %v3698_v18 = vadd.f32 %v3694_v51, %v3681_v29  ;;  %v3713_v30 = vmul.f32 0.5, %v3709_v19  ;;  %v3986_v19 = vld [vmem:[%s6734_s21] ss:$0 sm:$0xff] }
 0x617   :  { %v3717_v25 = vmul.f32 %v3713_v30, %v3678_v63  ;;  %v3702_v62 = vmul.f32 0.7978846, %v3698_v18 }
 0x619   :  { %3922 = vmatmul.msk.f32.gmra.mxu1 %vm3477_vm4, %v3717_v25  ;;  %4212 = vtanh.f32 %v3702_v62  ;;  %v3987_v25 = vld [vmem:[%s6735_s22] ss:$0 sm:$0xff] }
 0x61f   :  { %v4213_v40 = vpop.eup %4212 }
 0x620   :  { %v3710_v39 = vadd.f32 1.0, %v4213_v40 }
 0x622   :  { %v3714_v4 = vmul.f32 0.5, %v3710_v39 }
 0x624   :  { %v3718_v16 = vmul.f32 %v3714_v4, %v3681_v29 }
 0x626   :  { %3923 = vmatmul.msk.f32.gmra.mxu1 %vm3477_vm4, %v3718_v16 }
 0x686   :  { %v3760_v56 = vpop.f32.mrf.mxu1 }
 0x687   :  { %v3761_v43 = vadd.f32 %v3985_v55, %v3760_v56 }
 0x689   :  { %v3772_v0 = vadd.f32 %v3761_v43, %v6607_v59 }
 0x68b   :  { %v3778_v27 = vsel %vm82_vm0, %v3772_v0, 0.0 }
 0x68c   :  { %3779 = vadd.xlane.f32.xlu1 %v3778_v27 }
 0x68e   :  { %v3763_v50 = vpop.f32.mrf.mxu1 }
 0x68f   :  { %v3764_v35 = vadd.f32 %v3985_v55, %v3763_v50 }
 0x691   :  { %v3773_v6 = vadd.f32 %v3764_v35, %v6613_v53 }
 0x693   :  { %v3781_v58 = vsel %vm82_vm0, %v3773_v6, 0.0 }
 0x694   :  { %3782 = vadd.xlane.f32.xlu2 %v3781_v58 }
 0x696   :  { %v3766_v24 = vpop.f32.mrf.mxu1 }
 0x697   :  { %v3767_v48 = vadd.f32 %v3985_v55, %v3766_v24 }
 0x699   :  { %v3774_v61 = vadd.f32 %v3767_v48, %v6618_v46 }
 0x69b   :  { %v3784_v26 = vsel %vm82_vm0, %v3774_v61, 0.0 }
 0x69c   :  { %3785 = vadd.xlane.f32.xlu0 %v3784_v26 }
 0x6a3   :  { %v3769_v13 = vpop.f32.mrf.mxu1 }
 0x6a4   :  { %v3770_v17 = vadd.f32 %v3985_v55, %v3769_v13 }
 0x6a6   :  { %v3775_v59 = vadd.f32 %v3770_v17, %v6623_v33 }
 0x6a8   :  { %v3787_v54 = vsel %vm82_vm0, %v3775_v59, 0.0 }
 0x6a9   :  { %3788 = vadd.xlane.f32.xlu1 %v3787_v54 }
 0x6ff   :  { %v3780_v14 = vpop.xlane.xlu1 %3779 }
 0x700   :  { %v3790_v53 = vmul.f32 %v3780_v14, %v6564_v45 }
 0x702   :  { %v3794_v9 = vsub.f32 %v3772_v0, %v3790_v53 }
 0x704   :  { %v3798_v1 = vmul.f32 %v3794_v9, %v3794_v9 }
 0x706   :  { %v3802_v12 = vsel %vm82_vm0, %v3798_v1, 0.0 }
 0x707   :  { %3803 = vadd.xlane.f32.xlu2 %v3802_v12  ;;  %v3783_v60 = vpop.xlane.xlu2 %3782 }
 0x708   :  { %v3791_v46 = vmul.f32 %v3783_v60, %v6564_v45 }
 0x70a   :  { %v3795_v7 = vsub.f32 %v3773_v6, %v3791_v46 }
 0x70c   :  { %v3799_v15 = vmul.f32 %v3795_v7, %v3795_v7 }
 0x70e   :  { %v3805_v37 = vsel %vm82_vm0, %v3799_v15, 0.0 }
 0x70f   :  { %v3786_v23 = vpop.xlane.xlu0 %3785  ;;  %3806 = vadd.xlane.f32.xlu0 %v3805_v37 }
 0x710   :  { %v3792_v33 = vmul.f32 %v3786_v23, %v6564_v45 }
 0x712   :  { %v6674_v3 = vsub.f32 %v3774_v61, %v3792_v33 }
 0x714   :  { %v3800_v49 = vmul.f32 %v6674_v3, %v6674_v3 }
 0x716   :  { %v3808_v5 = vsel %vm82_vm0, %v3800_v49, 0.0 }
 0x717   :  { %3809 = vadd.xlane.f32.xlu1 %v3808_v5 }
 0x71c   :  { %v3789_v57 = vpop.xlane.xlu1 %3788 }
 0x71d   :  { %v3793_v63 = vmul.f32 %v3789_v57, %v6564_v45 }
 0x71f   :  { %v6680_v28 = vsub.f32 %v3775_v59, %v3793_v63 }
 0x721   :  { %v3801_v44 = vmul.f32 %v6680_v28, %v6680_v28 }
 0x723   :  { %v3811_v21 = vsel %vm82_vm0, %v3801_v44, 0.0 }
 0x724   :  { %3812 = vadd.xlane.f32.xlu2 %v3811_v21 }
 0x77a   :  { %v3804_v20 = vpop.xlane.xlu2 %3803 }
 0x77b   :  { %v3814_v2 = vmul.f32 %v3804_v20, %v6564_v45 }
 0x77d   :  { %v3818_v31 = vadd.f32 1e-05, %v3814_v2 }
 0x77f   :  { %4214 = vrsqrt.f32 %v3818_v31  ;;  %vm3828_vm4 = vweird.f32 %v3818_v31 }
 0x782   :  { %v3807_v47 = vpop.xlane.xlu0 %3806 }
 0x783   :  { %v3815_v41 = vmul.f32 %v3807_v47, %v6564_v45 }
 0x785   :  { %v4215_v10 = vpop.eup %4214  ;;  %v3819_v38 = vadd.f32 1e-05, %v3815_v41 }
 0x786   :  { %v3823_v32 = vmul.f32 %v4215_v10, %v3818_v31  ;;  %vm3829_vm3 = vweird.f32 %v4215_v10 }
 0x787   :  { %4216 = vrsqrt.f32 %v3819_v38  ;;  %vm3830_vm5 = vmor %vm3828_vm4, %vm3829_vm3  ;;  %vm3838_vm7 = vweird.f32 %v3819_v38 }
 0x788   :  { %v3824_v8 = vmul.f32 %v4215_v10, %v3823_v32 }
 0x78a   :  { %v3825_v36 = vmul.f32 0.5, %v3824_v8  ;;  %v3810_v29 = vpop.xlane.xlu1 %3809 }
 0x78b   :  { %v3816_v22 = vmul.f32 %v3810_v29, %v6564_v45 }
 0x78c   :  { %v3826_v34 = vsub.f32 1.5, %v3825_v36 }
 0x78d   :  { %v4217_v52 = vpop.eup %4216  ;;  %v3820_v11 = vadd.f32 1e-05, %v3816_v22 }
 0x78e   :  { %v3827_v42 = vmul.f32 %v4215_v10, %v3826_v34  ;;  %v3833_v51 = vmul.f32 %v4217_v52, %v3819_v38  ;;  %vm3839_vm6 = vweird.f32 %v4217_v52 }
 0x78f   :  { %4218 = vrsqrt.f32 %v3820_v11  ;;  %vm3840_vm8 = vmor %vm3838_vm7, %vm3839_vm6  ;;  %vm3848_vm10 = vweird.f32 %v3820_v11 }
 0x790   :  { %v3831_v18 = vsel %vm3830_vm5, %v4215_v10, %v3827_v42  ;;  %v3834_v30 = vmul.f32 %v4217_v52, %v3833_v51 }
 0x791   :  { %v3862_v62 = vmul.f32 %v3831_v18, %v3794_v9 }
 0x792   :  { %v3835_v40 = vmul.f32 0.5, %v3834_v30 }
 0x793   :  { %v3869_v39 = vmul.f32 %v3986_v19, %v3862_v62 }
 0x794   :  { %v3836_v4 = vsub.f32 1.5, %v3835_v40 }
 0x795   :  { %v4219_v16 = vpop.eup %4218  ;;  %v3876_v55 = vadd.f32 %v3987_v25, %v3869_v39 }
 0x796   :  { %v3837_v56 = vmul.f32 %v4217_v52, %v3836_v4  ;;  %v3843_v43 = vmul.f32 %v4219_v16, %v3820_v11  ;;  %vm3849_vm9 = vweird.f32 %v4219_v16 }
 0x797   :  { %3880 = vst.msk [vmem:[%s6736_s23] sm:$0xff] %vm82_vm0, %v3876_v55  ;;  %v3813_v0 = vpop.xlane.xlu2 %3812  ;;  %vm3850_vm11 = vmor %vm3848_vm10, %vm3849_vm9 }
 0x798   :  { %v3841_v27 = vsel %vm3840_vm8, %v4217_v52, %v3837_v56  ;;  %v3844_v50 = vmul.f32 %v4219_v16, %v3843_v43  ;;  %v3817_v35 = vmul.f32 %v3813_v0, %v6564_v45 }
 0x799   :  { %v3863_v6 = vmul.f32 %v3841_v27, %v3795_v7 }
 0x79a   :  { %v3845_v58 = vmul.f32 0.5, %v3844_v50  ;;  %v3821_v24 = vadd.f32 1e-05, %v3817_v35 }
 0x79b   :  { %v3870_v48 = vmul.f32 %v3986_v19, %v3863_v6 }
 0x79c   :  { %v3846_v61 = vsub.f32 1.5, %v3845_v58  ;;  %4220 = vrsqrt.f32 %v3821_v24  ;;  %vm3858_vm13 = vweird.f32 %v3821_v24 }
 0x79d   :  { %v3877_v26 = vadd.f32 %v3987_v25, %v3870_v48 }
 0x79e   :  { %v3847_v13 = vmul.f32 %v4219_v16, %v3846_v61 }
 0x79f   :  { %3881 = vst.msk [vmem:[%s6736_s23 + $0x8] sm:$0xff] %vm82_vm0, %v3877_v26 }
 0x7a0   :  { %v3851_v17 = vsel %vm3850_vm11, %v4219_v16, %v3847_v13 }
 0x7a1   :  { %v3864_v59 = vmul.f32 %v3851_v17, %v6674_v3 }
 0x7a2   :  { %v4221_v45 = vpop.eup %4220 }
 0x7a3   :  { %v3871_v54 = vmul.f32 %v3986_v19, %v3864_v59  ;;  %v3853_v14 = vmul.f32 %v4221_v45, %v3821_v24  ;;  %vm3859_vm12 = vweird.f32 %v4221_v45 }
 0x7a4   :  { %vm3860_vm14 = vmor %vm3858_vm13, %vm3859_vm12 }
 0x7a5   :  { %v3878_v53 = vadd.f32 %v3987_v25, %v3871_v54  ;;  %v3854_v9 = vmul.f32 %v4221_v45, %v3853_v14 }
 0x7a7   :  { %3882 = vst.msk [vmem:[%s6736_s23 + $0x10] sm:$0xff] %vm82_vm0, %v3878_v53  ;;  %v3855_v1 = vmul.f32 0.5, %v3854_v9 }
 0x7a9   :  { %v3856_v12 = vsub.f32 1.5, %v3855_v1 }
 0x7ab   :  { %v3857_v60 = vmul.f32 %v4221_v45, %v3856_v12 }
 0x7ad   :  { %v3861_v46 = vsel %vm3860_vm14, %v4221_v45, %v3857_v60 }
 0x7ae   :  { %v3865_v7 = vmul.f32 %v3861_v46, %v6680_v28 }
 0x7b0   :  { %v3872_v15 = vmul.f32 %v3986_v19, %v3865_v7 }
 0x7b2   :  { %v3879_v37 = vadd.f32 %v3987_v25, %v3872_v15 }
 0x7b4   :  { %3883 = vst.msk [vmem:[%s6736_s23 + $0x18] sm:$0xff] %vm82_vm0, %v3879_v37 }

</bundles_post_ra>
